<compile_context>
chip_gen: v7x
topology: tpu7x:2x2x1
jax: 0.10.0
libtpu: 0.0.40
codegen_flags: <defaults>
</compile_context>

<pallas_src>
import functools

import jax
import jax.numpy as jnp
from jax.experimental import pallas as pl
from jax.experimental.pallas import tpu as pltpu


# ----------------------------------------------------------------------------
# Fused forward kernel: all GRU layers/directions + FC head in one invocation
# ----------------------------------------------------------------------------
def _fused_kernel(x_ref, mask_ref, *args, T, B, E, H, num_layers, dirs, n_fc):
    G = 3 * H
    n_gru = num_layers * dirs * 4          # (w_ih, w_hh, b_i, b_hn) per (layer, dir)
    n_fcr = 2 * n_fc + 2                   # fc (w, b) pairs + last_fc (w, b)
    gru_refs = args[:n_gru]
    fc_refs = args[n_gru:n_gru + n_fcr]
    out_ref = args[n_gru + n_fcr]
    scratch = args[n_gru + n_fcr + 1:]
    gi_ref = scratch[0]                    # [T, B, 3H] input-projection buffer
    seq_refs = scratch[1:]                 # 2*dirs buffers of [T, B, H]: two ping-pong banks

    finals = []
    for l in range(num_layers):
        bank = l % 2
        out_bank = seq_refs[bank * dirs:(bank + 1) * dirs]
        in_bank = seq_refs[(1 - bank) * dirs:(2 - bank) * dirs]   # only used for l > 0
        finals = []                        # classifier uses the LAST layer's finals
        for d in range(dirs):
            base = (l * dirs + d) * 4
            w_ih = gru_refs[base][...]     # [D_in, 3H]
            w_hh = gru_refs[base + 1][...] # [H, 3H]
            b_i = gru_refs[base + 2][...]  # [1, 3H]   (b_ih with r/z parts pre-summed with b_hh)
            b_hn = gru_refs[base + 3][...] # [1, H]    (b_hh for the n gate, kept inside r*(.))

            # ---- input projection for ALL timesteps at once (hoisted out of the
            #      recurrence: one large MXU matmul instead of T small ones) ----
            if l == 0:
                gi = jnp.dot(x_ref[...].reshape(T * B, E), w_ih,
                             preferred_element_type=jnp.float32)
            else:
                gi = jnp.dot(in_bank[0][...].reshape(T * B, H), w_ih[:H],
                             preferred_element_type=jnp.float32)
                for dd in range(1, dirs):
                    gi = gi + jnp.dot(in_bank[dd][...].reshape(T * B, H),
                                      w_ih[dd * H:(dd + 1) * H],
                                      preferred_element_type=jnp.float32)
            gi_ref[...] = (gi + b_i).reshape(T, B, G)

            reverse = (d == 1)
            write_seq = (l < num_layers - 1)   # last layer: only finals are needed
            out_buf = out_bank[d]

            def step_fn(s, h, _rev=reverse, _write=write_seq, _out=out_buf,
                        _whh=w_hh, _bhn=b_hn):
                t = (T - 1 - s) if _rev else s
                gi_t = gi_ref[t]                                        # [B, 3H]
                gh = jnp.dot(h, _whh, preferred_element_type=jnp.float32)  # [B, 3H]
                r = jax.nn.sigmoid(gi_t[:, :H] + gh[:, :H])
                z = jax.nn.sigmoid(gi_t[:, H:2 * H] + gh[:, H:2 * H])
                n = jnp.tanh(gi_t[:, 2 * H:] + r * (gh[:, 2 * H:] + _bhn))
                h_new = (1.0 - z) * n + z * h
                m = mask_ref[t]                       # [B, 1]; 1.0 while t < length
                h_upd = h + m * (h_new - h)           # hold h on padded steps (packed seq)
                if _write:
                    _out[t] = h_upd                   # per-timestep output for next layer
                return h_upd

            h_final = jax.lax.fori_loop(0, T, step_fn,
                                        jnp.zeros((B, H), jnp.float32),
                                        unroll=True)
            finals.append(h_final)

    hidden = finals[0] if dirs == 1 else jnp.concatenate(finals, axis=-1)  # [B, dirs*H]

    # FC stack (bare Linears, as in the reference nn.Sequential) + last_fc
    for i in range(n_fc + 1):
        w = fc_refs[2 * i][...]
        b = fc_refs[2 * i + 1][...]
        hidden = jnp.dot(hidden, w, preferred_element_type=jnp.float32) + b
    out_ref[...] = hidden                                                  # [B, 1]


# ----------------------------------------------------------------------------
# Parameters (deterministic, in-script), gate-stacked layout
# ----------------------------------------------------------------------------
def init_params(key, *, num_embeddings, padding_idx, embedding_dim, rnn_hidden_dim,
                rnn_num_layers, rnn_bidirectional, fc_hidden_dim, fc_num_layers):
    k = [key]

    def nxt():
        k[0], sub = jax.random.split(k[0])
        return sub

    H = rnn_hidden_dim
    scale = 1.0 / (H ** 0.5)

    emb = 0.1 * jax.random.normal(nxt(), (num_embeddings, embedding_dim), jnp.float32)
    emb = emb.at[padding_idx].set(0.0)        # nn.Embedding zeros the padding_idx row

    dirs = 2 if rnn_bidirectional else 1
    gru = []
    for layer_idx in range(rnn_num_layers):
        d_in = embedding_dim if layer_idx == 0 else H * dirs
        layer = []
        for _ in range(dirs):
            w_ih = jax.random.uniform(nxt(), (d_in, 3 * H), jnp.float32, -scale, scale)
            w_hh = jax.random.uniform(nxt(), (H, 3 * H), jnp.float32, -scale, scale)
            b_ih = jax.random.uniform(nxt(), (1, 3 * H), jnp.float32, -scale, scale)
            b_hh = jax.random.uniform(nxt(), (1, 3 * H), jnp.float32, -scale, scale)
            # merge r/z biases (they always appear summed); keep b_hh_n separate
            # since it lives inside r * (gh_n + b_hh_n) in the GRU equations.
            b_i = jnp.concatenate(
                [b_ih[:, :2 * H] + b_hh[:, :2 * H], b_ih[:, 2 * H:]], axis=1)
            b_hn = b_hh[:, 2 * H:]
            layer.append((w_ih, w_hh, b_i, b_hn))
        gru.append(layer)

    fcs = []
    d_in = H * dirs
    for _ in range(fc_num_layers):
        w = jax.random.uniform(nxt(), (d_in, fc_hidden_dim), jnp.float32, -scale, scale)
        b = jax.random.uniform(nxt(), (1, fc_hidden_dim), jnp.float32, -scale, scale)
        fcs.append((w, b))
        d_in = fc_hidden_dim

    last_w = jax.random.uniform(nxt(), (d_in, 1), jnp.float32, -scale, scale)
    last_b = jax.random.uniform(nxt(), (1, 1), jnp.float32, -scale, scale)

    return {"embedding": emb, "gru": gru, "fcs": fcs, "last_fc": (last_w, last_b)}


# ----------------------------------------------------------------------------
# Forward pass (mirrors SentimentModel.forward, eval mode)
# ----------------------------------------------------------------------------
def sentiment_forward(params, text, text_lengths):
    B, T = text.shape
    E = params["embedding"].shape[1]
    H = params["gru"][0][0][1].shape[0]            # w_hh: [H, 3H]
    num_layers = len(params["gru"])
    dirs = len(params["gru"][0])
    n_fc = len(params["fcs"])

    # embedding lookup is a data-dependent gather: plain-JAX glue outside the kernel
    emb = params["embedding"][text]                              # [B, T, E]
    x = jnp.transpose(emb, (1, 0, 2)).astype(jnp.float32)        # [T, B, E] time-major

    # pad batch to a multiple of 8 sublanes; padded rows get length 0 so the GRU
    # never updates them, and they are sliced away after the kernel.
    B_pad = ((B + 7) // 8) * 8
    if B_pad != B:
        x = jnp.pad(x, ((0, 0), (0, B_pad - B), (0, 0)))
    lengths = jnp.pad(text_lengths.astype(jnp.int32), (0, B_pad - B))
    # precompute the validity mask once: [T, B_pad, 1], 1.0 while t < length
    mask = (jnp.arange(T)[:, None] < lengths[None, :]).astype(jnp.float32)[:, :, None]

    weights = []
    for layer in params["gru"]:
        for tensors in layer:
            weights.extend(tensors)
    for w, b in params["fcs"]:
        weights.extend((w, b))
    weights.extend(params["last_fc"])

    kernel = functools.partial(_fused_kernel, T=T, B=B_pad, E=E, H=H,
                               num_layers=num_layers, dirs=dirs, n_fc=n_fc)

    def full_spec(arr):
        nd = arr.ndim
        return pl.BlockSpec(arr.shape, lambda i, _n=nd: (0,) * _n)

    out = pl.pallas_call(
        kernel,
        out_shape=jax.ShapeDtypeStruct((B_pad, 1), jnp.float32),
        grid=(1,),
        in_specs=[full_spec(x), full_spec(mask)] + [full_spec(w) for w in weights],
        out_specs=pl.BlockSpec((B_pad, 1), lambda i: (0, 0)),
        scratch_shapes=[pltpu.VMEM((T, B_pad, 3 * H), jnp.float32)]        # gi buffer
                       + [pltpu.VMEM((T, B_pad, H), jnp.float32)           # 2 ping-pong banks
                          for _ in range(2 * dirs)],                       # of dirs buffers each
        compiler_params=pltpu.CompilerParams(
            dimension_semantics=("arbitrary",)),
    )(x, mask, *weights)

    return out[:B, 0]                                             # squeeze(1) -> [B]


# ----------------------------------------------------------------------------
if __name__ == "__main__":
    # model hyperparameters (small, consistent with the module's __init__)
    NUM_EMBEDDINGS = 50
    PADDING_IDX = 0
    EMBEDDING_DIM = 32
    RNN_HIDDEN_DIM = 32
    RNN_NUM_LAYERS = 2
    RNN_BIDIRECTIONAL = True
    FC_HIDDEN_DIM = 32
    FC_NUM_LAYERS = 2

    B, T = 2, 8

    key = jax.random.PRNGKey(0)
    pkey, tkey = jax.random.split(key)

    params = init_params(
        pkey,
        num_embeddings=NUM_EMBEDDINGS,
        padding_idx=PADDING_IDX,
        embedding_dim=EMBEDDING_DIM,
        rnn_hidden_dim=RNN_HIDDEN_DIM,
        rnn_num_layers=RNN_NUM_LAYERS,
        rnn_bidirectional=RNN_BIDIRECTIONAL,
        fc_hidden_dim=FC_HIDDEN_DIM,
        fc_num_layers=FC_NUM_LAYERS,
    )

    # token ids (avoid padding_idx for real tokens), lengths sorted descending
    # (pack_padded_sequence default enforce_sorted=True)
    text = jax.random.randint(tkey, (B, T), 1, NUM_EMBEDDINGS, dtype=jnp.int32)
    text_lengths = jnp.array([8, 5], dtype=jnp.int32)
    # zero out padded positions with padding_idx, as real packed data would be
    pos = jnp.arange(T)[None, :]
    text = jnp.where(pos < text_lengths[:, None], text, PADDING_IDX)

    out = sentiment_forward(params, text, text_lengths)
    out = jax.block_until_ready(out)

    assert out.shape == (B,), out.shape
    assert out.dtype == jnp.float32
    print("KERNEL_OK")
</pallas_src>

<mosaic_0001>
module attributes {stable_mosaic.version = 11 : i64} {
  func.func @_fused_kernel(%arg0: i32, %arg1: memref<8x8x32xf32, #tpu.memory_space<vmem>>, %arg2: memref<8x8x1xf32, #tpu.memory_space<vmem>>, %arg3: memref<32x96xf32, #tpu.memory_space<vmem>>, %arg4: memref<32x96xf32, #tpu.memory_space<vmem>>, %arg5: memref<1x96xf32, #tpu.memory_space<vmem>>, %arg6: memref<1x32xf32, #tpu.memory_space<vmem>>, %arg7: memref<32x96xf32, #tpu.memory_space<vmem>>, %arg8: memref<32x96xf32, #tpu.memory_space<vmem>>, %arg9: memref<1x96xf32, #tpu.memory_space<vmem>>, %arg10: memref<1x32xf32, #tpu.memory_space<vmem>>, %arg11: memref<64x96xf32, #tpu.memory_space<vmem>>, %arg12: memref<32x96xf32, #tpu.memory_space<vmem>>, %arg13: memref<1x96xf32, #tpu.memory_space<vmem>>, %arg14: memref<1x32xf32, #tpu.memory_space<vmem>>, %arg15: memref<64x96xf32, #tpu.memory_space<vmem>>, %arg16: memref<32x96xf32, #tpu.memory_space<vmem>>, %arg17: memref<1x96xf32, #tpu.memory_space<vmem>>, %arg18: memref<1x32xf32, #tpu.memory_space<vmem>>, %arg19: memref<64x32xf32, #tpu.memory_space<vmem>>, %arg20: memref<1x32xf32, #tpu.memory_space<vmem>>, %arg21: memref<32x32xf32, #tpu.memory_space<vmem>>, %arg22: memref<1x32xf32, #tpu.memory_space<vmem>>, %arg23: memref<32x1xf32, #tpu.memory_space<vmem>>, %arg24: memref<1x1xf32, #tpu.memory_space<vmem>>, %arg25: memref<8x1xf32, #tpu.memory_space<vmem>>, %arg26: memref<8x8x96xf32, #tpu.memory_space<vmem>>, %arg27: memref<8x8x32xf32, #tpu.memory_space<vmem>>, %arg28: memref<8x8x32xf32, #tpu.memory_space<vmem>>, %arg29: memref<8x8x32xf32, #tpu.memory_space<vmem>>, %arg30: memref<8x8x32xf32, #tpu.memory_space<vmem>>) attributes {dimension_semantics = [#tpu.dimension_semantics<arbitrary>], iteration_bounds = array<i64: 1>, scalar_prefetch = 0 : i64, scratch_operands = 5 : i64, tpu.core_type = #tpu.core_type<tc>, window_params = [{pipeline_mode = #tpu.pipeline_mode<synchronous>, transform_indices = @transform_0, window_bounds = array<i64: 8, 8, 32>}, {pipeline_mode = #tpu.pipeline_mode<synchronous>, transform_indices = @transform_1, window_bounds = array<i64: 8, 8, 1>}, {pipeline_mode = #tpu.pipeline_mode<synchronous>, transform_indices = @transform_2, window_bounds = array<i64: 32, 96>}, {pipeline_mode = #tpu.pipeline_mode<synchronous>, transform_indices = @transform_3, window_bounds = array<i64: 32, 96>}, {pipeline_mode = #tpu.pipeline_mode<synchronous>, transform_indices = @transform_4, window_bounds = array<i64: 1, 96>}, {pipeline_mode = #tpu.pipeline_mode<synchronous>, transform_indices = @transform_5, window_bounds = array<i64: 1, 32>}, {pipeline_mode = #tpu.pipeline_mode<synchronous>, transform_indices = @transform_6, window_bounds = array<i64: 32, 96>}, {pipeline_mode = #tpu.pipeline_mode<synchronous>, transform_indices = @transform_7, window_bounds = array<i64: 32, 96>}, {pipeline_mode = #tpu.pipeline_mode<synchronous>, transform_indices = @transform_8, window_bounds = array<i64: 1, 96>}, {pipeline_mode = #tpu.pipeline_mode<synchronous>, transform_indices = @transform_9, window_bounds = array<i64: 1, 32>}, {pipeline_mode = #tpu.pipeline_mode<synchronous>, transform_indices = @transform_10, window_bounds = array<i64: 64, 96>}, {pipeline_mode = #tpu.pipeline_mode<synchronous>, transform_indices = @transform_11, window_bounds = array<i64: 32, 96>}, {pipeline_mode = #tpu.pipeline_mode<synchronous>, transform_indices = @transform_12, window_bounds = array<i64: 1, 96>}, {pipeline_mode = #tpu.pipeline_mode<synchronous>, transform_indices = @transform_13, window_bounds = array<i64: 1, 32>}, {pipeline_mode = #tpu.pipeline_mode<synchronous>, transform_indices = @transform_14, window_bounds = array<i64: 64, 96>}, {pipeline_mode = #tpu.pipeline_mode<synchronous>, transform_indices = @transform_15, window_bounds = array<i64: 32, 96>}, {pipeline_mode = #tpu.pipeline_mode<synchronous>, transform_indices = @transform_16, window_bounds = array<i64: 1, 96>}, {pipeline_mode = #tpu.pipeline_mode<synchronous>, transform_indices = @transform_17, window_bounds = array<i64: 1, 32>}, {pipeline_mode = #tpu.pipeline_mode<synchronous>, transform_indices = @transform_18, window_bounds = array<i64: 64, 32>}, {pipeline_mode = #tpu.pipeline_mode<synchronous>, transform_indices = @transform_19, window_bounds = array<i64: 1, 32>}, {pipeline_mode = #tpu.pipeline_mode<synchronous>, transform_indices = @transform_20, window_bounds = array<i64: 32, 32>}, {pipeline_mode = #tpu.pipeline_mode<synchronous>, transform_indices = @transform_21, window_bounds = array<i64: 1, 32>}, {pipeline_mode = #tpu.pipeline_mode<synchronous>, transform_indices = @transform_22, window_bounds = array<i64: 32, 1>}, {pipeline_mode = #tpu.pipeline_mode<synchronous>, transform_indices = @transform_23, window_bounds = array<i64: 1, 1>}, {pipeline_mode = #tpu.pipeline_mode<synchronous>, transform_indices = @transform_24, window_bounds = array<i64: 8, 1>}]} {
    %c0 = arith.constant 0 : index
    %c0_0 = arith.constant 0 : index
    %0 = vector.load %arg3[%c0, %c0_0] : memref<32x96xf32, #tpu.memory_space<vmem>>, vector<32x96xf32>
    %c0_1 = arith.constant 0 : index
    %c0_2 = arith.constant 0 : index
    %1 = vector.load %arg4[%c0_1, %c0_2] : memref<32x96xf32, #tpu.memory_space<vmem>>, vector<32x96xf32>
    %c0_3 = arith.constant 0 : index
    %c0_4 = arith.constant 0 : index
    %2 = vector.load %arg5[%c0_3, %c0_4] : memref<1x96xf32, #tpu.memory_space<vmem>>, vector<1x96xf32>
    %c0_5 = arith.constant 0 : index
    %c0_6 = arith.constant 0 : index
    %3 = vector.load %arg6[%c0_5, %c0_6] : memref<1x32xf32, #tpu.memory_space<vmem>>, vector<1x32xf32>
    %c0_7 = arith.constant 0 : index
    %c0_8 = arith.constant 0 : index
    %c0_9 = arith.constant 0 : index
    %4 = vector.load %arg1[%c0_7, %c0_8, %c0_9] : memref<8x8x32xf32, #tpu.memory_space<vmem>>, vector<8x8x32xf32>
    %5 = vector.shape_cast %4 : vector<8x8x32xf32> to vector<64x32xf32>
    %cst = arith.constant dense<0.000000e+00> : vector<64x96xf32>
    %6 = tpu.matmul %5, %0, %cst {dimension_numbers = #tpu.dot_dimension_numbers<[1], [0], [0], [1], [0, 0, 1, 1], [], []>} : vector<64x32xf32>, vector<32x96xf32>, vector<64x96xf32> -> vector<64x96xf32>
    %7 = vector.broadcast %2 : vector<1x96xf32> to vector<64x96xf32>
    %8 = arith.addf %6, %7 : vector<64x96xf32>
    %9 = vector.shape_cast %8 : vector<64x96xf32> to vector<8x8x96xf32>
    %c0_10 = arith.constant 0 : index
    %c0_11 = arith.constant 0 : index
    %c0_12 = arith.constant 0 : index
    %10 = vector.load %arg26[%c0_10, %c0_11, %c0_12] : memref<8x8x96xf32, #tpu.memory_space<vmem>>, vector<8x8x96xf32>
    tpu.vector_store %arg26[%c0_10, %c0_11, %c0_12], %9 {strides = array<i32>} : memref<8x8x96xf32, #tpu.memory_space<vmem>>, vector<8x8x96xf32>,
    %cst_13 = arith.constant 0.000000e+00 : f32
    %11 = vector.broadcast %cst_13 : f32 to vector<8x32xf32>
    %c0_i32 = arith.constant 0 : i32
    %12 = arith.index_cast %c0_i32 : i32 to index
    %c0_14 = arith.constant 0 : index
    %c0_15 = arith.constant 0 : index
    %13 = vector.load %arg26[%12, %c0_14, %c0_15] : memref<8x8x96xf32, #tpu.memory_space<vmem>>, vector<1x8x96xf32>
    %14 = vector.shape_cast %13 : vector<1x8x96xf32> to vector<8x96xf32>
    %cst_16 = arith.constant dense<0.000000e+00> : vector<8x96xf32>
    %15 = tpu.matmul %11, %1, %cst_16 {dimension_numbers = #tpu.dot_dimension_numbers<[1], [0], [0], [1], [0, 0, 1, 1], [], []>} : vector<8x32xf32>, vector<32x96xf32>, vector<8x96xf32> -> vector<8x96xf32>
    %16 = vector.extract_strided_slice %14 {offsets = [0, 0], sizes = [8, 32], strides = [1, 1]} : vector<8x96xf32> to vector<8x32xf32>
    %17 = vector.extract_strided_slice %15 {offsets = [0, 0], sizes = [8, 32], strides = [1, 1]} : vector<8x96xf32> to vector<8x32xf32>
    %18 = arith.addf %16, %17 : vector<8x32xf32>
    %19 = arith.negf %18 : vector<8x32xf32>
    %20 = math.exp %19 : vector<8x32xf32>
    %cst_17 = arith.constant 1.000000e+00 : f32
    %21 = vector.broadcast %cst_17 : f32 to vector<8x32xf32>
    %22 = arith.addf %21, %20 : vector<8x32xf32>
    %23 = arith.divf %21, %22 : vector<8x32xf32>
    %24 = vector.extract_strided_slice %14 {offsets = [0, 32], sizes = [8, 32], strides = [1, 1]} : vector<8x96xf32> to vector<8x32xf32>
    %25 = vector.extract_strided_slice %15 {offsets = [0, 32], sizes = [8, 32], strides = [1, 1]} : vector<8x96xf32> to vector<8x32xf32>
    %26 = arith.addf %24, %25 : vector<8x32xf32>
    %27 = arith.negf %26 : vector<8x32xf32>
    %28 = math.exp %27 : vector<8x32xf32>
    %cst_18 = arith.constant 1.000000e+00 : f32
    %29 = vector.broadcast %cst_18 : f32 to vector<8x32xf32>
    %30 = arith.addf %29, %28 : vector<8x32xf32>
    %31 = arith.divf %29, %30 : vector<8x32xf32>
    %32 = vector.extract_strided_slice %14 {offsets = [0, 64], sizes = [8, 32], strides = [1, 1]} : vector<8x96xf32> to vector<8x32xf32>
    %33 = vector.extract_strided_slice %15 {offsets = [0, 64], sizes = [8, 32], strides = [1, 1]} : vector<8x96xf32> to vector<8x32xf32>
    %34 = vector.broadcast %3 : vector<1x32xf32> to vector<8x32xf32>
    %35 = arith.addf %33, %34 : vector<8x32xf32>
    %36 = arith.mulf %23, %35 : vector<8x32xf32>
    %37 = arith.addf %32, %36 : vector<8x32xf32>
    %38 = math.tanh %37 : vector<8x32xf32>
    %cst_19 = arith.constant 1.000000e+00 : f32
    %39 = vector.broadcast %cst_19 : f32 to vector<8x32xf32>
    %40 = arith.subf %39, %31 : vector<8x32xf32>
    %41 = arith.mulf %40, %38 : vector<8x32xf32>
    %42 = arith.mulf %31, %11 : vector<8x32xf32>
    %43 = arith.addf %41, %42 : vector<8x32xf32>
    %44 = arith.index_cast %c0_i32 : i32 to index
    %c0_20 = arith.constant 0 : index
    %c0_21 = arith.constant 0 : index
    %45 = vector.load %arg2[%44, %c0_20, %c0_21] : memref<8x8x1xf32, #tpu.memory_space<vmem>>, vector<1x8x1xf32>
    %46 = vector.shape_cast %45 : vector<1x8x1xf32> to vector<8x1xf32>
    %47 = arith.subf %43, %11 : vector<8x32xf32>
    %48 = vector.broadcast %46 : vector<8x1xf32> to vector<8x32xf32>
    %49 = arith.mulf %48, %47 : vector<8x32xf32>
    %50 = arith.addf %11, %49 : vector<8x32xf32>
    %51 = arith.index_cast %c0_i32 : i32 to index
    %c0_22 = arith.constant 0 : index
    %c0_23 = arith.constant 0 : index
    %52 = vector.load %arg27[%51, %c0_22, %c0_23] : memref<8x8x32xf32, #tpu.memory_space<vmem>>, vector<1x8x32xf32>
    %53 = vector.shape_cast %52 : vector<1x8x32xf32> to vector<8x32xf32>
    %54 = vector.shape_cast %50 : vector<8x32xf32> to vector<1x8x32xf32>
    tpu.vector_store %arg27[%51, %c0_22, %c0_23], %54 {strides = array<i32>} : memref<8x8x32xf32, #tpu.memory_space<vmem>>, vector<1x8x32xf32>,
    %c1_i32 = arith.constant 1 : i32
    %55 = arith.index_cast %c1_i32 : i32 to index
    %c0_24 = arith.constant 0 : index
    %c0_25 = arith.constant 0 : index
    %56 = vector.load %arg26[%55, %c0_24, %c0_25] : memref<8x8x96xf32, #tpu.memory_space<vmem>>, vector<1x8x96xf32>
    %57 = vector.shape_cast %56 : vector<1x8x96xf32> to vector<8x96xf32>
    %cst_26 = arith.constant dense<0.000000e+00> : vector<8x96xf32>
    %58 = tpu.matmul %50, %1, %cst_26 {dimension_numbers = #tpu.dot_dimension_numbers<[1], [0], [0], [1], [0, 0, 1, 1], [], []>} : vector<8x32xf32>, vector<32x96xf32>, vector<8x96xf32> -> vector<8x96xf32>
    %59 = vector.extract_strided_slice %57 {offsets = [0, 0], sizes = [8, 32], strides = [1, 1]} : vector<8x96xf32> to vector<8x32xf32>
    %60 = vector.extract_strided_slice %58 {offsets = [0, 0], sizes = [8, 32], strides = [1, 1]} : vector<8x96xf32> to vector<8x32xf32>
    %61 = arith.addf %59, %60 : vector<8x32xf32>
    %62 = arith.negf %61 : vector<8x32xf32>
    %63 = math.exp %62 : vector<8x32xf32>
    %cst_27 = arith.constant 1.000000e+00 : f32
    %64 = vector.broadcast %cst_27 : f32 to vector<8x32xf32>
    %65 = arith.addf %64, %63 : vector<8x32xf32>
    %66 = arith.divf %64, %65 : vector<8x32xf32>
    %67 = vector.extract_strided_slice %57 {offsets = [0, 32], sizes = [8, 32], strides = [1, 1]} : vector<8x96xf32> to vector<8x32xf32>
    %68 = vector.extract_strided_slice %58 {offsets = [0, 32], sizes = [8, 32], strides = [1, 1]} : vector<8x96xf32> to vector<8x32xf32>
    %69 = arith.addf %67, %68 : vector<8x32xf32>
    %70 = arith.negf %69 : vector<8x32xf32>
    %71 = math.exp %70 : vector<8x32xf32>
    %cst_28 = arith.constant 1.000000e+00 : f32
    %72 = vector.broadcast %cst_28 : f32 to vector<8x32xf32>
    %73 = arith.addf %72, %71 : vector<8x32xf32>
    %74 = arith.divf %72, %73 : vector<8x32xf32>
    %75 = vector.extract_strided_slice %57 {offsets = [0, 64], sizes = [8, 32], strides = [1, 1]} : vector<8x96xf32> to vector<8x32xf32>
    %76 = vector.extract_strided_slice %58 {offsets = [0, 64], sizes = [8, 32], strides = [1, 1]} : vector<8x96xf32> to vector<8x32xf32>
    %77 = vector.broadcast %3 : vector<1x32xf32> to vector<8x32xf32>
    %78 = arith.addf %76, %77 : vector<8x32xf32>
    %79 = arith.mulf %66, %78 : vector<8x32xf32>
    %80 = arith.addf %75, %79 : vector<8x32xf32>
    %81 = math.tanh %80 : vector<8x32xf32>
    %cst_29 = arith.constant 1.000000e+00 : f32
    %82 = vector.broadcast %cst_29 : f32 to vector<8x32xf32>
    %83 = arith.subf %82, %74 : vector<8x32xf32>
    %84 = arith.mulf %83, %81 : vector<8x32xf32>
    %85 = arith.mulf %74, %50 : vector<8x32xf32>
    %86 = arith.addf %84, %85 : vector<8x32xf32>
    %87 = arith.index_cast %c1_i32 : i32 to index
    %c0_30 = arith.constant 0 : index
    %c0_31 = arith.constant 0 : index
    %88 = vector.load %arg2[%87, %c0_30, %c0_31] : memref<8x8x1xf32, #tpu.memory_space<vmem>>, vector<1x8x1xf32>
    %89 = vector.shape_cast %88 : vector<1x8x1xf32> to vector<8x1xf32>
    %90 = arith.subf %86, %50 : vector<8x32xf32>
    %91 = vector.broadcast %89 : vector<8x1xf32> to vector<8x32xf32>
    %92 = arith.mulf %91, %90 : vector<8x32xf32>
    %93 = arith.addf %50, %92 : vector<8x32xf32>
    %94 = arith.index_cast %c1_i32 : i32 to index
    %c0_32 = arith.constant 0 : index
    %c0_33 = arith.constant 0 : index
    %95 = vector.load %arg27[%94, %c0_32, %c0_33] : memref<8x8x32xf32, #tpu.memory_space<vmem>>, vector<1x8x32xf32>
    %96 = vector.shape_cast %95 : vector<1x8x32xf32> to vector<8x32xf32>
    %97 = vector.shape_cast %93 : vector<8x32xf32> to vector<1x8x32xf32>
    tpu.vector_store %arg27[%94, %c0_32, %c0_33], %97 {strides = array<i32>} : memref<8x8x32xf32, #tpu.memory_space<vmem>>, vector<1x8x32xf32>,
    %c2_i32 = arith.constant 2 : i32
    %98 = arith.index_cast %c2_i32 : i32 to index
    %c0_34 = arith.constant 0 : index
    %c0_35 = arith.constant 0 : index
    %99 = vector.load %arg26[%98, %c0_34, %c0_35] : memref<8x8x96xf32, #tpu.memory_space<vmem>>, vector<1x8x96xf32>
    %100 = vector.shape_cast %99 : vector<1x8x96xf32> to vector<8x96xf32>
    %cst_36 = arith.constant dense<0.000000e+00> : vector<8x96xf32>
    %101 = tpu.matmul %93, %1, %cst_36 {dimension_numbers = #tpu.dot_dimension_numbers<[1], [0], [0], [1], [0, 0, 1, 1], [], []>} : vector<8x32xf32>, vector<32x96xf32>, vector<8x96xf32> -> vector<8x96xf32>
    %102 = vector.extract_strided_slice %100 {offsets = [0, 0], sizes = [8, 32], strides = [1, 1]} : vector<8x96xf32> to vector<8x32xf32>
    %103 = vector.extract_strided_slice %101 {offsets = [0, 0], sizes = [8, 32], strides = [1, 1]} : vector<8x96xf32> to vector<8x32xf32>
    %104 = arith.addf %102, %103 : vector<8x32xf32>
    %105 = arith.negf %104 : vector<8x32xf32>
    %106 = math.exp %105 : vector<8x32xf32>
    %cst_37 = arith.constant 1.000000e+00 : f32
    %107 = vector.broadcast %cst_37 : f32 to vector<8x32xf32>
    %108 = arith.addf %107, %106 : vector<8x32xf32>
    %109 = arith.divf %107, %108 : vector<8x32xf32>
    %110 = vector.extract_strided_slice %100 {offsets = [0, 32], sizes = [8, 32], strides = [1, 1]} : vector<8x96xf32> to vector<8x32xf32>
    %111 = vector.extract_strided_slice %101 {offsets = [0, 32], sizes = [8, 32], strides = [1, 1]} : vector<8x96xf32> to vector<8x32xf32>
    %112 = arith.addf %110, %111 : vector<8x32xf32>
    %113 = arith.negf %112 : vector<8x32xf32>
    %114 = math.exp %113 : vector<8x32xf32>
    %cst_38 = arith.constant 1.000000e+00 : f32
    %115 = vector.broadcast %cst_38 : f32 to vector<8x32xf32>
    %116 = arith.addf %115, %114 : vector<8x32xf32>
    %117 = arith.divf %115, %116 : vector<8x32xf32>
    %118 = vector.extract_strided_slice %100 {offsets = [0, 64], sizes = [8, 32], strides = [1, 1]} : vector<8x96xf32> to vector<8x32xf32>
    %119 = vector.extract_strided_slice %101 {offsets = [0, 64], sizes = [8, 32], strides = [1, 1]} : vector<8x96xf32> to vector<8x32xf32>
    %120 = vector.broadcast %3 : vector<1x32xf32> to vector<8x32xf32>
    %121 = arith.addf %119, %120 : vector<8x32xf32>
    %122 = arith.mulf %109, %121 : vector<8x32xf32>
    %123 = arith.addf %118, %122 : vector<8x32xf32>
    %124 = math.tanh %123 : vector<8x32xf32>
    %cst_39 = arith.constant 1.000000e+00 : f32
    %125 = vector.broadcast %cst_39 : f32 to vector<8x32xf32>
    %126 = arith.subf %125, %117 : vector<8x32xf32>
    %127 = arith.mulf %126, %124 : vector<8x32xf32>
    %128 = arith.mulf %117, %93 : vector<8x32xf32>
    %129 = arith.addf %127, %128 : vector<8x32xf32>
    %130 = arith.index_cast %c2_i32 : i32 to index
    %c0_40 = arith.constant 0 : index
    %c0_41 = arith.constant 0 : index
    %131 = vector.load %arg2[%130, %c0_40, %c0_41] : memref<8x8x1xf32, #tpu.memory_space<vmem>>, vector<1x8x1xf32>
    %132 = vector.shape_cast %131 : vector<1x8x1xf32> to vector<8x1xf32>
    %133 = arith.subf %129, %93 : vector<8x32xf32>
    %134 = vector.broadcast %132 : vector<8x1xf32> to vector<8x32xf32>
    %135 = arith.mulf %134, %133 : vector<8x32xf32>
    %136 = arith.addf %93, %135 : vector<8x32xf32>
    %137 = arith.index_cast %c2_i32 : i32 to index
    %c0_42 = arith.constant 0 : index
    %c0_43 = arith.constant 0 : index
    %138 = vector.load %arg27[%137, %c0_42, %c0_43] : memref<8x8x32xf32, #tpu.memory_space<vmem>>, vector<1x8x32xf32>
    %139 = vector.shape_cast %138 : vector<1x8x32xf32> to vector<8x32xf32>
    %140 = vector.shape_cast %136 : vector<8x32xf32> to vector<1x8x32xf32>
    tpu.vector_store %arg27[%137, %c0_42, %c0_43], %140 {strides = array<i32>} : memref<8x8x32xf32, #tpu.memory_space<vmem>>, vector<1x8x32xf32>,
    %c3_i32 = arith.constant 3 : i32
    %141 = arith.index_cast %c3_i32 : i32 to index
    %c0_44 = arith.constant 0 : index
    %c0_45 = arith.constant 0 : index
    %142 = vector.load %arg26[%141, %c0_44, %c0_45] : memref<8x8x96xf32, #tpu.memory_space<vmem>>, vector<1x8x96xf32>
    %143 = vector.shape_cast %142 : vector<1x8x96xf32> to vector<8x96xf32>
    %cst_46 = arith.constant dense<0.000000e+00> : vector<8x96xf32>
    %144 = tpu.matmul %136, %1, %cst_46 {dimension_numbers = #tpu.dot_dimension_numbers<[1], [0], [0], [1], [0, 0, 1, 1], [], []>} : vector<8x32xf32>, vector<32x96xf32>, vector<8x96xf32> -> vector<8x96xf32>
    %145 = vector.extract_strided_slice %143 {offsets = [0, 0], sizes = [8, 32], strides = [1, 1]} : vector<8x96xf32> to vector<8x32xf32>
    %146 = vector.extract_strided_slice %144 {offsets = [0, 0], sizes = [8, 32], strides = [1, 1]} : vector<8x96xf32> to vector<8x32xf32>
    %147 = arith.addf %145, %146 : vector<8x32xf32>
    %148 = arith.negf %147 : vector<8x32xf32>
    %149 = math.exp %148 : vector<8x32xf32>
    %cst_47 = arith.constant 1.000000e+00 : f32
    %150 = vector.broadcast %cst_47 : f32 to vector<8x32xf32>
    %151 = arith.addf %150, %149 : vector<8x32xf32>
    %152 = arith.divf %150, %151 : vector<8x32xf32>
    %153 = vector.extract_strided_slice %143 {offsets = [0, 32], sizes = [8, 32], strides = [1, 1]} : vector<8x96xf32> to vector<8x32xf32>
    %154 = vector.extract_strided_slice %144 {offsets = [0, 32], sizes = [8, 32], strides = [1, 1]} : vector<8x96xf32> to vector<8x32xf32>
    %155 = arith.addf %153, %154 : vector<8x32xf32>
    %156 = arith.negf %155 : vector<8x32xf32>
    %157 = math.exp %156 : vector<8x32xf32>
    %cst_48 = arith.constant 1.000000e+00 : f32
    %158 = vector.broadcast %cst_48 : f32 to vector<8x32xf32>
    %159 = arith.addf %158, %157 : vector<8x32xf32>
    %160 = arith.divf %158, %159 : vector<8x32xf32>
    %161 = vector.extract_strided_slice %143 {offsets = [0, 64], sizes = [8, 32], strides = [1, 1]} : vector<8x96xf32> to vector<8x32xf32>
    %162 = vector.extract_strided_slice %144 {offsets = [0, 64], sizes = [8, 32], strides = [1, 1]} : vector<8x96xf32> to vector<8x32xf32>
    %163 = vector.broadcast %3 : vector<1x32xf32> to vector<8x32xf32>
    %164 = arith.addf %162, %163 : vector<8x32xf32>
    %165 = arith.mulf %152, %164 : vector<8x32xf32>
    %166 = arith.addf %161, %165 : vector<8x32xf32>
    %167 = math.tanh %166 : vector<8x32xf32>
    %cst_49 = arith.constant 1.000000e+00 : f32
    %168 = vector.broadcast %cst_49 : f32 to vector<8x32xf32>
    %169 = arith.subf %168, %160 : vector<8x32xf32>
    %170 = arith.mulf %169, %167 : vector<8x32xf32>
    %171 = arith.mulf %160, %136 : vector<8x32xf32>
    %172 = arith.addf %170, %171 : vector<8x32xf32>
    %173 = arith.index_cast %c3_i32 : i32 to index
    %c0_50 = arith.constant 0 : index
    %c0_51 = arith.constant 0 : index
    %174 = vector.load %arg2[%173, %c0_50, %c0_51] : memref<8x8x1xf32, #tpu.memory_space<vmem>>, vector<1x8x1xf32>
    %175 = vector.shape_cast %174 : vector<1x8x1xf32> to vector<8x1xf32>
    %176 = arith.subf %172, %136 : vector<8x32xf32>
    %177 = vector.broadcast %175 : vector<8x1xf32> to vector<8x32xf32>
    %178 = arith.mulf %177, %176 : vector<8x32xf32>
    %179 = arith.addf %136, %178 : vector<8x32xf32>
    %180 = arith.index_cast %c3_i32 : i32 to index
    %c0_52 = arith.constant 0 : index
    %c0_53 = arith.constant 0 : index
    %181 = vector.load %arg27[%180, %c0_52, %c0_53] : memref<8x8x32xf32, #tpu.memory_space<vmem>>, vector<1x8x32xf32>
    %182 = vector.shape_cast %181 : vector<1x8x32xf32> to vector<8x32xf32>
    %183 = vector.shape_cast %179 : vector<8x32xf32> to vector<1x8x32xf32>
    tpu.vector_store %arg27[%180, %c0_52, %c0_53], %183 {strides = array<i32>} : memref<8x8x32xf32, #tpu.memory_space<vmem>>, vector<1x8x32xf32>,
    %c4_i32 = arith.constant 4 : i32
    %184 = arith.index_cast %c4_i32 : i32 to index
    %c0_54 = arith.constant 0 : index
    %c0_55 = arith.constant 0 : index
    %185 = vector.load %arg26[%184, %c0_54, %c0_55] : memref<8x8x96xf32, #tpu.memory_space<vmem>>, vector<1x8x96xf32>
    %186 = vector.shape_cast %185 : vector<1x8x96xf32> to vector<8x96xf32>
    %cst_56 = arith.constant dense<0.000000e+00> : vector<8x96xf32>
    %187 = tpu.matmul %179, %1, %cst_56 {dimension_numbers = #tpu.dot_dimension_numbers<[1], [0], [0], [1], [0, 0, 1, 1], [], []>} : vector<8x32xf32>, vector<32x96xf32>, vector<8x96xf32> -> vector<8x96xf32>
    %188 = vector.extract_strided_slice %186 {offsets = [0, 0], sizes = [8, 32], strides = [1, 1]} : vector<8x96xf32> to vector<8x32xf32>
    %189 = vector.extract_strided_slice %187 {offsets = [0, 0], sizes = [8, 32], strides = [1, 1]} : vector<8x96xf32> to vector<8x32xf32>
    %190 = arith.addf %188, %189 : vector<8x32xf32>
    %191 = arith.negf %190 : vector<8x32xf32>
    %192 = math.exp %191 : vector<8x32xf32>
    %cst_57 = arith.constant 1.000000e+00 : f32
    %193 = vector.broadcast %cst_57 : f32 to vector<8x32xf32>
    %194 = arith.addf %193, %192 : vector<8x32xf32>
    %195 = arith.divf %193, %194 : vector<8x32xf32>
    %196 = vector.extract_strided_slice %186 {offsets = [0, 32], sizes = [8, 32], strides = [1, 1]} : vector<8x96xf32> to vector<8x32xf32>
    %197 = vector.extract_strided_slice %187 {offsets = [0, 32], sizes = [8, 32], strides = [1, 1]} : vector<8x96xf32> to vector<8x32xf32>
    %198 = arith.addf %196, %197 : vector<8x32xf32>
    %199 = arith.negf %198 : vector<8x32xf32>
    %200 = math.exp %199 : vector<8x32xf32>
    %cst_58 = arith.constant 1.000000e+00 : f32
    %201 = vector.broadcast %cst_58 : f32 to vector<8x32xf32>
    %202 = arith.addf %201, %200 : vector<8x32xf32>
    %203 = arith.divf %201, %202 : vector<8x32xf32>
    %204 = vector.extract_strided_slice %186 {offsets = [0, 64], sizes = [8, 32], strides = [1, 1]} : vector<8x96xf32> to vector<8x32xf32>
    %205 = vector.extract_strided_slice %187 {offsets = [0, 64], sizes = [8, 32], strides = [1, 1]} : vector<8x96xf32> to vector<8x32xf32>
    %206 = vector.broadcast %3 : vector<1x32xf32> to vector<8x32xf32>
    %207 = arith.addf %205, %206 : vector<8x32xf32>
    %208 = arith.mulf %195, %207 : vector<8x32xf32>
    %209 = arith.addf %204, %208 : vector<8x32xf32>
    %210 = math.tanh %209 : vector<8x32xf32>
    %cst_59 = arith.constant 1.000000e+00 : f32
    %211 = vector.broadcast %cst_59 : f32 to vector<8x32xf32>
    %212 = arith.subf %211, %203 : vector<8x32xf32>
    %213 = arith.mulf %212, %210 : vector<8x32xf32>
    %214 = arith.mulf %203, %179 : vector<8x32xf32>
    %215 = arith.addf %213, %214 : vector<8x32xf32>
    %216 = arith.index_cast %c4_i32 : i32 to index
    %c0_60 = arith.constant 0 : index
    %c0_61 = arith.constant 0 : index
    %217 = vector.load %arg2[%216, %c0_60, %c0_61] : memref<8x8x1xf32, #tpu.memory_space<vmem>>, vector<1x8x1xf32>
    %218 = vector.shape_cast %217 : vector<1x8x1xf32> to vector<8x1xf32>
    %219 = arith.subf %215, %179 : vector<8x32xf32>
    %220 = vector.broadcast %218 : vector<8x1xf32> to vector<8x32xf32>
    %221 = arith.mulf %220, %219 : vector<8x32xf32>
    %222 = arith.addf %179, %221 : vector<8x32xf32>
    %223 = arith.index_cast %c4_i32 : i32 to index
    %c0_62 = arith.constant 0 : index
    %c0_63 = arith.constant 0 : index
    %224 = vector.load %arg27[%223, %c0_62, %c0_63] : memref<8x8x32xf32, #tpu.memory_space<vmem>>, vector<1x8x32xf32>
    %225 = vector.shape_cast %224 : vector<1x8x32xf32> to vector<8x32xf32>
    %226 = vector.shape_cast %222 : vector<8x32xf32> to vector<1x8x32xf32>
    tpu.vector_store %arg27[%223, %c0_62, %c0_63], %226 {strides = array<i32>} : memref<8x8x32xf32, #tpu.memory_space<vmem>>, vector<1x8x32xf32>,
    %c5_i32 = arith.constant 5 : i32
    %227 = arith.index_cast %c5_i32 : i32 to index
    %c0_64 = arith.constant 0 : index
    %c0_65 = arith.constant 0 : index
    %228 = vector.load %arg26[%227, %c0_64, %c0_65] : memref<8x8x96xf32, #tpu.memory_space<vmem>>, vector<1x8x96xf32>
    %229 = vector.shape_cast %228 : vector<1x8x96xf32> to vector<8x96xf32>
    %cst_66 = arith.constant dense<0.000000e+00> : vector<8x96xf32>
    %230 = tpu.matmul %222, %1, %cst_66 {dimension_numbers = #tpu.dot_dimension_numbers<[1], [0], [0], [1], [0, 0, 1, 1], [], []>} : vector<8x32xf32>, vector<32x96xf32>, vector<8x96xf32> -> vector<8x96xf32>
    %231 = vector.extract_strided_slice %229 {offsets = [0, 0], sizes = [8, 32], strides = [1, 1]} : vector<8x96xf32> to vector<8x32xf32>
    %232 = vector.extract_strided_slice %230 {offsets = [0, 0], sizes = [8, 32], strides = [1, 1]} : vector<8x96xf32> to vector<8x32xf32>
    %233 = arith.addf %231, %232 : vector<8x32xf32>
    %234 = arith.negf %233 : vector<8x32xf32>
    %235 = math.exp %234 : vector<8x32xf32>
    %cst_67 = arith.constant 1.000000e+00 : f32
    %236 = vector.broadcast %cst_67 : f32 to vector<8x32xf32>
    %237 = arith.addf %236, %235 : vector<8x32xf32>
    %238 = arith.divf %236, %237 : vector<8x32xf32>
    %239 = vector.extract_strided_slice %229 {offsets = [0, 32], sizes = [8, 32], strides = [1, 1]} : vector<8x96xf32> to vector<8x32xf32>
    %240 = vector.extract_strided_slice %230 {offsets = [0, 32], sizes = [8, 32], strides = [1, 1]} : vector<8x96xf32> to vector<8x32xf32>
    %241 = arith.addf %239, %240 : vector<8x32xf32>
    %242 = arith.negf %241 : vector<8x32xf32>
    %243 = math.exp %242 : vector<8x32xf32>
    %cst_68 = arith.constant 1.000000e+00 : f32
    %244 = vector.broadcast %cst_68 : f32 to vector<8x32xf32>
    %245 = arith.addf %244, %243 : vector<8x32xf32>
    %246 = arith.divf %244, %245 : vector<8x32xf32>
    %247 = vector.extract_strided_slice %229 {offsets = [0, 64], sizes = [8, 32], strides = [1, 1]} : vector<8x96xf32> to vector<8x32xf32>
    %248 = vector.extract_strided_slice %230 {offsets = [0, 64], sizes = [8, 32], strides = [1, 1]} : vector<8x96xf32> to vector<8x32xf32>
    %249 = vector.broadcast %3 : vector<1x32xf32> to vector<8x32xf32>
    %250 = arith.addf %248, %249 : vector<8x32xf32>
    %251 = arith.mulf %238, %250 : vector<8x32xf32>
    %252 = arith.addf %247, %251 : vector<8x32xf32>
    %253 = math.tanh %252 : vector<8x32xf32>
    %cst_69 = arith.constant 1.000000e+00 : f32
    %254 = vector.broadcast %cst_69 : f32 to vector<8x32xf32>
    %255 = arith.subf %254, %246 : vector<8x32xf32>
    %256 = arith.mulf %255, %253 : vector<8x32xf32>
    %257 = arith.mulf %246, %222 : vector<8x32xf32>
    %258 = arith.addf %256, %257 : vector<8x32xf32>
    %259 = arith.index_cast %c5_i32 : i32 to index
    %c0_70 = arith.constant 0 : index
    %c0_71 = arith.constant 0 : index
    %260 = vector.load %arg2[%259, %c0_70, %c0_71] : memref<8x8x1xf32, #tpu.memory_space<vmem>>, vector<1x8x1xf32>
    %261 = vector.shape_cast %260 : vector<1x8x1xf32> to vector<8x1xf32>
    %262 = arith.subf %258, %222 : vector<8x32xf32>
    %263 = vector.broadcast %261 : vector<8x1xf32> to vector<8x32xf32>
    %264 = arith.mulf %263, %262 : vector<8x32xf32>
    %265 = arith.addf %222, %264 : vector<8x32xf32>
    %266 = arith.index_cast %c5_i32 : i32 to index
    %c0_72 = arith.constant 0 : index
    %c0_73 = arith.constant 0 : index
    %267 = vector.load %arg27[%266, %c0_72, %c0_73] : memref<8x8x32xf32, #tpu.memory_space<vmem>>, vector<1x8x32xf32>
    %268 = vector.shape_cast %267 : vector<1x8x32xf32> to vector<8x32xf32>
    %269 = vector.shape_cast %265 : vector<8x32xf32> to vector<1x8x32xf32>
    tpu.vector_store %arg27[%266, %c0_72, %c0_73], %269 {strides = array<i32>} : memref<8x8x32xf32, #tpu.memory_space<vmem>>, vector<1x8x32xf32>,
    %c6_i32 = arith.constant 6 : i32
    %270 = arith.index_cast %c6_i32 : i32 to index
    %c0_74 = arith.constant 0 : index
    %c0_75 = arith.constant 0 : index
    %271 = vector.load %arg26[%270, %c0_74, %c0_75] : memref<8x8x96xf32, #tpu.memory_space<vmem>>, vector<1x8x96xf32>
    %272 = vector.shape_cast %271 : vector<1x8x96xf32> to vector<8x96xf32>
    %cst_76 = arith.constant dense<0.000000e+00> : vector<8x96xf32>
    %273 = tpu.matmul %265, %1, %cst_76 {dimension_numbers = #tpu.dot_dimension_numbers<[1], [0], [0], [1], [0, 0, 1, 1], [], []>} : vector<8x32xf32>, vector<32x96xf32>, vector<8x96xf32> -> vector<8x96xf32>
    %274 = vector.extract_strided_slice %272 {offsets = [0, 0], sizes = [8, 32], strides = [1, 1]} : vector<8x96xf32> to vector<8x32xf32>
    %275 = vector.extract_strided_slice %273 {offsets = [0, 0], sizes = [8, 32], strides = [1, 1]} : vector<8x96xf32> to vector<8x32xf32>
    %276 = arith.addf %274, %275 : vector<8x32xf32>
    %277 = arith.negf %276 : vector<8x32xf32>
    %278 = math.exp %277 : vector<8x32xf32>
    %cst_77 = arith.constant 1.000000e+00 : f32
    %279 = vector.broadcast %cst_77 : f32 to vector<8x32xf32>
    %280 = arith.addf %279, %278 : vector<8x32xf32>
    %281 = arith.divf %279, %280 : vector<8x32xf32>
    %282 = vector.extract_strided_slice %272 {offsets = [0, 32], sizes = [8, 32], strides = [1, 1]} : vector<8x96xf32> to vector<8x32xf32>
    %283 = vector.extract_strided_slice %273 {offsets = [0, 32], sizes = [8, 32], strides = [1, 1]} : vector<8x96xf32> to vector<8x32xf32>
    %284 = arith.addf %282, %283 : vector<8x32xf32>
    %285 = arith.negf %284 : vector<8x32xf32>
    %286 = math.exp %285 : vector<8x32xf32>
    %cst_78 = arith.constant 1.000000e+00 : f32
    %287 = vector.broadcast %cst_78 : f32 to vector<8x32xf32>
    %288 = arith.addf %287, %286 : vector<8x32xf32>
    %289 = arith.divf %287, %288 : vector<8x32xf32>
    %290 = vector.extract_strided_slice %272 {offsets = [0, 64], sizes = [8, 32], strides = [1, 1]} : vector<8x96xf32> to vector<8x32xf32>
    %291 = vector.extract_strided_slice %273 {offsets = [0, 64], sizes = [8, 32], strides = [1, 1]} : vector<8x96xf32> to vector<8x32xf32>
    %292 = vector.broadcast %3 : vector<1x32xf32> to vector<8x32xf32>
    %293 = arith.addf %291, %292 : vector<8x32xf32>
    %294 = arith.mulf %281, %293 : vector<8x32xf32>
    %295 = arith.addf %290, %294 : vector<8x32xf32>
    %296 = math.tanh %295 : vector<8x32xf32>
    %cst_79 = arith.constant 1.000000e+00 : f32
    %297 = vector.broadcast %cst_79 : f32 to vector<8x32xf32>
    %298 = arith.subf %297, %289 : vector<8x32xf32>
    %299 = arith.mulf %298, %296 : vector<8x32xf32>
    %300 = arith.mulf %289, %265 : vector<8x32xf32>
    %301 = arith.addf %299, %300 : vector<8x32xf32>
    %302 = arith.index_cast %c6_i32 : i32 to index
    %c0_80 = arith.constant 0 : index
    %c0_81 = arith.constant 0 : index
    %303 = vector.load %arg2[%302, %c0_80, %c0_81] : memref<8x8x1xf32, #tpu.memory_space<vmem>>, vector<1x8x1xf32>
    %304 = vector.shape_cast %303 : vector<1x8x1xf32> to vector<8x1xf32>
    %305 = arith.subf %301, %265 : vector<8x32xf32>
    %306 = vector.broadcast %304 : vector<8x1xf32> to vector<8x32xf32>
    %307 = arith.mulf %306, %305 : vector<8x32xf32>
    %308 = arith.addf %265, %307 : vector<8x32xf32>
    %309 = arith.index_cast %c6_i32 : i32 to index
    %c0_82 = arith.constant 0 : index
    %c0_83 = arith.constant 0 : index
    %310 = vector.load %arg27[%309, %c0_82, %c0_83] : memref<8x8x32xf32, #tpu.memory_space<vmem>>, vector<1x8x32xf32>
    %311 = vector.shape_cast %310 : vector<1x8x32xf32> to vector<8x32xf32>
    %312 = vector.shape_cast %308 : vector<8x32xf32> to vector<1x8x32xf32>
    tpu.vector_store %arg27[%309, %c0_82, %c0_83], %312 {strides = array<i32>} : memref<8x8x32xf32, #tpu.memory_space<vmem>>, vector<1x8x32xf32>,
    %c7_i32 = arith.constant 7 : i32
    %313 = arith.index_cast %c7_i32 : i32 to index
    %c0_84 = arith.constant 0 : index
    %c0_85 = arith.constant 0 : index
    %314 = vector.load %arg26[%313, %c0_84, %c0_85] : memref<8x8x96xf32, #tpu.memory_space<vmem>>, vector<1x8x96xf32>
    %315 = vector.shape_cast %314 : vector<1x8x96xf32> to vector<8x96xf32>
    %cst_86 = arith.constant dense<0.000000e+00> : vector<8x96xf32>
    %316 = tpu.matmul %308, %1, %cst_86 {dimension_numbers = #tpu.dot_dimension_numbers<[1], [0], [0], [1], [0, 0, 1, 1], [], []>} : vector<8x32xf32>, vector<32x96xf32>, vector<8x96xf32> -> vector<8x96xf32>
    %317 = vector.extract_strided_slice %315 {offsets = [0, 0], sizes = [8, 32], strides = [1, 1]} : vector<8x96xf32> to vector<8x32xf32>
    %318 = vector.extract_strided_slice %316 {offsets = [0, 0], sizes = [8, 32], strides = [1, 1]} : vector<8x96xf32> to vector<8x32xf32>
    %319 = arith.addf %317, %318 : vector<8x32xf32>
    %320 = arith.negf %319 : vector<8x32xf32>
    %321 = math.exp %320 : vector<8x32xf32>
    %cst_87 = arith.constant 1.000000e+00 : f32
    %322 = vector.broadcast %cst_87 : f32 to vector<8x32xf32>
    %323 = arith.addf %322, %321 : vector<8x32xf32>
    %324 = arith.divf %322, %323 : vector<8x32xf32>
    %325 = vector.extract_strided_slice %315 {offsets = [0, 32], sizes = [8, 32], strides = [1, 1]} : vector<8x96xf32> to vector<8x32xf32>
    %326 = vector.extract_strided_slice %316 {offsets = [0, 32], sizes = [8, 32], strides = [1, 1]} : vector<8x96xf32> to vector<8x32xf32>
    %327 = arith.addf %325, %326 : vector<8x32xf32>
    %328 = arith.negf %327 : vector<8x32xf32>
    %329 = math.exp %328 : vector<8x32xf32>
    %cst_88 = arith.constant 1.000000e+00 : f32
    %330 = vector.broadcast %cst_88 : f32 to vector<8x32xf32>
    %331 = arith.addf %330, %329 : vector<8x32xf32>
    %332 = arith.divf %330, %331 : vector<8x32xf32>
    %333 = vector.extract_strided_slice %315 {offsets = [0, 64], sizes = [8, 32], strides = [1, 1]} : vector<8x96xf32> to vector<8x32xf32>
    %334 = vector.extract_strided_slice %316 {offsets = [0, 64], sizes = [8, 32], strides = [1, 1]} : vector<8x96xf32> to vector<8x32xf32>
    %335 = vector.broadcast %3 : vector<1x32xf32> to vector<8x32xf32>
    %336 = arith.addf %334, %335 : vector<8x32xf32>
    %337 = arith.mulf %324, %336 : vector<8x32xf32>
    %338 = arith.addf %333, %337 : vector<8x32xf32>
    %339 = math.tanh %338 : vector<8x32xf32>
    %cst_89 = arith.constant 1.000000e+00 : f32
    %340 = vector.broadcast %cst_89 : f32 to vector<8x32xf32>
    %341 = arith.subf %340, %332 : vector<8x32xf32>
    %342 = arith.mulf %341, %339 : vector<8x32xf32>
    %343 = arith.mulf %332, %308 : vector<8x32xf32>
    %344 = arith.addf %342, %343 : vector<8x32xf32>
    %345 = arith.index_cast %c7_i32 : i32 to index
    %c0_90 = arith.constant 0 : index
    %c0_91 = arith.constant 0 : index
    %346 = vector.load %arg2[%345, %c0_90, %c0_91] : memref<8x8x1xf32, #tpu.memory_space<vmem>>, vector<1x8x1xf32>
    %347 = vector.shape_cast %346 : vector<1x8x1xf32> to vector<8x1xf32>
    %348 = arith.subf %344, %308 : vector<8x32xf32>
    %349 = vector.broadcast %347 : vector<8x1xf32> to vector<8x32xf32>
    %350 = arith.mulf %349, %348 : vector<8x32xf32>
    %351 = arith.addf %308, %350 : vector<8x32xf32>
    %352 = arith.index_cast %c7_i32 : i32 to index
    %c0_92 = arith.constant 0 : index
    %c0_93 = arith.constant 0 : index
    %353 = vector.load %arg27[%352, %c0_92, %c0_93] : memref<8x8x32xf32, #tpu.memory_space<vmem>>, vector<1x8x32xf32>
    %354 = vector.shape_cast %353 : vector<1x8x32xf32> to vector<8x32xf32>
    %355 = vector.shape_cast %351 : vector<8x32xf32> to vector<1x8x32xf32>
    tpu.vector_store %arg27[%352, %c0_92, %c0_93], %355 {strides = array<i32>} : memref<8x8x32xf32, #tpu.memory_space<vmem>>, vector<1x8x32xf32>,
    %c8_i32 = arith.constant 8 : i32
    %c0_94 = arith.constant 0 : index
    %c0_95 = arith.constant 0 : index
    %356 = vector.load %arg7[%c0_94, %c0_95] : memref<32x96xf32, #tpu.memory_space<vmem>>, vector<32x96xf32>
    %c0_96 = arith.constant 0 : index
    %c0_97 = arith.constant 0 : index
    %357 = vector.load %arg8[%c0_96, %c0_97] : memref<32x96xf32, #tpu.memory_space<vmem>>, vector<32x96xf32>
    %c0_98 = arith.constant 0 : index
    %c0_99 = arith.constant 0 : index
    %358 = vector.load %arg9[%c0_98, %c0_99] : memref<1x96xf32, #tpu.memory_space<vmem>>, vector<1x96xf32>
    %c0_100 = arith.constant 0 : index
    %c0_101 = arith.constant 0 : index
    %359 = vector.load %arg10[%c0_100, %c0_101] : memref<1x32xf32, #tpu.memory_space<vmem>>, vector<1x32xf32>
    %c0_102 = arith.constant 0 : index
    %c0_103 = arith.constant 0 : index
    %c0_104 = arith.constant 0 : index
    %360 = vector.load %arg1[%c0_102, %c0_103, %c0_104] : memref<8x8x32xf32, #tpu.memory_space<vmem>>, vector<8x8x32xf32>
    %361 = vector.shape_cast %360 : vector<8x8x32xf32> to vector<64x32xf32>
    %cst_105 = arith.constant dense<0.000000e+00> : vector<64x96xf32>
    %362 = tpu.matmul %361, %356, %cst_105 {dimension_numbers = #tpu.dot_dimension_numbers<[1], [0], [0], [1], [0, 0, 1, 1], [], []>} : vector<64x32xf32>, vector<32x96xf32>, vector<64x96xf32> -> vector<64x96xf32>
    %363 = vector.broadcast %358 : vector<1x96xf32> to vector<64x96xf32>
    %364 = arith.addf %362, %363 : vector<64x96xf32>
    %365 = vector.shape_cast %364 : vector<64x96xf32> to vector<8x8x96xf32>
    %c0_106 = arith.constant 0 : index
    %c0_107 = arith.constant 0 : index
    %c0_108 = arith.constant 0 : index
    %366 = vector.load %arg26[%c0_106, %c0_107, %c0_108] : memref<8x8x96xf32, #tpu.memory_space<vmem>>, vector<8x8x96xf32>
    tpu.vector_store %arg26[%c0_106, %c0_107, %c0_108], %365 {strides = array<i32>} : memref<8x8x96xf32, #tpu.memory_space<vmem>>, vector<8x8x96xf32>,
    %cst_109 = arith.constant 0.000000e+00 : f32
    %367 = vector.broadcast %cst_109 : f32 to vector<8x32xf32>
    %c0_i32_110 = arith.constant 0 : i32
    %c7_i32_111 = arith.constant 7 : i32
    %368 = arith.subi %c7_i32_111, %c0_i32_110 : i32
    %369 = arith.index_cast %368 : i32 to index
    %c0_112 = arith.constant 0 : index
    %c0_113 = arith.constant 0 : index
    %370 = vector.load %arg26[%369, %c0_112, %c0_113] : memref<8x8x96xf32, #tpu.memory_space<vmem>>, vector<1x8x96xf32>
    %371 = vector.shape_cast %370 : vector<1x8x96xf32> to vector<8x96xf32>
    %cst_114 = arith.constant dense<0.000000e+00> : vector<8x96xf32>
    %372 = tpu.matmul %367, %357, %cst_114 {dimension_numbers = #tpu.dot_dimension_numbers<[1], [0], [0], [1], [0, 0, 1, 1], [], []>} : vector<8x32xf32>, vector<32x96xf32>, vector<8x96xf32> -> vector<8x96xf32>
    %373 = vector.extract_strided_slice %371 {offsets = [0, 0], sizes = [8, 32], strides = [1, 1]} : vector<8x96xf32> to vector<8x32xf32>
    %374 = vector.extract_strided_slice %372 {offsets = [0, 0], sizes = [8, 32], strides = [1, 1]} : vector<8x96xf32> to vector<8x32xf32>
    %375 = arith.addf %373, %374 : vector<8x32xf32>
    %376 = arith.negf %375 : vector<8x32xf32>
    %377 = math.exp %376 : vector<8x32xf32>
    %cst_115 = arith.constant 1.000000e+00 : f32
    %378 = vector.broadcast %cst_115 : f32 to vector<8x32xf32>
    %379 = arith.addf %378, %377 : vector<8x32xf32>
    %380 = arith.divf %378, %379 : vector<8x32xf32>
    %381 = vector.extract_strided_slice %371 {offsets = [0, 32], sizes = [8, 32], strides = [1, 1]} : vector<8x96xf32> to vector<8x32xf32>
    %382 = vector.extract_strided_slice %372 {offsets = [0, 32], sizes = [8, 32], strides = [1, 1]} : vector<8x96xf32> to vector<8x32xf32>
    %383 = arith.addf %381, %382 : vector<8x32xf32>
    %384 = arith.negf %383 : vector<8x32xf32>
    %385 = math.exp %384 : vector<8x32xf32>
    %cst_116 = arith.constant 1.000000e+00 : f32
    %386 = vector.broadcast %cst_116 : f32 to vector<8x32xf32>
    %387 = arith.addf %386, %385 : vector<8x32xf32>
    %388 = arith.divf %386, %387 : vector<8x32xf32>
    %389 = vector.extract_strided_slice %371 {offsets = [0, 64], sizes = [8, 32], strides = [1, 1]} : vector<8x96xf32> to vector<8x32xf32>
    %390 = vector.extract_strided_slice %372 {offsets = [0, 64], sizes = [8, 32], strides = [1, 1]} : vector<8x96xf32> to vector<8x32xf32>
    %391 = vector.broadcast %359 : vector<1x32xf32> to vector<8x32xf32>
    %392 = arith.addf %390, %391 : vector<8x32xf32>
    %393 = arith.mulf %380, %392 : vector<8x32xf32>
    %394 = arith.addf %389, %393 : vector<8x32xf32>
    %395 = math.tanh %394 : vector<8x32xf32>
    %cst_117 = arith.constant 1.000000e+00 : f32
    %396 = vector.broadcast %cst_117 : f32 to vector<8x32xf32>
    %397 = arith.subf %396, %388 : vector<8x32xf32>
    %398 = arith.mulf %397, %395 : vector<8x32xf32>
    %399 = arith.mulf %388, %367 : vector<8x32xf32>
    %400 = arith.addf %398, %399 : vector<8x32xf32>
    %401 = arith.index_cast %368 : i32 to index
    %c0_118 = arith.constant 0 : index
    %c0_119 = arith.constant 0 : index
    %402 = vector.load %arg2[%401, %c0_118, %c0_119] : memref<8x8x1xf32, #tpu.memory_space<vmem>>, vector<1x8x1xf32>
    %403 = vector.shape_cast %402 : vector<1x8x1xf32> to vector<8x1xf32>
    %404 = arith.subf %400, %367 : vector<8x32xf32>
    %405 = vector.broadcast %403 : vector<8x1xf32> to vector<8x32xf32>
    %406 = arith.mulf %405, %404 : vector<8x32xf32>
    %407 = arith.addf %367, %406 : vector<8x32xf32>
    %408 = arith.index_cast %368 : i32 to index
    %c0_120 = arith.constant 0 : index
    %c0_121 = arith.constant 0 : index
    %409 = vector.load %arg28[%408, %c0_120, %c0_121] : memref<8x8x32xf32, #tpu.memory_space<vmem>>, vector<1x8x32xf32>
    %410 = vector.shape_cast %409 : vector<1x8x32xf32> to vector<8x32xf32>
    %411 = vector.shape_cast %407 : vector<8x32xf32> to vector<1x8x32xf32>
    tpu.vector_store %arg28[%408, %c0_120, %c0_121], %411 {strides = array<i32>} : memref<8x8x32xf32, #tpu.memory_space<vmem>>, vector<1x8x32xf32>,
    %c1_i32_122 = arith.constant 1 : i32
    %c7_i32_123 = arith.constant 7 : i32
    %412 = arith.subi %c7_i32_123, %c1_i32_122 : i32
    %413 = arith.index_cast %412 : i32 to index
    %c0_124 = arith.constant 0 : index
    %c0_125 = arith.constant 0 : index
    %414 = vector.load %arg26[%413, %c0_124, %c0_125] : memref<8x8x96xf32, #tpu.memory_space<vmem>>, vector<1x8x96xf32>
    %415 = vector.shape_cast %414 : vector<1x8x96xf32> to vector<8x96xf32>
    %cst_126 = arith.constant dense<0.000000e+00> : vector<8x96xf32>
    %416 = tpu.matmul %407, %357, %cst_126 {dimension_numbers = #tpu.dot_dimension_numbers<[1], [0], [0], [1], [0, 0, 1, 1], [], []>} : vector<8x32xf32>, vector<32x96xf32>, vector<8x96xf32> -> vector<8x96xf32>
    %417 = vector.extract_strided_slice %415 {offsets = [0, 0], sizes = [8, 32], strides = [1, 1]} : vector<8x96xf32> to vector<8x32xf32>
    %418 = vector.extract_strided_slice %416 {offsets = [0, 0], sizes = [8, 32], strides = [1, 1]} : vector<8x96xf32> to vector<8x32xf32>
    %419 = arith.addf %417, %418 : vector<8x32xf32>
    %420 = arith.negf %419 : vector<8x32xf32>
    %421 = math.exp %420 : vector<8x32xf32>
    %cst_127 = arith.constant 1.000000e+00 : f32
    %422 = vector.broadcast %cst_127 : f32 to vector<8x32xf32>
    %423 = arith.addf %422, %421 : vector<8x32xf32>
    %424 = arith.divf %422, %423 : vector<8x32xf32>
    %425 = vector.extract_strided_slice %415 {offsets = [0, 32], sizes = [8, 32], strides = [1, 1]} : vector<8x96xf32> to vector<8x32xf32>
    %426 = vector.extract_strided_slice %416 {offsets = [0, 32], sizes = [8, 32], strides = [1, 1]} : vector<8x96xf32> to vector<8x32xf32>
    %427 = arith.addf %425, %426 : vector<8x32xf32>
    %428 = arith.negf %427 : vector<8x32xf32>
    %429 = math.exp %428 : vector<8x32xf32>
    %cst_128 = arith.constant 1.000000e+00 : f32
    %430 = vector.broadcast %cst_128 : f32 to vector<8x32xf32>
    %431 = arith.addf %430, %429 : vector<8x32xf32>
    %432 = arith.divf %430, %431 : vector<8x32xf32>
    %433 = vector.extract_strided_slice %415 {offsets = [0, 64], sizes = [8, 32], strides = [1, 1]} : vector<8x96xf32> to vector<8x32xf32>
    %434 = vector.extract_strided_slice %416 {offsets = [0, 64], sizes = [8, 32], strides = [1, 1]} : vector<8x96xf32> to vector<8x32xf32>
    %435 = vector.broadcast %359 : vector<1x32xf32> to vector<8x32xf32>
    %436 = arith.addf %434, %435 : vector<8x32xf32>
    %437 = arith.mulf %424, %436 : vector<8x32xf32>
    %438 = arith.addf %433, %437 : vector<8x32xf32>
    %439 = math.tanh %438 : vector<8x32xf32>
    %cst_129 = arith.constant 1.000000e+00 : f32
    %440 = vector.broadcast %cst_129 : f32 to vector<8x32xf32>
    %441 = arith.subf %440, %432 : vector<8x32xf32>
    %442 = arith.mulf %441, %439 : vector<8x32xf32>
    %443 = arith.mulf %432, %407 : vector<8x32xf32>
    %444 = arith.addf %442, %443 : vector<8x32xf32>
    %445 = arith.index_cast %412 : i32 to index
    %c0_130 = arith.constant 0 : index
    %c0_131 = arith.constant 0 : index
    %446 = vector.load %arg2[%445, %c0_130, %c0_131] : memref<8x8x1xf32, #tpu.memory_space<vmem>>, vector<1x8x1xf32>
    %447 = vector.shape_cast %446 : vector<1x8x1xf32> to vector<8x1xf32>
    %448 = arith.subf %444, %407 : vector<8x32xf32>
    %449 = vector.broadcast %447 : vector<8x1xf32> to vector<8x32xf32>
    %450 = arith.mulf %449, %448 : vector<8x32xf32>
    %451 = arith.addf %407, %450 : vector<8x32xf32>
    %452 = arith.index_cast %412 : i32 to index
    %c0_132 = arith.constant 0 : index
    %c0_133 = arith.constant 0 : index
    %453 = vector.load %arg28[%452, %c0_132, %c0_133] : memref<8x8x32xf32, #tpu.memory_space<vmem>>, vector<1x8x32xf32>
    %454 = vector.shape_cast %453 : vector<1x8x32xf32> to vector<8x32xf32>
    %455 = vector.shape_cast %451 : vector<8x32xf32> to vector<1x8x32xf32>
    tpu.vector_store %arg28[%452, %c0_132, %c0_133], %455 {strides = array<i32>} : memref<8x8x32xf32, #tpu.memory_space<vmem>>, vector<1x8x32xf32>,
    %c2_i32_134 = arith.constant 2 : i32
    %c7_i32_135 = arith.constant 7 : i32
    %456 = arith.subi %c7_i32_135, %c2_i32_134 : i32
    %457 = arith.index_cast %456 : i32 to index
    %c0_136 = arith.constant 0 : index
    %c0_137 = arith.constant 0 : index
    %458 = vector.load %arg26[%457, %c0_136, %c0_137] : memref<8x8x96xf32, #tpu.memory_space<vmem>>, vector<1x8x96xf32>
    %459 = vector.shape_cast %458 : vector<1x8x96xf32> to vector<8x96xf32>
    %cst_138 = arith.constant dense<0.000000e+00> : vector<8x96xf32>
    %460 = tpu.matmul %451, %357, %cst_138 {dimension_numbers = #tpu.dot_dimension_numbers<[1], [0], [0], [1], [0, 0, 1, 1], [], []>} : vector<8x32xf32>, vector<32x96xf32>, vector<8x96xf32> -> vector<8x96xf32>
    %461 = vector.extract_strided_slice %459 {offsets = [0, 0], sizes = [8, 32], strides = [1, 1]} : vector<8x96xf32> to vector<8x32xf32>
    %462 = vector.extract_strided_slice %460 {offsets = [0, 0], sizes = [8, 32], strides = [1, 1]} : vector<8x96xf32> to vector<8x32xf32>
    %463 = arith.addf %461, %462 : vector<8x32xf32>
    %464 = arith.negf %463 : vector<8x32xf32>
    %465 = math.exp %464 : vector<8x32xf32>
    %cst_139 = arith.constant 1.000000e+00 : f32
    %466 = vector.broadcast %cst_139 : f32 to vector<8x32xf32>
    %467 = arith.addf %466, %465 : vector<8x32xf32>
    %468 = arith.divf %466, %467 : vector<8x32xf32>
    %469 = vector.extract_strided_slice %459 {offsets = [0, 32], sizes = [8, 32], strides = [1, 1]} : vector<8x96xf32> to vector<8x32xf32>
    %470 = vector.extract_strided_slice %460 {offsets = [0, 32], sizes = [8, 32], strides = [1, 1]} : vector<8x96xf32> to vector<8x32xf32>
    %471 = arith.addf %469, %470 : vector<8x32xf32>
    %472 = arith.negf %471 : vector<8x32xf32>
    %473 = math.exp %472 : vector<8x32xf32>
    %cst_140 = arith.constant 1.000000e+00 : f32
    %474 = vector.broadcast %cst_140 : f32 to vector<8x32xf32>
    %475 = arith.addf %474, %473 : vector<8x32xf32>
    %476 = arith.divf %474, %475 : vector<8x32xf32>
    %477 = vector.extract_strided_slice %459 {offsets = [0, 64], sizes = [8, 32], strides = [1, 1]} : vector<8x96xf32> to vector<8x32xf32>
    %478 = vector.extract_strided_slice %460 {offsets = [0, 64], sizes = [8, 32], strides = [1, 1]} : vector<8x96xf32> to vector<8x32xf32>
    %479 = vector.broadcast %359 : vector<1x32xf32> to vector<8x32xf32>
    %480 = arith.addf %478, %479 : vector<8x32xf32>
    %481 = arith.mulf %468, %480 : vector<8x32xf32>
    %482 = arith.addf %477, %481 : vector<8x32xf32>
    %483 = math.tanh %482 : vector<8x32xf32>
    %cst_141 = arith.constant 1.000000e+00 : f32
    %484 = vector.broadcast %cst_141 : f32 to vector<8x32xf32>
    %485 = arith.subf %484, %476 : vector<8x32xf32>
    %486 = arith.mulf %485, %483 : vector<8x32xf32>
    %487 = arith.mulf %476, %451 : vector<8x32xf32>
    %488 = arith.addf %486, %487 : vector<8x32xf32>
    %489 = arith.index_cast %456 : i32 to index
    %c0_142 = arith.constant 0 : index
    %c0_143 = arith.constant 0 : index
    %490 = vector.load %arg2[%489, %c0_142, %c0_143] : memref<8x8x1xf32, #tpu.memory_space<vmem>>, vector<1x8x1xf32>
    %491 = vector.shape_cast %490 : vector<1x8x1xf32> to vector<8x1xf32>
    %492 = arith.subf %488, %451 : vector<8x32xf32>
    %493 = vector.broadcast %491 : vector<8x1xf32> to vector<8x32xf32>
    %494 = arith.mulf %493, %492 : vector<8x32xf32>
    %495 = arith.addf %451, %494 : vector<8x32xf32>
    %496 = arith.index_cast %456 : i32 to index
    %c0_144 = arith.constant 0 : index
    %c0_145 = arith.constant 0 : index
    %497 = vector.load %arg28[%496, %c0_144, %c0_145] : memref<8x8x32xf32, #tpu.memory_space<vmem>>, vector<1x8x32xf32>
    %498 = vector.shape_cast %497 : vector<1x8x32xf32> to vector<8x32xf32>
    %499 = vector.shape_cast %495 : vector<8x32xf32> to vector<1x8x32xf32>
    tpu.vector_store %arg28[%496, %c0_144, %c0_145], %499 {strides = array<i32>} : memref<8x8x32xf32, #tpu.memory_space<vmem>>, vector<1x8x32xf32>,
    %c3_i32_146 = arith.constant 3 : i32
    %c7_i32_147 = arith.constant 7 : i32
    %500 = arith.subi %c7_i32_147, %c3_i32_146 : i32
    %501 = arith.index_cast %500 : i32 to index
    %c0_148 = arith.constant 0 : index
    %c0_149 = arith.constant 0 : index
    %502 = vector.load %arg26[%501, %c0_148, %c0_149] : memref<8x8x96xf32, #tpu.memory_space<vmem>>, vector<1x8x96xf32>
    %503 = vector.shape_cast %502 : vector<1x8x96xf32> to vector<8x96xf32>
    %cst_150 = arith.constant dense<0.000000e+00> : vector<8x96xf32>
    %504 = tpu.matmul %495, %357, %cst_150 {dimension_numbers = #tpu.dot_dimension_numbers<[1], [0], [0], [1], [0, 0, 1, 1], [], []>} : vector<8x32xf32>, vector<32x96xf32>, vector<8x96xf32> -> vector<8x96xf32>
    %505 = vector.extract_strided_slice %503 {offsets = [0, 0], sizes = [8, 32], strides = [1, 1]} : vector<8x96xf32> to vector<8x32xf32>
    %506 = vector.extract_strided_slice %504 {offsets = [0, 0], sizes = [8, 32], strides = [1, 1]} : vector<8x96xf32> to vector<8x32xf32>
    %507 = arith.addf %505, %506 : vector<8x32xf32>
    %508 = arith.negf %507 : vector<8x32xf32>
    %509 = math.exp %508 : vector<8x32xf32>
    %cst_151 = arith.constant 1.000000e+00 : f32
    %510 = vector.broadcast %cst_151 : f32 to vector<8x32xf32>
    %511 = arith.addf %510, %509 : vector<8x32xf32>
    %512 = arith.divf %510, %511 : vector<8x32xf32>
    %513 = vector.extract_strided_slice %503 {offsets = [0, 32], sizes = [8, 32], strides = [1, 1]} : vector<8x96xf32> to vector<8x32xf32>
    %514 = vector.extract_strided_slice %504 {offsets = [0, 32], sizes = [8, 32], strides = [1, 1]} : vector<8x96xf32> to vector<8x32xf32>
    %515 = arith.addf %513, %514 : vector<8x32xf32>
    %516 = arith.negf %515 : vector<8x32xf32>
    %517 = math.exp %516 : vector<8x32xf32>
    %cst_152 = arith.constant 1.000000e+00 : f32
    %518 = vector.broadcast %cst_152 : f32 to vector<8x32xf32>
    %519 = arith.addf %518, %517 : vector<8x32xf32>
    %520 = arith.divf %518, %519 : vector<8x32xf32>
    %521 = vector.extract_strided_slice %503 {offsets = [0, 64], sizes = [8, 32], strides = [1, 1]} : vector<8x96xf32> to vector<8x32xf32>
    %522 = vector.extract_strided_slice %504 {offsets = [0, 64], sizes = [8, 32], strides = [1, 1]} : vector<8x96xf32> to vector<8x32xf32>
    %523 = vector.broadcast %359 : vector<1x32xf32> to vector<8x32xf32>
    %524 = arith.addf %522, %523 : vector<8x32xf32>
    %525 = arith.mulf %512, %524 : vector<8x32xf32>
    %526 = arith.addf %521, %525 : vector<8x32xf32>
    %527 = math.tanh %526 : vector<8x32xf32>
    %cst_153 = arith.constant 1.000000e+00 : f32
    %528 = vector.broadcast %cst_153 : f32 to vector<8x32xf32>
    %529 = arith.subf %528, %520 : vector<8x32xf32>
    %530 = arith.mulf %529, %527 : vector<8x32xf32>
    %531 = arith.mulf %520, %495 : vector<8x32xf32>
    %532 = arith.addf %530, %531 : vector<8x32xf32>
    %533 = arith.index_cast %500 : i32 to index
    %c0_154 = arith.constant 0 : index
    %c0_155 = arith.constant 0 : index
    %534 = vector.load %arg2[%533, %c0_154, %c0_155] : memref<8x8x1xf32, #tpu.memory_space<vmem>>, vector<1x8x1xf32>
    %535 = vector.shape_cast %534 : vector<1x8x1xf32> to vector<8x1xf32>
    %536 = arith.subf %532, %495 : vector<8x32xf32>
    %537 = vector.broadcast %535 : vector<8x1xf32> to vector<8x32xf32>
    %538 = arith.mulf %537, %536 : vector<8x32xf32>
    %539 = arith.addf %495, %538 : vector<8x32xf32>
    %540 = arith.index_cast %500 : i32 to index
    %c0_156 = arith.constant 0 : index
    %c0_157 = arith.constant 0 : index
    %541 = vector.load %arg28[%540, %c0_156, %c0_157] : memref<8x8x32xf32, #tpu.memory_space<vmem>>, vector<1x8x32xf32>
    %542 = vector.shape_cast %541 : vector<1x8x32xf32> to vector<8x32xf32>
    %543 = vector.shape_cast %539 : vector<8x32xf32> to vector<1x8x32xf32>
    tpu.vector_store %arg28[%540, %c0_156, %c0_157], %543 {strides = array<i32>} : memref<8x8x32xf32, #tpu.memory_space<vmem>>, vector<1x8x32xf32>,
    %c4_i32_158 = arith.constant 4 : i32
    %c7_i32_159 = arith.constant 7 : i32
    %544 = arith.subi %c7_i32_159, %c4_i32_158 : i32
    %545 = arith.index_cast %544 : i32 to index
    %c0_160 = arith.constant 0 : index
    %c0_161 = arith.constant 0 : index
    %546 = vector.load %arg26[%545, %c0_160, %c0_161] : memref<8x8x96xf32, #tpu.memory_space<vmem>>, vector<1x8x96xf32>
    %547 = vector.shape_cast %546 : vector<1x8x96xf32> to vector<8x96xf32>
    %cst_162 = arith.constant dense<0.000000e+00> : vector<8x96xf32>
    %548 = tpu.matmul %539, %357, %cst_162 {dimension_numbers = #tpu.dot_dimension_numbers<[1], [0], [0], [1], [0, 0, 1, 1], [], []>} : vector<8x32xf32>, vector<32x96xf32>, vector<8x96xf32> -> vector<8x96xf32>
    %549 = vector.extract_strided_slice %547 {offsets = [0, 0], sizes = [8, 32], strides = [1, 1]} : vector<8x96xf32> to vector<8x32xf32>
    %550 = vector.extract_strided_slice %548 {offsets = [0, 0], sizes = [8, 32], strides = [1, 1]} : vector<8x96xf32> to vector<8x32xf32>
    %551 = arith.addf %549, %550 : vector<8x32xf32>
    %552 = arith.negf %551 : vector<8x32xf32>
    %553 = math.exp %552 : vector<8x32xf32>
    %cst_163 = arith.constant 1.000000e+00 : f32
    %554 = vector.broadcast %cst_163 : f32 to vector<8x32xf32>
    %555 = arith.addf %554, %553 : vector<8x32xf32>
    %556 = arith.divf %554, %555 : vector<8x32xf32>
    %557 = vector.extract_strided_slice %547 {offsets = [0, 32], sizes = [8, 32], strides = [1, 1]} : vector<8x96xf32> to vector<8x32xf32>
    %558 = vector.extract_strided_slice %548 {offsets = [0, 32], sizes = [8, 32], strides = [1, 1]} : vector<8x96xf32> to vector<8x32xf32>
    %559 = arith.addf %557, %558 : vector<8x32xf32>
    %560 = arith.negf %559 : vector<8x32xf32>
    %561 = math.exp %560 : vector<8x32xf32>
    %cst_164 = arith.constant 1.000000e+00 : f32
    %562 = vector.broadcast %cst_164 : f32 to vector<8x32xf32>
    %563 = arith.addf %562, %561 : vector<8x32xf32>
    %564 = arith.divf %562, %563 : vector<8x32xf32>
    %565 = vector.extract_strided_slice %547 {offsets = [0, 64], sizes = [8, 32], strides = [1, 1]} : vector<8x96xf32> to vector<8x32xf32>
    %566 = vector.extract_strided_slice %548 {offsets = [0, 64], sizes = [8, 32], strides = [1, 1]} : vector<8x96xf32> to vector<8x32xf32>
    %567 = vector.broadcast %359 : vector<1x32xf32> to vector<8x32xf32>
    %568 = arith.addf %566, %567 : vector<8x32xf32>
    %569 = arith.mulf %556, %568 : vector<8x32xf32>
    %570 = arith.addf %565, %569 : vector<8x32xf32>
    %571 = math.tanh %570 : vector<8x32xf32>
    %cst_165 = arith.constant 1.000000e+00 : f32
    %572 = vector.broadcast %cst_165 : f32 to vector<8x32xf32>
    %573 = arith.subf %572, %564 : vector<8x32xf32>
    %574 = arith.mulf %573, %571 : vector<8x32xf32>
    %575 = arith.mulf %564, %539 : vector<8x32xf32>
    %576 = arith.addf %574, %575 : vector<8x32xf32>
    %577 = arith.index_cast %544 : i32 to index
    %c0_166 = arith.constant 0 : index
    %c0_167 = arith.constant 0 : index
    %578 = vector.load %arg2[%577, %c0_166, %c0_167] : memref<8x8x1xf32, #tpu.memory_space<vmem>>, vector<1x8x1xf32>
    %579 = vector.shape_cast %578 : vector<1x8x1xf32> to vector<8x1xf32>
    %580 = arith.subf %576, %539 : vector<8x32xf32>
    %581 = vector.broadcast %579 : vector<8x1xf32> to vector<8x32xf32>
    %582 = arith.mulf %581, %580 : vector<8x32xf32>
    %583 = arith.addf %539, %582 : vector<8x32xf32>
    %584 = arith.index_cast %544 : i32 to index
    %c0_168 = arith.constant 0 : index
    %c0_169 = arith.constant 0 : index
    %585 = vector.load %arg28[%584, %c0_168, %c0_169] : memref<8x8x32xf32, #tpu.memory_space<vmem>>, vector<1x8x32xf32>
    %586 = vector.shape_cast %585 : vector<1x8x32xf32> to vector<8x32xf32>
    %587 = vector.shape_cast %583 : vector<8x32xf32> to vector<1x8x32xf32>
    tpu.vector_store %arg28[%584, %c0_168, %c0_169], %587 {strides = array<i32>} : memref<8x8x32xf32, #tpu.memory_space<vmem>>, vector<1x8x32xf32>,
    %c5_i32_170 = arith.constant 5 : i32
    %c7_i32_171 = arith.constant 7 : i32
    %588 = arith.subi %c7_i32_171, %c5_i32_170 : i32
    %589 = arith.index_cast %588 : i32 to index
    %c0_172 = arith.constant 0 : index
    %c0_173 = arith.constant 0 : index
    %590 = vector.load %arg26[%589, %c0_172, %c0_173] : memref<8x8x96xf32, #tpu.memory_space<vmem>>, vector<1x8x96xf32>
    %591 = vector.shape_cast %590 : vector<1x8x96xf32> to vector<8x96xf32>
    %cst_174 = arith.constant dense<0.000000e+00> : vector<8x96xf32>
    %592 = tpu.matmul %583, %357, %cst_174 {dimension_numbers = #tpu.dot_dimension_numbers<[1], [0], [0], [1], [0, 0, 1, 1], [], []>} : vector<8x32xf32>, vector<32x96xf32>, vector<8x96xf32> -> vector<8x96xf32>
    %593 = vector.extract_strided_slice %591 {offsets = [0, 0], sizes = [8, 32], strides = [1, 1]} : vector<8x96xf32> to vector<8x32xf32>
    %594 = vector.extract_strided_slice %592 {offsets = [0, 0], sizes = [8, 32], strides = [1, 1]} : vector<8x96xf32> to vector<8x32xf32>
    %595 = arith.addf %593, %594 : vector<8x32xf32>
    %596 = arith.negf %595 : vector<8x32xf32>
    %597 = math.exp %596 : vector<8x32xf32>
    %cst_175 = arith.constant 1.000000e+00 : f32
    %598 = vector.broadcast %cst_175 : f32 to vector<8x32xf32>
    %599 = arith.addf %598, %597 : vector<8x32xf32>
    %600 = arith.divf %598, %599 : vector<8x32xf32>
    %601 = vector.extract_strided_slice %591 {offsets = [0, 32], sizes = [8, 32], strides = [1, 1]} : vector<8x96xf32> to vector<8x32xf32>
    %602 = vector.extract_strided_slice %592 {offsets = [0, 32], sizes = [8, 32], strides = [1, 1]} : vector<8x96xf32> to vector<8x32xf32>
    %603 = arith.addf %601, %602 : vector<8x32xf32>
    %604 = arith.negf %603 : vector<8x32xf32>
    %605 = math.exp %604 : vector<8x32xf32>
    %cst_176 = arith.constant 1.000000e+00 : f32
    %606 = vector.broadcast %cst_176 : f32 to vector<8x32xf32>
    %607 = arith.addf %606, %605 : vector<8x32xf32>
    %608 = arith.divf %606, %607 : vector<8x32xf32>
    %609 = vector.extract_strided_slice %591 {offsets = [0, 64], sizes = [8, 32], strides = [1, 1]} : vector<8x96xf32> to vector<8x32xf32>
    %610 = vector.extract_strided_slice %592 {offsets = [0, 64], sizes = [8, 32], strides = [1, 1]} : vector<8x96xf32> to vector<8x32xf32>
    %611 = vector.broadcast %359 : vector<1x32xf32> to vector<8x32xf32>
    %612 = arith.addf %610, %611 : vector<8x32xf32>
    %613 = arith.mulf %600, %612 : vector<8x32xf32>
    %614 = arith.addf %609, %613 : vector<8x32xf32>
    %615 = math.tanh %614 : vector<8x32xf32>
    %cst_177 = arith.constant 1.000000e+00 : f32
    %616 = vector.broadcast %cst_177 : f32 to vector<8x32xf32>
    %617 = arith.subf %616, %608 : vector<8x32xf32>
    %618 = arith.mulf %617, %615 : vector<8x32xf32>
    %619 = arith.mulf %608, %583 : vector<8x32xf32>
    %620 = arith.addf %618, %619 : vector<8x32xf32>
    %621 = arith.index_cast %588 : i32 to index
    %c0_178 = arith.constant 0 : index
    %c0_179 = arith.constant 0 : index
    %622 = vector.load %arg2[%621, %c0_178, %c0_179] : memref<8x8x1xf32, #tpu.memory_space<vmem>>, vector<1x8x1xf32>
    %623 = vector.shape_cast %622 : vector<1x8x1xf32> to vector<8x1xf32>
    %624 = arith.subf %620, %583 : vector<8x32xf32>
    %625 = vector.broadcast %623 : vector<8x1xf32> to vector<8x32xf32>
    %626 = arith.mulf %625, %624 : vector<8x32xf32>
    %627 = arith.addf %583, %626 : vector<8x32xf32>
    %628 = arith.index_cast %588 : i32 to index
    %c0_180 = arith.constant 0 : index
    %c0_181 = arith.constant 0 : index
    %629 = vector.load %arg28[%628, %c0_180, %c0_181] : memref<8x8x32xf32, #tpu.memory_space<vmem>>, vector<1x8x32xf32>
    %630 = vector.shape_cast %629 : vector<1x8x32xf32> to vector<8x32xf32>
    %631 = vector.shape_cast %627 : vector<8x32xf32> to vector<1x8x32xf32>
    tpu.vector_store %arg28[%628, %c0_180, %c0_181], %631 {strides = array<i32>} : memref<8x8x32xf32, #tpu.memory_space<vmem>>, vector<1x8x32xf32>,
    %c6_i32_182 = arith.constant 6 : i32
    %c7_i32_183 = arith.constant 7 : i32
    %632 = arith.subi %c7_i32_183, %c6_i32_182 : i32
    %633 = arith.index_cast %632 : i32 to index
    %c0_184 = arith.constant 0 : index
    %c0_185 = arith.constant 0 : index
    %634 = vector.load %arg26[%633, %c0_184, %c0_185] : memref<8x8x96xf32, #tpu.memory_space<vmem>>, vector<1x8x96xf32>
    %635 = vector.shape_cast %634 : vector<1x8x96xf32> to vector<8x96xf32>
    %cst_186 = arith.constant dense<0.000000e+00> : vector<8x96xf32>
    %636 = tpu.matmul %627, %357, %cst_186 {dimension_numbers = #tpu.dot_dimension_numbers<[1], [0], [0], [1], [0, 0, 1, 1], [], []>} : vector<8x32xf32>, vector<32x96xf32>, vector<8x96xf32> -> vector<8x96xf32>
    %637 = vector.extract_strided_slice %635 {offsets = [0, 0], sizes = [8, 32], strides = [1, 1]} : vector<8x96xf32> to vector<8x32xf32>
    %638 = vector.extract_strided_slice %636 {offsets = [0, 0], sizes = [8, 32], strides = [1, 1]} : vector<8x96xf32> to vector<8x32xf32>
    %639 = arith.addf %637, %638 : vector<8x32xf32>
    %640 = arith.negf %639 : vector<8x32xf32>
    %641 = math.exp %640 : vector<8x32xf32>
    %cst_187 = arith.constant 1.000000e+00 : f32
    %642 = vector.broadcast %cst_187 : f32 to vector<8x32xf32>
    %643 = arith.addf %642, %641 : vector<8x32xf32>
    %644 = arith.divf %642, %643 : vector<8x32xf32>
    %645 = vector.extract_strided_slice %635 {offsets = [0, 32], sizes = [8, 32], strides = [1, 1]} : vector<8x96xf32> to vector<8x32xf32>
    %646 = vector.extract_strided_slice %636 {offsets = [0, 32], sizes = [8, 32], strides = [1, 1]} : vector<8x96xf32> to vector<8x32xf32>
    %647 = arith.addf %645, %646 : vector<8x32xf32>
    %648 = arith.negf %647 : vector<8x32xf32>
    %649 = math.exp %648 : vector<8x32xf32>
    %cst_188 = arith.constant 1.000000e+00 : f32
    %650 = vector.broadcast %cst_188 : f32 to vector<8x32xf32>
    %651 = arith.addf %650, %649 : vector<8x32xf32>
    %652 = arith.divf %650, %651 : vector<8x32xf32>
    %653 = vector.extract_strided_slice %635 {offsets = [0, 64], sizes = [8, 32], strides = [1, 1]} : vector<8x96xf32> to vector<8x32xf32>
    %654 = vector.extract_strided_slice %636 {offsets = [0, 64], sizes = [8, 32], strides = [1, 1]} : vector<8x96xf32> to vector<8x32xf32>
    %655 = vector.broadcast %359 : vector<1x32xf32> to vector<8x32xf32>
    %656 = arith.addf %654, %655 : vector<8x32xf32>
    %657 = arith.mulf %644, %656 : vector<8x32xf32>
    %658 = arith.addf %653, %657 : vector<8x32xf32>
    %659 = math.tanh %658 : vector<8x32xf32>
    %cst_189 = arith.constant 1.000000e+00 : f32
    %660 = vector.broadcast %cst_189 : f32 to vector<8x32xf32>
    %661 = arith.subf %660, %652 : vector<8x32xf32>
    %662 = arith.mulf %661, %659 : vector<8x32xf32>
    %663 = arith.mulf %652, %627 : vector<8x32xf32>
    %664 = arith.addf %662, %663 : vector<8x32xf32>
    %665 = arith.index_cast %632 : i32 to index
    %c0_190 = arith.constant 0 : index
    %c0_191 = arith.constant 0 : index
    %666 = vector.load %arg2[%665, %c0_190, %c0_191] : memref<8x8x1xf32, #tpu.memory_space<vmem>>, vector<1x8x1xf32>
    %667 = vector.shape_cast %666 : vector<1x8x1xf32> to vector<8x1xf32>
    %668 = arith.subf %664, %627 : vector<8x32xf32>
    %669 = vector.broadcast %667 : vector<8x1xf32> to vector<8x32xf32>
    %670 = arith.mulf %669, %668 : vector<8x32xf32>
    %671 = arith.addf %627, %670 : vector<8x32xf32>
    %672 = arith.index_cast %632 : i32 to index
    %c0_192 = arith.constant 0 : index
    %c0_193 = arith.constant 0 : index
    %673 = vector.load %arg28[%672, %c0_192, %c0_193] : memref<8x8x32xf32, #tpu.memory_space<vmem>>, vector<1x8x32xf32>
    %674 = vector.shape_cast %673 : vector<1x8x32xf32> to vector<8x32xf32>
    %675 = vector.shape_cast %671 : vector<8x32xf32> to vector<1x8x32xf32>
    tpu.vector_store %arg28[%672, %c0_192, %c0_193], %675 {strides = array<i32>} : memref<8x8x32xf32, #tpu.memory_space<vmem>>, vector<1x8x32xf32>,
    %c7_i32_194 = arith.constant 7 : i32
    %c7_i32_195 = arith.constant 7 : i32
    %676 = arith.subi %c7_i32_195, %c7_i32_194 : i32
    %677 = arith.index_cast %676 : i32 to index
    %c0_196 = arith.constant 0 : index
    %c0_197 = arith.constant 0 : index
    %678 = vector.load %arg26[%677, %c0_196, %c0_197] : memref<8x8x96xf32, #tpu.memory_space<vmem>>, vector<1x8x96xf32>
    %679 = vector.shape_cast %678 : vector<1x8x96xf32> to vector<8x96xf32>
    %cst_198 = arith.constant dense<0.000000e+00> : vector<8x96xf32>
    %680 = tpu.matmul %671, %357, %cst_198 {dimension_numbers = #tpu.dot_dimension_numbers<[1], [0], [0], [1], [0, 0, 1, 1], [], []>} : vector<8x32xf32>, vector<32x96xf32>, vector<8x96xf32> -> vector<8x96xf32>
    %681 = vector.extract_strided_slice %679 {offsets = [0, 0], sizes = [8, 32], strides = [1, 1]} : vector<8x96xf32> to vector<8x32xf32>
    %682 = vector.extract_strided_slice %680 {offsets = [0, 0], sizes = [8, 32], strides = [1, 1]} : vector<8x96xf32> to vector<8x32xf32>
    %683 = arith.addf %681, %682 : vector<8x32xf32>
    %684 = arith.negf %683 : vector<8x32xf32>
    %685 = math.exp %684 : vector<8x32xf32>
    %cst_199 = arith.constant 1.000000e+00 : f32
    %686 = vector.broadcast %cst_199 : f32 to vector<8x32xf32>
    %687 = arith.addf %686, %685 : vector<8x32xf32>
    %688 = arith.divf %686, %687 : vector<8x32xf32>
    %689 = vector.extract_strided_slice %679 {offsets = [0, 32], sizes = [8, 32], strides = [1, 1]} : vector<8x96xf32> to vector<8x32xf32>
    %690 = vector.extract_strided_slice %680 {offsets = [0, 32], sizes = [8, 32], strides = [1, 1]} : vector<8x96xf32> to vector<8x32xf32>
    %691 = arith.addf %689, %690 : vector<8x32xf32>
    %692 = arith.negf %691 : vector<8x32xf32>
    %693 = math.exp %692 : vector<8x32xf32>
    %cst_200 = arith.constant 1.000000e+00 : f32
    %694 = vector.broadcast %cst_200 : f32 to vector<8x32xf32>
    %695 = arith.addf %694, %693 : vector<8x32xf32>
    %696 = arith.divf %694, %695 : vector<8x32xf32>
    %697 = vector.extract_strided_slice %679 {offsets = [0, 64], sizes = [8, 32], strides = [1, 1]} : vector<8x96xf32> to vector<8x32xf32>
    %698 = vector.extract_strided_slice %680 {offsets = [0, 64], sizes = [8, 32], strides = [1, 1]} : vector<8x96xf32> to vector<8x32xf32>
    %699 = vector.broadcast %359 : vector<1x32xf32> to vector<8x32xf32>
    %700 = arith.addf %698, %699 : vector<8x32xf32>
    %701 = arith.mulf %688, %700 : vector<8x32xf32>
    %702 = arith.addf %697, %701 : vector<8x32xf32>
    %703 = math.tanh %702 : vector<8x32xf32>
    %cst_201 = arith.constant 1.000000e+00 : f32
    %704 = vector.broadcast %cst_201 : f32 to vector<8x32xf32>
    %705 = arith.subf %704, %696 : vector<8x32xf32>
    %706 = arith.mulf %705, %703 : vector<8x32xf32>
    %707 = arith.mulf %696, %671 : vector<8x32xf32>
    %708 = arith.addf %706, %707 : vector<8x32xf32>
    %709 = arith.index_cast %676 : i32 to index
    %c0_202 = arith.constant 0 : index
    %c0_203 = arith.constant 0 : index
    %710 = vector.load %arg2[%709, %c0_202, %c0_203] : memref<8x8x1xf32, #tpu.memory_space<vmem>>, vector<1x8x1xf32>
    %711 = vector.shape_cast %710 : vector<1x8x1xf32> to vector<8x1xf32>
    %712 = arith.subf %708, %671 : vector<8x32xf32>
    %713 = vector.broadcast %711 : vector<8x1xf32> to vector<8x32xf32>
    %714 = arith.mulf %713, %712 : vector<8x32xf32>
    %715 = arith.addf %671, %714 : vector<8x32xf32>
    %716 = arith.index_cast %676 : i32 to index
    %c0_204 = arith.constant 0 : index
    %c0_205 = arith.constant 0 : index
    %717 = vector.load %arg28[%716, %c0_204, %c0_205] : memref<8x8x32xf32, #tpu.memory_space<vmem>>, vector<1x8x32xf32>
    %718 = vector.shape_cast %717 : vector<1x8x32xf32> to vector<8x32xf32>
    %719 = vector.shape_cast %715 : vector<8x32xf32> to vector<1x8x32xf32>
    tpu.vector_store %arg28[%716, %c0_204, %c0_205], %719 {strides = array<i32>} : memref<8x8x32xf32, #tpu.memory_space<vmem>>, vector<1x8x32xf32>,
    %c8_i32_206 = arith.constant 8 : i32
    %c0_207 = arith.constant 0 : index
    %c0_208 = arith.constant 0 : index
    %720 = vector.load %arg11[%c0_207, %c0_208] : memref<64x96xf32, #tpu.memory_space<vmem>>, vector<64x96xf32>
    %c0_209 = arith.constant 0 : index
    %c0_210 = arith.constant 0 : index
    %721 = vector.load %arg12[%c0_209, %c0_210] : memref<32x96xf32, #tpu.memory_space<vmem>>, vector<32x96xf32>
    %c0_211 = arith.constant 0 : index
    %c0_212 = arith.constant 0 : index
    %722 = vector.load %arg13[%c0_211, %c0_212] : memref<1x96xf32, #tpu.memory_space<vmem>>, vector<1x96xf32>
    %c0_213 = arith.constant 0 : index
    %c0_214 = arith.constant 0 : index
    %723 = vector.load %arg14[%c0_213, %c0_214] : memref<1x32xf32, #tpu.memory_space<vmem>>, vector<1x32xf32>
    %c0_215 = arith.constant 0 : index
    %c0_216 = arith.constant 0 : index
    %c0_217 = arith.constant 0 : index
    %724 = vector.load %arg27[%c0_215, %c0_216, %c0_217] : memref<8x8x32xf32, #tpu.memory_space<vmem>>, vector<8x8x32xf32>
    %725 = vector.shape_cast %724 : vector<8x8x32xf32> to vector<64x32xf32>
    %726 = vector.extract_strided_slice %720 {offsets = [0, 0], sizes = [32, 96], strides = [1, 1]} : vector<64x96xf32> to vector<32x96xf32>
    %cst_218 = arith.constant dense<0.000000e+00> : vector<64x96xf32>
    %727 = tpu.matmul %725, %726, %cst_218 {dimension_numbers = #tpu.dot_dimension_numbers<[1], [0], [0], [1], [0, 0, 1, 1], [], []>} : vector<64x32xf32>, vector<32x96xf32>, vector<64x96xf32> -> vector<64x96xf32>
    %c0_219 = arith.constant 0 : index
    %c0_220 = arith.constant 0 : index
    %c0_221 = arith.constant 0 : index
    %728 = vector.load %arg28[%c0_219, %c0_220, %c0_221] : memref<8x8x32xf32, #tpu.memory_space<vmem>>, vector<8x8x32xf32>
    %729 = vector.shape_cast %728 : vector<8x8x32xf32> to vector<64x32xf32>
    %730 = vector.extract_strided_slice %720 {offsets = [32, 0], sizes = [32, 96], strides = [1, 1]} : vector<64x96xf32> to vector<32x96xf32>
    %cst_222 = arith.constant dense<0.000000e+00> : vector<64x96xf32>
    %731 = tpu.matmul %729, %730, %cst_222 {dimension_numbers = #tpu.dot_dimension_numbers<[1], [0], [0], [1], [0, 0, 1, 1], [], []>} : vector<64x32xf32>, vector<32x96xf32>, vector<64x96xf32> -> vector<64x96xf32>
    %732 = arith.addf %727, %731 : vector<64x96xf32>
    %733 = vector.broadcast %722 : vector<1x96xf32> to vector<64x96xf32>
    %734 = arith.addf %732, %733 : vector<64x96xf32>
    %735 = vector.shape_cast %734 : vector<64x96xf32> to vector<8x8x96xf32>
    %c0_223 = arith.constant 0 : index
    %c0_224 = arith.constant 0 : index
    %c0_225 = arith.constant 0 : index
    %736 = vector.load %arg26[%c0_223, %c0_224, %c0_225] : memref<8x8x96xf32, #tpu.memory_space<vmem>>, vector<8x8x96xf32>
    tpu.vector_store %arg26[%c0_223, %c0_224, %c0_225], %735 {strides = array<i32>} : memref<8x8x96xf32, #tpu.memory_space<vmem>>, vector<8x8x96xf32>,
    %cst_226 = arith.constant 0.000000e+00 : f32
    %737 = vector.broadcast %cst_226 : f32 to vector<8x32xf32>
    %c0_i32_227 = arith.constant 0 : i32
    %738 = arith.index_cast %c0_i32_227 : i32 to index
    %c0_228 = arith.constant 0 : index
    %c0_229 = arith.constant 0 : index
    %739 = vector.load %arg26[%738, %c0_228, %c0_229] : memref<8x8x96xf32, #tpu.memory_space<vmem>>, vector<1x8x96xf32>
    %740 = vector.shape_cast %739 : vector<1x8x96xf32> to vector<8x96xf32>
    %cst_230 = arith.constant dense<0.000000e+00> : vector<8x96xf32>
    %741 = tpu.matmul %737, %721, %cst_230 {dimension_numbers = #tpu.dot_dimension_numbers<[1], [0], [0], [1], [0, 0, 1, 1], [], []>} : vector<8x32xf32>, vector<32x96xf32>, vector<8x96xf32> -> vector<8x96xf32>
    %742 = vector.extract_strided_slice %740 {offsets = [0, 0], sizes = [8, 32], strides = [1, 1]} : vector<8x96xf32> to vector<8x32xf32>
    %743 = vector.extract_strided_slice %741 {offsets = [0, 0], sizes = [8, 32], strides = [1, 1]} : vector<8x96xf32> to vector<8x32xf32>
    %744 = arith.addf %742, %743 : vector<8x32xf32>
    %745 = arith.negf %744 : vector<8x32xf32>
    %746 = math.exp %745 : vector<8x32xf32>
    %cst_231 = arith.constant 1.000000e+00 : f32
    %747 = vector.broadcast %cst_231 : f32 to vector<8x32xf32>
    %748 = arith.addf %747, %746 : vector<8x32xf32>
    %749 = arith.divf %747, %748 : vector<8x32xf32>
    %750 = vector.extract_strided_slice %740 {offsets = [0, 32], sizes = [8, 32], strides = [1, 1]} : vector<8x96xf32> to vector<8x32xf32>
    %751 = vector.extract_strided_slice %741 {offsets = [0, 32], sizes = [8, 32], strides = [1, 1]} : vector<8x96xf32> to vector<8x32xf32>
    %752 = arith.addf %750, %751 : vector<8x32xf32>
    %753 = arith.negf %752 : vector<8x32xf32>
    %754 = math.exp %753 : vector<8x32xf32>
    %cst_232 = arith.constant 1.000000e+00 : f32
    %755 = vector.broadcast %cst_232 : f32 to vector<8x32xf32>
    %756 = arith.addf %755, %754 : vector<8x32xf32>
    %757 = arith.divf %755, %756 : vector<8x32xf32>
    %758 = vector.extract_strided_slice %740 {offsets = [0, 64], sizes = [8, 32], strides = [1, 1]} : vector<8x96xf32> to vector<8x32xf32>
    %759 = vector.extract_strided_slice %741 {offsets = [0, 64], sizes = [8, 32], strides = [1, 1]} : vector<8x96xf32> to vector<8x32xf32>
    %760 = vector.broadcast %723 : vector<1x32xf32> to vector<8x32xf32>
    %761 = arith.addf %759, %760 : vector<8x32xf32>
    %762 = arith.mulf %749, %761 : vector<8x32xf32>
    %763 = arith.addf %758, %762 : vector<8x32xf32>
    %764 = math.tanh %763 : vector<8x32xf32>
    %cst_233 = arith.constant 1.000000e+00 : f32
    %765 = vector.broadcast %cst_233 : f32 to vector<8x32xf32>
    %766 = arith.subf %765, %757 : vector<8x32xf32>
    %767 = arith.mulf %766, %764 : vector<8x32xf32>
    %768 = arith.mulf %757, %737 : vector<8x32xf32>
    %769 = arith.addf %767, %768 : vector<8x32xf32>
    %770 = arith.index_cast %c0_i32_227 : i32 to index
    %c0_234 = arith.constant 0 : index
    %c0_235 = arith.constant 0 : index
    %771 = vector.load %arg2[%770, %c0_234, %c0_235] : memref<8x8x1xf32, #tpu.memory_space<vmem>>, vector<1x8x1xf32>
    %772 = vector.shape_cast %771 : vector<1x8x1xf32> to vector<8x1xf32>
    %773 = arith.subf %769, %737 : vector<8x32xf32>
    %774 = vector.broadcast %772 : vector<8x1xf32> to vector<8x32xf32>
    %775 = arith.mulf %774, %773 : vector<8x32xf32>
    %776 = arith.addf %737, %775 : vector<8x32xf32>
    %c1_i32_236 = arith.constant 1 : i32
    %777 = arith.index_cast %c1_i32_236 : i32 to index
    %c0_237 = arith.constant 0 : index
    %c0_238 = arith.constant 0 : index
    %778 = vector.load %arg26[%777, %c0_237, %c0_238] : memref<8x8x96xf32, #tpu.memory_space<vmem>>, vector<1x8x96xf32>
    %779 = vector.shape_cast %778 : vector<1x8x96xf32> to vector<8x96xf32>
    %cst_239 = arith.constant dense<0.000000e+00> : vector<8x96xf32>
    %780 = tpu.matmul %776, %721, %cst_239 {dimension_numbers = #tpu.dot_dimension_numbers<[1], [0], [0], [1], [0, 0, 1, 1], [], []>} : vector<8x32xf32>, vector<32x96xf32>, vector<8x96xf32> -> vector<8x96xf32>
    %781 = vector.extract_strided_slice %779 {offsets = [0, 0], sizes = [8, 32], strides = [1, 1]} : vector<8x96xf32> to vector<8x32xf32>
    %782 = vector.extract_strided_slice %780 {offsets = [0, 0], sizes = [8, 32], strides = [1, 1]} : vector<8x96xf32> to vector<8x32xf32>
    %783 = arith.addf %781, %782 : vector<8x32xf32>
    %784 = arith.negf %783 : vector<8x32xf32>
    %785 = math.exp %784 : vector<8x32xf32>
    %cst_240 = arith.constant 1.000000e+00 : f32
    %786 = vector.broadcast %cst_240 : f32 to vector<8x32xf32>
    %787 = arith.addf %786, %785 : vector<8x32xf32>
    %788 = arith.divf %786, %787 : vector<8x32xf32>
    %789 = vector.extract_strided_slice %779 {offsets = [0, 32], sizes = [8, 32], strides = [1, 1]} : vector<8x96xf32> to vector<8x32xf32>
    %790 = vector.extract_strided_slice %780 {offsets = [0, 32], sizes = [8, 32], strides = [1, 1]} : vector<8x96xf32> to vector<8x32xf32>
    %791 = arith.addf %789, %790 : vector<8x32xf32>
    %792 = arith.negf %791 : vector<8x32xf32>
    %793 = math.exp %792 : vector<8x32xf32>
    %cst_241 = arith.constant 1.000000e+00 : f32
    %794 = vector.broadcast %cst_241 : f32 to vector<8x32xf32>
    %795 = arith.addf %794, %793 : vector<8x32xf32>
    %796 = arith.divf %794, %795 : vector<8x32xf32>
    %797 = vector.extract_strided_slice %779 {offsets = [0, 64], sizes = [8, 32], strides = [1, 1]} : vector<8x96xf32> to vector<8x32xf32>
    %798 = vector.extract_strided_slice %780 {offsets = [0, 64], sizes = [8, 32], strides = [1, 1]} : vector<8x96xf32> to vector<8x32xf32>
    %799 = vector.broadcast %723 : vector<1x32xf32> to vector<8x32xf32>
    %800 = arith.addf %798, %799 : vector<8x32xf32>
    %801 = arith.mulf %788, %800 : vector<8x32xf32>
    %802 = arith.addf %797, %801 : vector<8x32xf32>
    %803 = math.tanh %802 : vector<8x32xf32>
    %cst_242 = arith.constant 1.000000e+00 : f32
    %804 = vector.broadcast %cst_242 : f32 to vector<8x32xf32>
    %805 = arith.subf %804, %796 : vector<8x32xf32>
    %806 = arith.mulf %805, %803 : vector<8x32xf32>
    %807 = arith.mulf %796, %776 : vector<8x32xf32>
    %808 = arith.addf %806, %807 : vector<8x32xf32>
    %809 = arith.index_cast %c1_i32_236 : i32 to index
    %c0_243 = arith.constant 0 : index
    %c0_244 = arith.constant 0 : index
    %810 = vector.load %arg2[%809, %c0_243, %c0_244] : memref<8x8x1xf32, #tpu.memory_space<vmem>>, vector<1x8x1xf32>
    %811 = vector.shape_cast %810 : vector<1x8x1xf32> to vector<8x1xf32>
    %812 = arith.subf %808, %776 : vector<8x32xf32>
    %813 = vector.broadcast %811 : vector<8x1xf32> to vector<8x32xf32>
    %814 = arith.mulf %813, %812 : vector<8x32xf32>
    %815 = arith.addf %776, %814 : vector<8x32xf32>
    %c2_i32_245 = arith.constant 2 : i32
    %816 = arith.index_cast %c2_i32_245 : i32 to index
    %c0_246 = arith.constant 0 : index
    %c0_247 = arith.constant 0 : index
    %817 = vector.load %arg26[%816, %c0_246, %c0_247] : memref<8x8x96xf32, #tpu.memory_space<vmem>>, vector<1x8x96xf32>
    %818 = vector.shape_cast %817 : vector<1x8x96xf32> to vector<8x96xf32>
    %cst_248 = arith.constant dense<0.000000e+00> : vector<8x96xf32>
    %819 = tpu.matmul %815, %721, %cst_248 {dimension_numbers = #tpu.dot_dimension_numbers<[1], [0], [0], [1], [0, 0, 1, 1], [], []>} : vector<8x32xf32>, vector<32x96xf32>, vector<8x96xf32> -> vector<8x96xf32>
    %820 = vector.extract_strided_slice %818 {offsets = [0, 0], sizes = [8, 32], strides = [1, 1]} : vector<8x96xf32> to vector<8x32xf32>
    %821 = vector.extract_strided_slice %819 {offsets = [0, 0], sizes = [8, 32], strides = [1, 1]} : vector<8x96xf32> to vector<8x32xf32>
    %822 = arith.addf %820, %821 : vector<8x32xf32>
    %823 = arith.negf %822 : vector<8x32xf32>
    %824 = math.exp %823 : vector<8x32xf32>
    %cst_249 = arith.constant 1.000000e+00 : f32
    %825 = vector.broadcast %cst_249 : f32 to vector<8x32xf32>
    %826 = arith.addf %825, %824 : vector<8x32xf32>
    %827 = arith.divf %825, %826 : vector<8x32xf32>
    %828 = vector.extract_strided_slice %818 {offsets = [0, 32], sizes = [8, 32], strides = [1, 1]} : vector<8x96xf32> to vector<8x32xf32>
    %829 = vector.extract_strided_slice %819 {offsets = [0, 32], sizes = [8, 32], strides = [1, 1]} : vector<8x96xf32> to vector<8x32xf32>
    %830 = arith.addf %828, %829 : vector<8x32xf32>
    %831 = arith.negf %830 : vector<8x32xf32>
    %832 = math.exp %831 : vector<8x32xf32>
    %cst_250 = arith.constant 1.000000e+00 : f32
    %833 = vector.broadcast %cst_250 : f32 to vector<8x32xf32>
    %834 = arith.addf %833, %832 : vector<8x32xf32>
    %835 = arith.divf %833, %834 : vector<8x32xf32>
    %836 = vector.extract_strided_slice %818 {offsets = [0, 64], sizes = [8, 32], strides = [1, 1]} : vector<8x96xf32> to vector<8x32xf32>
    %837 = vector.extract_strided_slice %819 {offsets = [0, 64], sizes = [8, 32], strides = [1, 1]} : vector<8x96xf32> to vector<8x32xf32>
    %838 = vector.broadcast %723 : vector<1x32xf32> to vector<8x32xf32>
    %839 = arith.addf %837, %838 : vector<8x32xf32>
    %840 = arith.mulf %827, %839 : vector<8x32xf32>
    %841 = arith.addf %836, %840 : vector<8x32xf32>
    %842 = math.tanh %841 : vector<8x32xf32>
    %cst_251 = arith.constant 1.000000e+00 : f32
    %843 = vector.broadcast %cst_251 : f32 to vector<8x32xf32>
    %844 = arith.subf %843, %835 : vector<8x32xf32>
    %845 = arith.mulf %844, %842 : vector<8x32xf32>
    %846 = arith.mulf %835, %815 : vector<8x32xf32>
    %847 = arith.addf %845, %846 : vector<8x32xf32>
    %848 = arith.index_cast %c2_i32_245 : i32 to index
    %c0_252 = arith.constant 0 : index
    %c0_253 = arith.constant 0 : index
    %849 = vector.load %arg2[%848, %c0_252, %c0_253] : memref<8x8x1xf32, #tpu.memory_space<vmem>>, vector<1x8x1xf32>
    %850 = vector.shape_cast %849 : vector<1x8x1xf32> to vector<8x1xf32>
    %851 = arith.subf %847, %815 : vector<8x32xf32>
    %852 = vector.broadcast %850 : vector<8x1xf32> to vector<8x32xf32>
    %853 = arith.mulf %852, %851 : vector<8x32xf32>
    %854 = arith.addf %815, %853 : vector<8x32xf32>
    %c3_i32_254 = arith.constant 3 : i32
    %855 = arith.index_cast %c3_i32_254 : i32 to index
    %c0_255 = arith.constant 0 : index
    %c0_256 = arith.constant 0 : index
    %856 = vector.load %arg26[%855, %c0_255, %c0_256] : memref<8x8x96xf32, #tpu.memory_space<vmem>>, vector<1x8x96xf32>
    %857 = vector.shape_cast %856 : vector<1x8x96xf32> to vector<8x96xf32>
    %cst_257 = arith.constant dense<0.000000e+00> : vector<8x96xf32>
    %858 = tpu.matmul %854, %721, %cst_257 {dimension_numbers = #tpu.dot_dimension_numbers<[1], [0], [0], [1], [0, 0, 1, 1], [], []>} : vector<8x32xf32>, vector<32x96xf32>, vector<8x96xf32> -> vector<8x96xf32>
    %859 = vector.extract_strided_slice %857 {offsets = [0, 0], sizes = [8, 32], strides = [1, 1]} : vector<8x96xf32> to vector<8x32xf32>
    %860 = vector.extract_strided_slice %858 {offsets = [0, 0], sizes = [8, 32], strides = [1, 1]} : vector<8x96xf32> to vector<8x32xf32>
    %861 = arith.addf %859, %860 : vector<8x32xf32>
    %862 = arith.negf %861 : vector<8x32xf32>
    %863 = math.exp %862 : vector<8x32xf32>
    %cst_258 = arith.constant 1.000000e+00 : f32
    %864 = vector.broadcast %cst_258 : f32 to vector<8x32xf32>
    %865 = arith.addf %864, %863 : vector<8x32xf32>
    %866 = arith.divf %864, %865 : vector<8x32xf32>
    %867 = vector.extract_strided_slice %857 {offsets = [0, 32], sizes = [8, 32], strides = [1, 1]} : vector<8x96xf32> to vector<8x32xf32>
    %868 = vector.extract_strided_slice %858 {offsets = [0, 32], sizes = [8, 32], strides = [1, 1]} : vector<8x96xf32> to vector<8x32xf32>
    %869 = arith.addf %867, %868 : vector<8x32xf32>
    %870 = arith.negf %869 : vector<8x32xf32>
    %871 = math.exp %870 : vector<8x32xf32>
    %cst_259 = arith.constant 1.000000e+00 : f32
    %872 = vector.broadcast %cst_259 : f32 to vector<8x32xf32>
    %873 = arith.addf %872, %871 : vector<8x32xf32>
    %874 = arith.divf %872, %873 : vector<8x32xf32>
    %875 = vector.extract_strided_slice %857 {offsets = [0, 64], sizes = [8, 32], strides = [1, 1]} : vector<8x96xf32> to vector<8x32xf32>
    %876 = vector.extract_strided_slice %858 {offsets = [0, 64], sizes = [8, 32], strides = [1, 1]} : vector<8x96xf32> to vector<8x32xf32>
    %877 = vector.broadcast %723 : vector<1x32xf32> to vector<8x32xf32>
    %878 = arith.addf %876, %877 : vector<8x32xf32>
    %879 = arith.mulf %866, %878 : vector<8x32xf32>
    %880 = arith.addf %875, %879 : vector<8x32xf32>
    %881 = math.tanh %880 : vector<8x32xf32>
    %cst_260 = arith.constant 1.000000e+00 : f32
    %882 = vector.broadcast %cst_260 : f32 to vector<8x32xf32>
    %883 = arith.subf %882, %874 : vector<8x32xf32>
    %884 = arith.mulf %883, %881 : vector<8x32xf32>
    %885 = arith.mulf %874, %854 : vector<8x32xf32>
    %886 = arith.addf %884, %885 : vector<8x32xf32>
    %887 = arith.index_cast %c3_i32_254 : i32 to index
    %c0_261 = arith.constant 0 : index
    %c0_262 = arith.constant 0 : index
    %888 = vector.load %arg2[%887, %c0_261, %c0_262] : memref<8x8x1xf32, #tpu.memory_space<vmem>>, vector<1x8x1xf32>
    %889 = vector.shape_cast %888 : vector<1x8x1xf32> to vector<8x1xf32>
    %890 = arith.subf %886, %854 : vector<8x32xf32>
    %891 = vector.broadcast %889 : vector<8x1xf32> to vector<8x32xf32>
    %892 = arith.mulf %891, %890 : vector<8x32xf32>
    %893 = arith.addf %854, %892 : vector<8x32xf32>
    %c4_i32_263 = arith.constant 4 : i32
    %894 = arith.index_cast %c4_i32_263 : i32 to index
    %c0_264 = arith.constant 0 : index
    %c0_265 = arith.constant 0 : index
    %895 = vector.load %arg26[%894, %c0_264, %c0_265] : memref<8x8x96xf32, #tpu.memory_space<vmem>>, vector<1x8x96xf32>
    %896 = vector.shape_cast %895 : vector<1x8x96xf32> to vector<8x96xf32>
    %cst_266 = arith.constant dense<0.000000e+00> : vector<8x96xf32>
    %897 = tpu.matmul %893, %721, %cst_266 {dimension_numbers = #tpu.dot_dimension_numbers<[1], [0], [0], [1], [0, 0, 1, 1], [], []>} : vector<8x32xf32>, vector<32x96xf32>, vector<8x96xf32> -> vector<8x96xf32>
    %898 = vector.extract_strided_slice %896 {offsets = [0, 0], sizes = [8, 32], strides = [1, 1]} : vector<8x96xf32> to vector<8x32xf32>
    %899 = vector.extract_strided_slice %897 {offsets = [0, 0], sizes = [8, 32], strides = [1, 1]} : vector<8x96xf32> to vector<8x32xf32>
    %900 = arith.addf %898, %899 : vector<8x32xf32>
    %901 = arith.negf %900 : vector<8x32xf32>
    %902 = math.exp %901 : vector<8x32xf32>
    %cst_267 = arith.constant 1.000000e+00 : f32
    %903 = vector.broadcast %cst_267 : f32 to vector<8x32xf32>
    %904 = arith.addf %903, %902 : vector<8x32xf32>
    %905 = arith.divf %903, %904 : vector<8x32xf32>
    %906 = vector.extract_strided_slice %896 {offsets = [0, 32], sizes = [8, 32], strides = [1, 1]} : vector<8x96xf32> to vector<8x32xf32>
    %907 = vector.extract_strided_slice %897 {offsets = [0, 32], sizes = [8, 32], strides = [1, 1]} : vector<8x96xf32> to vector<8x32xf32>
    %908 = arith.addf %906, %907 : vector<8x32xf32>
    %909 = arith.negf %908 : vector<8x32xf32>
    %910 = math.exp %909 : vector<8x32xf32>
    %cst_268 = arith.constant 1.000000e+00 : f32
    %911 = vector.broadcast %cst_268 : f32 to vector<8x32xf32>
    %912 = arith.addf %911, %910 : vector<8x32xf32>
    %913 = arith.divf %911, %912 : vector<8x32xf32>
    %914 = vector.extract_strided_slice %896 {offsets = [0, 64], sizes = [8, 32], strides = [1, 1]} : vector<8x96xf32> to vector<8x32xf32>
    %915 = vector.extract_strided_slice %897 {offsets = [0, 64], sizes = [8, 32], strides = [1, 1]} : vector<8x96xf32> to vector<8x32xf32>
    %916 = vector.broadcast %723 : vector<1x32xf32> to vector<8x32xf32>
    %917 = arith.addf %915, %916 : vector<8x32xf32>
    %918 = arith.mulf %905, %917 : vector<8x32xf32>
    %919 = arith.addf %914, %918 : vector<8x32xf32>
    %920 = math.tanh %919 : vector<8x32xf32>
    %cst_269 = arith.constant 1.000000e+00 : f32
    %921 = vector.broadcast %cst_269 : f32 to vector<8x32xf32>
    %922 = arith.subf %921, %913 : vector<8x32xf32>
    %923 = arith.mulf %922, %920 : vector<8x32xf32>
    %924 = arith.mulf %913, %893 : vector<8x32xf32>
    %925 = arith.addf %923, %924 : vector<8x32xf32>
    %926 = arith.index_cast %c4_i32_263 : i32 to index
    %c0_270 = arith.constant 0 : index
    %c0_271 = arith.constant 0 : index
    %927 = vector.load %arg2[%926, %c0_270, %c0_271] : memref<8x8x1xf32, #tpu.memory_space<vmem>>, vector<1x8x1xf32>
    %928 = vector.shape_cast %927 : vector<1x8x1xf32> to vector<8x1xf32>
    %929 = arith.subf %925, %893 : vector<8x32xf32>
    %930 = vector.broadcast %928 : vector<8x1xf32> to vector<8x32xf32>
    %931 = arith.mulf %930, %929 : vector<8x32xf32>
    %932 = arith.addf %893, %931 : vector<8x32xf32>
    %c5_i32_272 = arith.constant 5 : i32
    %933 = arith.index_cast %c5_i32_272 : i32 to index
    %c0_273 = arith.constant 0 : index
    %c0_274 = arith.constant 0 : index
    %934 = vector.load %arg26[%933, %c0_273, %c0_274] : memref<8x8x96xf32, #tpu.memory_space<vmem>>, vector<1x8x96xf32>
    %935 = vector.shape_cast %934 : vector<1x8x96xf32> to vector<8x96xf32>
    %cst_275 = arith.constant dense<0.000000e+00> : vector<8x96xf32>
    %936 = tpu.matmul %932, %721, %cst_275 {dimension_numbers = #tpu.dot_dimension_numbers<[1], [0], [0], [1], [0, 0, 1, 1], [], []>} : vector<8x32xf32>, vector<32x96xf32>, vector<8x96xf32> -> vector<8x96xf32>
    %937 = vector.extract_strided_slice %935 {offsets = [0, 0], sizes = [8, 32], strides = [1, 1]} : vector<8x96xf32> to vector<8x32xf32>
    %938 = vector.extract_strided_slice %936 {offsets = [0, 0], sizes = [8, 32], strides = [1, 1]} : vector<8x96xf32> to vector<8x32xf32>
    %939 = arith.addf %937, %938 : vector<8x32xf32>
    %940 = arith.negf %939 : vector<8x32xf32>
    %941 = math.exp %940 : vector<8x32xf32>
    %cst_276 = arith.constant 1.000000e+00 : f32
    %942 = vector.broadcast %cst_276 : f32 to vector<8x32xf32>
    %943 = arith.addf %942, %941 : vector<8x32xf32>
    %944 = arith.divf %942, %943 : vector<8x32xf32>
    %945 = vector.extract_strided_slice %935 {offsets = [0, 32], sizes = [8, 32], strides = [1, 1]} : vector<8x96xf32> to vector<8x32xf32>
    %946 = vector.extract_strided_slice %936 {offsets = [0, 32], sizes = [8, 32], strides = [1, 1]} : vector<8x96xf32> to vector<8x32xf32>
    %947 = arith.addf %945, %946 : vector<8x32xf32>
    %948 = arith.negf %947 : vector<8x32xf32>
    %949 = math.exp %948 : vector<8x32xf32>
    %cst_277 = arith.constant 1.000000e+00 : f32
    %950 = vector.broadcast %cst_277 : f32 to vector<8x32xf32>
    %951 = arith.addf %950, %949 : vector<8x32xf32>
    %952 = arith.divf %950, %951 : vector<8x32xf32>
    %953 = vector.extract_strided_slice %935 {offsets = [0, 64], sizes = [8, 32], strides = [1, 1]} : vector<8x96xf32> to vector<8x32xf32>
    %954 = vector.extract_strided_slice %936 {offsets = [0, 64], sizes = [8, 32], strides = [1, 1]} : vector<8x96xf32> to vector<8x32xf32>
    %955 = vector.broadcast %723 : vector<1x32xf32> to vector<8x32xf32>
    %956 = arith.addf %954, %955 : vector<8x32xf32>
    %957 = arith.mulf %944, %956 : vector<8x32xf32>
    %958 = arith.addf %953, %957 : vector<8x32xf32>
    %959 = math.tanh %958 : vector<8x32xf32>
    %cst_278 = arith.constant 1.000000e+00 : f32
    %960 = vector.broadcast %cst_278 : f32 to vector<8x32xf32>
    %961 = arith.subf %960, %952 : vector<8x32xf32>
    %962 = arith.mulf %961, %959 : vector<8x32xf32>
    %963 = arith.mulf %952, %932 : vector<8x32xf32>
    %964 = arith.addf %962, %963 : vector<8x32xf32>
    %965 = arith.index_cast %c5_i32_272 : i32 to index
    %c0_279 = arith.constant 0 : index
    %c0_280 = arith.constant 0 : index
    %966 = vector.load %arg2[%965, %c0_279, %c0_280] : memref<8x8x1xf32, #tpu.memory_space<vmem>>, vector<1x8x1xf32>
    %967 = vector.shape_cast %966 : vector<1x8x1xf32> to vector<8x1xf32>
    %968 = arith.subf %964, %932 : vector<8x32xf32>
    %969 = vector.broadcast %967 : vector<8x1xf32> to vector<8x32xf32>
    %970 = arith.mulf %969, %968 : vector<8x32xf32>
    %971 = arith.addf %932, %970 : vector<8x32xf32>
    %c6_i32_281 = arith.constant 6 : i32
    %972 = arith.index_cast %c6_i32_281 : i32 to index
    %c0_282 = arith.constant 0 : index
    %c0_283 = arith.constant 0 : index
    %973 = vector.load %arg26[%972, %c0_282, %c0_283] : memref<8x8x96xf32, #tpu.memory_space<vmem>>, vector<1x8x96xf32>
    %974 = vector.shape_cast %973 : vector<1x8x96xf32> to vector<8x96xf32>
    %cst_284 = arith.constant dense<0.000000e+00> : vector<8x96xf32>
    %975 = tpu.matmul %971, %721, %cst_284 {dimension_numbers = #tpu.dot_dimension_numbers<[1], [0], [0], [1], [0, 0, 1, 1], [], []>} : vector<8x32xf32>, vector<32x96xf32>, vector<8x96xf32> -> vector<8x96xf32>
    %976 = vector.extract_strided_slice %974 {offsets = [0, 0], sizes = [8, 32], strides = [1, 1]} : vector<8x96xf32> to vector<8x32xf32>
    %977 = vector.extract_strided_slice %975 {offsets = [0, 0], sizes = [8, 32], strides = [1, 1]} : vector<8x96xf32> to vector<8x32xf32>
    %978 = arith.addf %976, %977 : vector<8x32xf32>
    %979 = arith.negf %978 : vector<8x32xf32>
    %980 = math.exp %979 : vector<8x32xf32>
    %cst_285 = arith.constant 1.000000e+00 : f32
    %981 = vector.broadcast %cst_285 : f32 to vector<8x32xf32>
    %982 = arith.addf %981, %980 : vector<8x32xf32>
    %983 = arith.divf %981, %982 : vector<8x32xf32>
    %984 = vector.extract_strided_slice %974 {offsets = [0, 32], sizes = [8, 32], strides = [1, 1]} : vector<8x96xf32> to vector<8x32xf32>
    %985 = vector.extract_strided_slice %975 {offsets = [0, 32], sizes = [8, 32], strides = [1, 1]} : vector<8x96xf32> to vector<8x32xf32>
    %986 = arith.addf %984, %985 : vector<8x32xf32>
    %987 = arith.negf %986 : vector<8x32xf32>
    %988 = math.exp %987 : vector<8x32xf32>
    %cst_286 = arith.constant 1.000000e+00 : f32
    %989 = vector.broadcast %cst_286 : f32 to vector<8x32xf32>
    %990 = arith.addf %989, %988 : vector<8x32xf32>
    %991 = arith.divf %989, %990 : vector<8x32xf32>
    %992 = vector.extract_strided_slice %974 {offsets = [0, 64], sizes = [8, 32], strides = [1, 1]} : vector<8x96xf32> to vector<8x32xf32>
    %993 = vector.extract_strided_slice %975 {offsets = [0, 64], sizes = [8, 32], strides = [1, 1]} : vector<8x96xf32> to vector<8x32xf32>
    %994 = vector.broadcast %723 : vector<1x32xf32> to vector<8x32xf32>
    %995 = arith.addf %993, %994 : vector<8x32xf32>
    %996 = arith.mulf %983, %995 : vector<8x32xf32>
    %997 = arith.addf %992, %996 : vector<8x32xf32>
    %998 = math.tanh %997 : vector<8x32xf32>
    %cst_287 = arith.constant 1.000000e+00 : f32
    %999 = vector.broadcast %cst_287 : f32 to vector<8x32xf32>
    %1000 = arith.subf %999, %991 : vector<8x32xf32>
    %1001 = arith.mulf %1000, %998 : vector<8x32xf32>
    %1002 = arith.mulf %991, %971 : vector<8x32xf32>
    %1003 = arith.addf %1001, %1002 : vector<8x32xf32>
    %1004 = arith.index_cast %c6_i32_281 : i32 to index
    %c0_288 = arith.constant 0 : index
    %c0_289 = arith.constant 0 : index
    %1005 = vector.load %arg2[%1004, %c0_288, %c0_289] : memref<8x8x1xf32, #tpu.memory_space<vmem>>, vector<1x8x1xf32>
    %1006 = vector.shape_cast %1005 : vector<1x8x1xf32> to vector<8x1xf32>
    %1007 = arith.subf %1003, %971 : vector<8x32xf32>
    %1008 = vector.broadcast %1006 : vector<8x1xf32> to vector<8x32xf32>
    %1009 = arith.mulf %1008, %1007 : vector<8x32xf32>
    %1010 = arith.addf %971, %1009 : vector<8x32xf32>
    %c7_i32_290 = arith.constant 7 : i32
    %1011 = arith.index_cast %c7_i32_290 : i32 to index
    %c0_291 = arith.constant 0 : index
    %c0_292 = arith.constant 0 : index
    %1012 = vector.load %arg26[%1011, %c0_291, %c0_292] : memref<8x8x96xf32, #tpu.memory_space<vmem>>, vector<1x8x96xf32>
    %1013 = vector.shape_cast %1012 : vector<1x8x96xf32> to vector<8x96xf32>
    %cst_293 = arith.constant dense<0.000000e+00> : vector<8x96xf32>
    %1014 = tpu.matmul %1010, %721, %cst_293 {dimension_numbers = #tpu.dot_dimension_numbers<[1], [0], [0], [1], [0, 0, 1, 1], [], []>} : vector<8x32xf32>, vector<32x96xf32>, vector<8x96xf32> -> vector<8x96xf32>
    %1015 = vector.extract_strided_slice %1013 {offsets = [0, 0], sizes = [8, 32], strides = [1, 1]} : vector<8x96xf32> to vector<8x32xf32>
    %1016 = vector.extract_strided_slice %1014 {offsets = [0, 0], sizes = [8, 32], strides = [1, 1]} : vector<8x96xf32> to vector<8x32xf32>
    %1017 = arith.addf %1015, %1016 : vector<8x32xf32>
    %1018 = arith.negf %1017 : vector<8x32xf32>
    %1019 = math.exp %1018 : vector<8x32xf32>
    %cst_294 = arith.constant 1.000000e+00 : f32
    %1020 = vector.broadcast %cst_294 : f32 to vector<8x32xf32>
    %1021 = arith.addf %1020, %1019 : vector<8x32xf32>
    %1022 = arith.divf %1020, %1021 : vector<8x32xf32>
    %1023 = vector.extract_strided_slice %1013 {offsets = [0, 32], sizes = [8, 32], strides = [1, 1]} : vector<8x96xf32> to vector<8x32xf32>
    %1024 = vector.extract_strided_slice %1014 {offsets = [0, 32], sizes = [8, 32], strides = [1, 1]} : vector<8x96xf32> to vector<8x32xf32>
    %1025 = arith.addf %1023, %1024 : vector<8x32xf32>
    %1026 = arith.negf %1025 : vector<8x32xf32>
    %1027 = math.exp %1026 : vector<8x32xf32>
    %cst_295 = arith.constant 1.000000e+00 : f32
    %1028 = vector.broadcast %cst_295 : f32 to vector<8x32xf32>
    %1029 = arith.addf %1028, %1027 : vector<8x32xf32>
    %1030 = arith.divf %1028, %1029 : vector<8x32xf32>
    %1031 = vector.extract_strided_slice %1013 {offsets = [0, 64], sizes = [8, 32], strides = [1, 1]} : vector<8x96xf32> to vector<8x32xf32>
    %1032 = vector.extract_strided_slice %1014 {offsets = [0, 64], sizes = [8, 32], strides = [1, 1]} : vector<8x96xf32> to vector<8x32xf32>
    %1033 = vector.broadcast %723 : vector<1x32xf32> to vector<8x32xf32>
    %1034 = arith.addf %1032, %1033 : vector<8x32xf32>
    %1035 = arith.mulf %1022, %1034 : vector<8x32xf32>
    %1036 = arith.addf %1031, %1035 : vector<8x32xf32>
    %1037 = math.tanh %1036 : vector<8x32xf32>
    %cst_296 = arith.constant 1.000000e+00 : f32
    %1038 = vector.broadcast %cst_296 : f32 to vector<8x32xf32>
    %1039 = arith.subf %1038, %1030 : vector<8x32xf32>
    %1040 = arith.mulf %1039, %1037 : vector<8x32xf32>
    %1041 = arith.mulf %1030, %1010 : vector<8x32xf32>
    %1042 = arith.addf %1040, %1041 : vector<8x32xf32>
    %1043 = arith.index_cast %c7_i32_290 : i32 to index
    %c0_297 = arith.constant 0 : index
    %c0_298 = arith.constant 0 : index
    %1044 = vector.load %arg2[%1043, %c0_297, %c0_298] : memref<8x8x1xf32, #tpu.memory_space<vmem>>, vector<1x8x1xf32>
    %1045 = vector.shape_cast %1044 : vector<1x8x1xf32> to vector<8x1xf32>
    %1046 = arith.subf %1042, %1010 : vector<8x32xf32>
    %1047 = vector.broadcast %1045 : vector<8x1xf32> to vector<8x32xf32>
    %1048 = arith.mulf %1047, %1046 : vector<8x32xf32>
    %1049 = arith.addf %1010, %1048 : vector<8x32xf32>
    %c8_i32_299 = arith.constant 8 : i32
    %c0_300 = arith.constant 0 : index
    %c0_301 = arith.constant 0 : index
    %1050 = vector.load %arg15[%c0_300, %c0_301] : memref<64x96xf32, #tpu.memory_space<vmem>>, vector<64x96xf32>
    %c0_302 = arith.constant 0 : index
    %c0_303 = arith.constant 0 : index
    %1051 = vector.load %arg16[%c0_302, %c0_303] : memref<32x96xf32, #tpu.memory_space<vmem>>, vector<32x96xf32>
    %c0_304 = arith.constant 0 : index
    %c0_305 = arith.constant 0 : index
    %1052 = vector.load %arg17[%c0_304, %c0_305] : memref<1x96xf32, #tpu.memory_space<vmem>>, vector<1x96xf32>
    %c0_306 = arith.constant 0 : index
    %c0_307 = arith.constant 0 : index
    %1053 = vector.load %arg18[%c0_306, %c0_307] : memref<1x32xf32, #tpu.memory_space<vmem>>, vector<1x32xf32>
    %c0_308 = arith.constant 0 : index
    %c0_309 = arith.constant 0 : index
    %c0_310 = arith.constant 0 : index
    %1054 = vector.load %arg27[%c0_308, %c0_309, %c0_310] : memref<8x8x32xf32, #tpu.memory_space<vmem>>, vector<8x8x32xf32>
    %1055 = vector.shape_cast %1054 : vector<8x8x32xf32> to vector<64x32xf32>
    %1056 = vector.extract_strided_slice %1050 {offsets = [0, 0], sizes = [32, 96], strides = [1, 1]} : vector<64x96xf32> to vector<32x96xf32>
    %cst_311 = arith.constant dense<0.000000e+00> : vector<64x96xf32>
    %1057 = tpu.matmul %1055, %1056, %cst_311 {dimension_numbers = #tpu.dot_dimension_numbers<[1], [0], [0], [1], [0, 0, 1, 1], [], []>} : vector<64x32xf32>, vector<32x96xf32>, vector<64x96xf32> -> vector<64x96xf32>
    %c0_312 = arith.constant 0 : index
    %c0_313 = arith.constant 0 : index
    %c0_314 = arith.constant 0 : index
    %1058 = vector.load %arg28[%c0_312, %c0_313, %c0_314] : memref<8x8x32xf32, #tpu.memory_space<vmem>>, vector<8x8x32xf32>
    %1059 = vector.shape_cast %1058 : vector<8x8x32xf32> to vector<64x32xf32>
    %1060 = vector.extract_strided_slice %1050 {offsets = [32, 0], sizes = [32, 96], strides = [1, 1]} : vector<64x96xf32> to vector<32x96xf32>
    %cst_315 = arith.constant dense<0.000000e+00> : vector<64x96xf32>
    %1061 = tpu.matmul %1059, %1060, %cst_315 {dimension_numbers = #tpu.dot_dimension_numbers<[1], [0], [0], [1], [0, 0, 1, 1], [], []>} : vector<64x32xf32>, vector<32x96xf32>, vector<64x96xf32> -> vector<64x96xf32>
    %1062 = arith.addf %1057, %1061 : vector<64x96xf32>
    %1063 = vector.broadcast %1052 : vector<1x96xf32> to vector<64x96xf32>
    %1064 = arith.addf %1062, %1063 : vector<64x96xf32>
    %1065 = vector.shape_cast %1064 : vector<64x96xf32> to vector<8x8x96xf32>
    %c0_316 = arith.constant 0 : index
    %c0_317 = arith.constant 0 : index
    %c0_318 = arith.constant 0 : index
    %1066 = vector.load %arg26[%c0_316, %c0_317, %c0_318] : memref<8x8x96xf32, #tpu.memory_space<vmem>>, vector<8x8x96xf32>
    tpu.vector_store %arg26[%c0_316, %c0_317, %c0_318], %1065 {strides = array<i32>} : memref<8x8x96xf32, #tpu.memory_space<vmem>>, vector<8x8x96xf32>,
    %cst_319 = arith.constant 0.000000e+00 : f32
    %1067 = vector.broadcast %cst_319 : f32 to vector<8x32xf32>
    %c0_i32_320 = arith.constant 0 : i32
    %c7_i32_321 = arith.constant 7 : i32
    %1068 = arith.subi %c7_i32_321, %c0_i32_320 : i32
    %1069 = arith.index_cast %1068 : i32 to index
    %c0_322 = arith.constant 0 : index
    %c0_323 = arith.constant 0 : index
    %1070 = vector.load %arg26[%1069, %c0_322, %c0_323] : memref<8x8x96xf32, #tpu.memory_space<vmem>>, vector<1x8x96xf32>
    %1071 = vector.shape_cast %1070 : vector<1x8x96xf32> to vector<8x96xf32>
    %cst_324 = arith.constant dense<0.000000e+00> : vector<8x96xf32>
    %1072 = tpu.matmul %1067, %1051, %cst_324 {dimension_numbers = #tpu.dot_dimension_numbers<[1], [0], [0], [1], [0, 0, 1, 1], [], []>} : vector<8x32xf32>, vector<32x96xf32>, vector<8x96xf32> -> vector<8x96xf32>
    %1073 = vector.extract_strided_slice %1071 {offsets = [0, 0], sizes = [8, 32], strides = [1, 1]} : vector<8x96xf32> to vector<8x32xf32>
    %1074 = vector.extract_strided_slice %1072 {offsets = [0, 0], sizes = [8, 32], strides = [1, 1]} : vector<8x96xf32> to vector<8x32xf32>
    %1075 = arith.addf %1073, %1074 : vector<8x32xf32>
    %1076 = arith.negf %1075 : vector<8x32xf32>
    %1077 = math.exp %1076 : vector<8x32xf32>
    %cst_325 = arith.constant 1.000000e+00 : f32
    %1078 = vector.broadcast %cst_325 : f32 to vector<8x32xf32>
    %1079 = arith.addf %1078, %1077 : vector<8x32xf32>
    %1080 = arith.divf %1078, %1079 : vector<8x32xf32>
    %1081 = vector.extract_strided_slice %1071 {offsets = [0, 32], sizes = [8, 32], strides = [1, 1]} : vector<8x96xf32> to vector<8x32xf32>
    %1082 = vector.extract_strided_slice %1072 {offsets = [0, 32], sizes = [8, 32], strides = [1, 1]} : vector<8x96xf32> to vector<8x32xf32>
    %1083 = arith.addf %1081, %1082 : vector<8x32xf32>
    %1084 = arith.negf %1083 : vector<8x32xf32>
    %1085 = math.exp %1084 : vector<8x32xf32>
    %cst_326 = arith.constant 1.000000e+00 : f32
    %1086 = vector.broadcast %cst_326 : f32 to vector<8x32xf32>
    %1087 = arith.addf %1086, %1085 : vector<8x32xf32>
    %1088 = arith.divf %1086, %1087 : vector<8x32xf32>
    %1089 = vector.extract_strided_slice %1071 {offsets = [0, 64], sizes = [8, 32], strides = [1, 1]} : vector<8x96xf32> to vector<8x32xf32>
    %1090 = vector.extract_strided_slice %1072 {offsets = [0, 64], sizes = [8, 32], strides = [1, 1]} : vector<8x96xf32> to vector<8x32xf32>
    %1091 = vector.broadcast %1053 : vector<1x32xf32> to vector<8x32xf32>
    %1092 = arith.addf %1090, %1091 : vector<8x32xf32>
    %1093 = arith.mulf %1080, %1092 : vector<8x32xf32>
    %1094 = arith.addf %1089, %1093 : vector<8x32xf32>
    %1095 = math.tanh %1094 : vector<8x32xf32>
    %cst_327 = arith.constant 1.000000e+00 : f32
    %1096 = vector.broadcast %cst_327 : f32 to vector<8x32xf32>
    %1097 = arith.subf %1096, %1088 : vector<8x32xf32>
    %1098 = arith.mulf %1097, %1095 : vector<8x32xf32>
    %1099 = arith.mulf %1088, %1067 : vector<8x32xf32>
    %1100 = arith.addf %1098, %1099 : vector<8x32xf32>
    %1101 = arith.index_cast %1068 : i32 to index
    %c0_328 = arith.constant 0 : index
    %c0_329 = arith.constant 0 : index
    %1102 = vector.load %arg2[%1101, %c0_328, %c0_329] : memref<8x8x1xf32, #tpu.memory_space<vmem>>, vector<1x8x1xf32>
    %1103 = vector.shape_cast %1102 : vector<1x8x1xf32> to vector<8x1xf32>
    %1104 = arith.subf %1100, %1067 : vector<8x32xf32>
    %1105 = vector.broadcast %1103 : vector<8x1xf32> to vector<8x32xf32>
    %1106 = arith.mulf %1105, %1104 : vector<8x32xf32>
    %1107 = arith.addf %1067, %1106 : vector<8x32xf32>
    %c1_i32_330 = arith.constant 1 : i32
    %c7_i32_331 = arith.constant 7 : i32
    %1108 = arith.subi %c7_i32_331, %c1_i32_330 : i32
    %1109 = arith.index_cast %1108 : i32 to index
    %c0_332 = arith.constant 0 : index
    %c0_333 = arith.constant 0 : index
    %1110 = vector.load %arg26[%1109, %c0_332, %c0_333] : memref<8x8x96xf32, #tpu.memory_space<vmem>>, vector<1x8x96xf32>
    %1111 = vector.shape_cast %1110 : vector<1x8x96xf32> to vector<8x96xf32>
    %cst_334 = arith.constant dense<0.000000e+00> : vector<8x96xf32>
    %1112 = tpu.matmul %1107, %1051, %cst_334 {dimension_numbers = #tpu.dot_dimension_numbers<[1], [0], [0], [1], [0, 0, 1, 1], [], []>} : vector<8x32xf32>, vector<32x96xf32>, vector<8x96xf32> -> vector<8x96xf32>
    %1113 = vector.extract_strided_slice %1111 {offsets = [0, 0], sizes = [8, 32], strides = [1, 1]} : vector<8x96xf32> to vector<8x32xf32>
    %1114 = vector.extract_strided_slice %1112 {offsets = [0, 0], sizes = [8, 32], strides = [1, 1]} : vector<8x96xf32> to vector<8x32xf32>
    %1115 = arith.addf %1113, %1114 : vector<8x32xf32>
    %1116 = arith.negf %1115 : vector<8x32xf32>
    %1117 = math.exp %1116 : vector<8x32xf32>
    %cst_335 = arith.constant 1.000000e+00 : f32
    %1118 = vector.broadcast %cst_335 : f32 to vector<8x32xf32>
    %1119 = arith.addf %1118, %1117 : vector<8x32xf32>
    %1120 = arith.divf %1118, %1119 : vector<8x32xf32>
    %1121 = vector.extract_strided_slice %1111 {offsets = [0, 32], sizes = [8, 32], strides = [1, 1]} : vector<8x96xf32> to vector<8x32xf32>
    %1122 = vector.extract_strided_slice %1112 {offsets = [0, 32], sizes = [8, 32], strides = [1, 1]} : vector<8x96xf32> to vector<8x32xf32>
    %1123 = arith.addf %1121, %1122 : vector<8x32xf32>
    %1124 = arith.negf %1123 : vector<8x32xf32>
    %1125 = math.exp %1124 : vector<8x32xf32>
    %cst_336 = arith.constant 1.000000e+00 : f32
    %1126 = vector.broadcast %cst_336 : f32 to vector<8x32xf32>
    %1127 = arith.addf %1126, %1125 : vector<8x32xf32>
    %1128 = arith.divf %1126, %1127 : vector<8x32xf32>
    %1129 = vector.extract_strided_slice %1111 {offsets = [0, 64], sizes = [8, 32], strides = [1, 1]} : vector<8x96xf32> to vector<8x32xf32>
    %1130 = vector.extract_strided_slice %1112 {offsets = [0, 64], sizes = [8, 32], strides = [1, 1]} : vector<8x96xf32> to vector<8x32xf32>
    %1131 = vector.broadcast %1053 : vector<1x32xf32> to vector<8x32xf32>
    %1132 = arith.addf %1130, %1131 : vector<8x32xf32>
    %1133 = arith.mulf %1120, %1132 : vector<8x32xf32>
    %1134 = arith.addf %1129, %1133 : vector<8x32xf32>
    %1135 = math.tanh %1134 : vector<8x32xf32>
    %cst_337 = arith.constant 1.000000e+00 : f32
    %1136 = vector.broadcast %cst_337 : f32 to vector<8x32xf32>
    %1137 = arith.subf %1136, %1128 : vector<8x32xf32>
    %1138 = arith.mulf %1137, %1135 : vector<8x32xf32>
    %1139 = arith.mulf %1128, %1107 : vector<8x32xf32>
    %1140 = arith.addf %1138, %1139 : vector<8x32xf32>
    %1141 = arith.index_cast %1108 : i32 to index
    %c0_338 = arith.constant 0 : index
    %c0_339 = arith.constant 0 : index
    %1142 = vector.load %arg2[%1141, %c0_338, %c0_339] : memref<8x8x1xf32, #tpu.memory_space<vmem>>, vector<1x8x1xf32>
    %1143 = vector.shape_cast %1142 : vector<1x8x1xf32> to vector<8x1xf32>
    %1144 = arith.subf %1140, %1107 : vector<8x32xf32>
    %1145 = vector.broadcast %1143 : vector<8x1xf32> to vector<8x32xf32>
    %1146 = arith.mulf %1145, %1144 : vector<8x32xf32>
    %1147 = arith.addf %1107, %1146 : vector<8x32xf32>
    %c2_i32_340 = arith.constant 2 : i32
    %c7_i32_341 = arith.constant 7 : i32
    %1148 = arith.subi %c7_i32_341, %c2_i32_340 : i32
    %1149 = arith.index_cast %1148 : i32 to index
    %c0_342 = arith.constant 0 : index
    %c0_343 = arith.constant 0 : index
    %1150 = vector.load %arg26[%1149, %c0_342, %c0_343] : memref<8x8x96xf32, #tpu.memory_space<vmem>>, vector<1x8x96xf32>
    %1151 = vector.shape_cast %1150 : vector<1x8x96xf32> to vector<8x96xf32>
    %cst_344 = arith.constant dense<0.000000e+00> : vector<8x96xf32>
    %1152 = tpu.matmul %1147, %1051, %cst_344 {dimension_numbers = #tpu.dot_dimension_numbers<[1], [0], [0], [1], [0, 0, 1, 1], [], []>} : vector<8x32xf32>, vector<32x96xf32>, vector<8x96xf32> -> vector<8x96xf32>
    %1153 = vector.extract_strided_slice %1151 {offsets = [0, 0], sizes = [8, 32], strides = [1, 1]} : vector<8x96xf32> to vector<8x32xf32>
    %1154 = vector.extract_strided_slice %1152 {offsets = [0, 0], sizes = [8, 32], strides = [1, 1]} : vector<8x96xf32> to vector<8x32xf32>
    %1155 = arith.addf %1153, %1154 : vector<8x32xf32>
    %1156 = arith.negf %1155 : vector<8x32xf32>
    %1157 = math.exp %1156 : vector<8x32xf32>
    %cst_345 = arith.constant 1.000000e+00 : f32
    %1158 = vector.broadcast %cst_345 : f32 to vector<8x32xf32>
    %1159 = arith.addf %1158, %1157 : vector<8x32xf32>
    %1160 = arith.divf %1158, %1159 : vector<8x32xf32>
    %1161 = vector.extract_strided_slice %1151 {offsets = [0, 32], sizes = [8, 32], strides = [1, 1]} : vector<8x96xf32> to vector<8x32xf32>
    %1162 = vector.extract_strided_slice %1152 {offsets = [0, 32], sizes = [8, 32], strides = [1, 1]} : vector<8x96xf32> to vector<8x32xf32>
    %1163 = arith.addf %1161, %1162 : vector<8x32xf32>
    %1164 = arith.negf %1163 : vector<8x32xf32>
    %1165 = math.exp %1164 : vector<8x32xf32>
    %cst_346 = arith.constant 1.000000e+00 : f32
    %1166 = vector.broadcast %cst_346 : f32 to vector<8x32xf32>
    %1167 = arith.addf %1166, %1165 : vector<8x32xf32>
    %1168 = arith.divf %1166, %1167 : vector<8x32xf32>
    %1169 = vector.extract_strided_slice %1151 {offsets = [0, 64], sizes = [8, 32], strides = [1, 1]} : vector<8x96xf32> to vector<8x32xf32>
    %1170 = vector.extract_strided_slice %1152 {offsets = [0, 64], sizes = [8, 32], strides = [1, 1]} : vector<8x96xf32> to vector<8x32xf32>
    %1171 = vector.broadcast %1053 : vector<1x32xf32> to vector<8x32xf32>
    %1172 = arith.addf %1170, %1171 : vector<8x32xf32>
    %1173 = arith.mulf %1160, %1172 : vector<8x32xf32>
    %1174 = arith.addf %1169, %1173 : vector<8x32xf32>
    %1175 = math.tanh %1174 : vector<8x32xf32>
    %cst_347 = arith.constant 1.000000e+00 : f32
    %1176 = vector.broadcast %cst_347 : f32 to vector<8x32xf32>
    %1177 = arith.subf %1176, %1168 : vector<8x32xf32>
    %1178 = arith.mulf %1177, %1175 : vector<8x32xf32>
    %1179 = arith.mulf %1168, %1147 : vector<8x32xf32>
    %1180 = arith.addf %1178, %1179 : vector<8x32xf32>
    %1181 = arith.index_cast %1148 : i32 to index
    %c0_348 = arith.constant 0 : index
    %c0_349 = arith.constant 0 : index
    %1182 = vector.load %arg2[%1181, %c0_348, %c0_349] : memref<8x8x1xf32, #tpu.memory_space<vmem>>, vector<1x8x1xf32>
    %1183 = vector.shape_cast %1182 : vector<1x8x1xf32> to vector<8x1xf32>
    %1184 = arith.subf %1180, %1147 : vector<8x32xf32>
    %1185 = vector.broadcast %1183 : vector<8x1xf32> to vector<8x32xf32>
    %1186 = arith.mulf %1185, %1184 : vector<8x32xf32>
    %1187 = arith.addf %1147, %1186 : vector<8x32xf32>
    %c3_i32_350 = arith.constant 3 : i32
    %c7_i32_351 = arith.constant 7 : i32
    %1188 = arith.subi %c7_i32_351, %c3_i32_350 : i32
    %1189 = arith.index_cast %1188 : i32 to index
    %c0_352 = arith.constant 0 : index
    %c0_353 = arith.constant 0 : index
    %1190 = vector.load %arg26[%1189, %c0_352, %c0_353] : memref<8x8x96xf32, #tpu.memory_space<vmem>>, vector<1x8x96xf32>
    %1191 = vector.shape_cast %1190 : vector<1x8x96xf32> to vector<8x96xf32>
    %cst_354 = arith.constant dense<0.000000e+00> : vector<8x96xf32>
    %1192 = tpu.matmul %1187, %1051, %cst_354 {dimension_numbers = #tpu.dot_dimension_numbers<[1], [0], [0], [1], [0, 0, 1, 1], [], []>} : vector<8x32xf32>, vector<32x96xf32>, vector<8x96xf32> -> vector<8x96xf32>
    %1193 = vector.extract_strided_slice %1191 {offsets = [0, 0], sizes = [8, 32], strides = [1, 1]} : vector<8x96xf32> to vector<8x32xf32>
    %1194 = vector.extract_strided_slice %1192 {offsets = [0, 0], sizes = [8, 32], strides = [1, 1]} : vector<8x96xf32> to vector<8x32xf32>
    %1195 = arith.addf %1193, %1194 : vector<8x32xf32>
    %1196 = arith.negf %1195 : vector<8x32xf32>
    %1197 = math.exp %1196 : vector<8x32xf32>
    %cst_355 = arith.constant 1.000000e+00 : f32
    %1198 = vector.broadcast %cst_355 : f32 to vector<8x32xf32>
    %1199 = arith.addf %1198, %1197 : vector<8x32xf32>
    %1200 = arith.divf %1198, %1199 : vector<8x32xf32>
    %1201 = vector.extract_strided_slice %1191 {offsets = [0, 32], sizes = [8, 32], strides = [1, 1]} : vector<8x96xf32> to vector<8x32xf32>
    %1202 = vector.extract_strided_slice %1192 {offsets = [0, 32], sizes = [8, 32], strides = [1, 1]} : vector<8x96xf32> to vector<8x32xf32>
    %1203 = arith.addf %1201, %1202 : vector<8x32xf32>
    %1204 = arith.negf %1203 : vector<8x32xf32>
    %1205 = math.exp %1204 : vector<8x32xf32>
    %cst_356 = arith.constant 1.000000e+00 : f32
    %1206 = vector.broadcast %cst_356 : f32 to vector<8x32xf32>
    %1207 = arith.addf %1206, %1205 : vector<8x32xf32>
    %1208 = arith.divf %1206, %1207 : vector<8x32xf32>
    %1209 = vector.extract_strided_slice %1191 {offsets = [0, 64], sizes = [8, 32], strides = [1, 1]} : vector<8x96xf32> to vector<8x32xf32>
    %1210 = vector.extract_strided_slice %1192 {offsets = [0, 64], sizes = [8, 32], strides = [1, 1]} : vector<8x96xf32> to vector<8x32xf32>
    %1211 = vector.broadcast %1053 : vector<1x32xf32> to vector<8x32xf32>
    %1212 = arith.addf %1210, %1211 : vector<8x32xf32>
    %1213 = arith.mulf %1200, %1212 : vector<8x32xf32>
    %1214 = arith.addf %1209, %1213 : vector<8x32xf32>
    %1215 = math.tanh %1214 : vector<8x32xf32>
    %cst_357 = arith.constant 1.000000e+00 : f32
    %1216 = vector.broadcast %cst_357 : f32 to vector<8x32xf32>
    %1217 = arith.subf %1216, %1208 : vector<8x32xf32>
    %1218 = arith.mulf %1217, %1215 : vector<8x32xf32>
    %1219 = arith.mulf %1208, %1187 : vector<8x32xf32>
    %1220 = arith.addf %1218, %1219 : vector<8x32xf32>
    %1221 = arith.index_cast %1188 : i32 to index
    %c0_358 = arith.constant 0 : index
    %c0_359 = arith.constant 0 : index
    %1222 = vector.load %arg2[%1221, %c0_358, %c0_359] : memref<8x8x1xf32, #tpu.memory_space<vmem>>, vector<1x8x1xf32>
    %1223 = vector.shape_cast %1222 : vector<1x8x1xf32> to vector<8x1xf32>
    %1224 = arith.subf %1220, %1187 : vector<8x32xf32>
    %1225 = vector.broadcast %1223 : vector<8x1xf32> to vector<8x32xf32>
    %1226 = arith.mulf %1225, %1224 : vector<8x32xf32>
    %1227 = arith.addf %1187, %1226 : vector<8x32xf32>
    %c4_i32_360 = arith.constant 4 : i32
    %c7_i32_361 = arith.constant 7 : i32
    %1228 = arith.subi %c7_i32_361, %c4_i32_360 : i32
    %1229 = arith.index_cast %1228 : i32 to index
    %c0_362 = arith.constant 0 : index
    %c0_363 = arith.constant 0 : index
    %1230 = vector.load %arg26[%1229, %c0_362, %c0_363] : memref<8x8x96xf32, #tpu.memory_space<vmem>>, vector<1x8x96xf32>
    %1231 = vector.shape_cast %1230 : vector<1x8x96xf32> to vector<8x96xf32>
    %cst_364 = arith.constant dense<0.000000e+00> : vector<8x96xf32>
    %1232 = tpu.matmul %1227, %1051, %cst_364 {dimension_numbers = #tpu.dot_dimension_numbers<[1], [0], [0], [1], [0, 0, 1, 1], [], []>} : vector<8x32xf32>, vector<32x96xf32>, vector<8x96xf32> -> vector<8x96xf32>
    %1233 = vector.extract_strided_slice %1231 {offsets = [0, 0], sizes = [8, 32], strides = [1, 1]} : vector<8x96xf32> to vector<8x32xf32>
    %1234 = vector.extract_strided_slice %1232 {offsets = [0, 0], sizes = [8, 32], strides = [1, 1]} : vector<8x96xf32> to vector<8x32xf32>
    %1235 = arith.addf %1233, %1234 : vector<8x32xf32>
    %1236 = arith.negf %1235 : vector<8x32xf32>
    %1237 = math.exp %1236 : vector<8x32xf32>
    %cst_365 = arith.constant 1.000000e+00 : f32
    %1238 = vector.broadcast %cst_365 : f32 to vector<8x32xf32>
    %1239 = arith.addf %1238, %1237 : vector<8x32xf32>
    %1240 = arith.divf %1238, %1239 : vector<8x32xf32>
    %1241 = vector.extract_strided_slice %1231 {offsets = [0, 32], sizes = [8, 32], strides = [1, 1]} : vector<8x96xf32> to vector<8x32xf32>
    %1242 = vector.extract_strided_slice %1232 {offsets = [0, 32], sizes = [8, 32], strides = [1, 1]} : vector<8x96xf32> to vector<8x32xf32>
    %1243 = arith.addf %1241, %1242 : vector<8x32xf32>
    %1244 = arith.negf %1243 : vector<8x32xf32>
    %1245 = math.exp %1244 : vector<8x32xf32>
    %cst_366 = arith.constant 1.000000e+00 : f32
    %1246 = vector.broadcast %cst_366 : f32 to vector<8x32xf32>
    %1247 = arith.addf %1246, %1245 : vector<8x32xf32>
    %1248 = arith.divf %1246, %1247 : vector<8x32xf32>
    %1249 = vector.extract_strided_slice %1231 {offsets = [0, 64], sizes = [8, 32], strides = [1, 1]} : vector<8x96xf32> to vector<8x32xf32>
    %1250 = vector.extract_strided_slice %1232 {offsets = [0, 64], sizes = [8, 32], strides = [1, 1]} : vector<8x96xf32> to vector<8x32xf32>
    %1251 = vector.broadcast %1053 : vector<1x32xf32> to vector<8x32xf32>
    %1252 = arith.addf %1250, %1251 : vector<8x32xf32>
    %1253 = arith.mulf %1240, %1252 : vector<8x32xf32>
    %1254 = arith.addf %1249, %1253 : vector<8x32xf32>
    %1255 = math.tanh %1254 : vector<8x32xf32>
    %cst_367 = arith.constant 1.000000e+00 : f32
    %1256 = vector.broadcast %cst_367 : f32 to vector<8x32xf32>
    %1257 = arith.subf %1256, %1248 : vector<8x32xf32>
    %1258 = arith.mulf %1257, %1255 : vector<8x32xf32>
    %1259 = arith.mulf %1248, %1227 : vector<8x32xf32>
    %1260 = arith.addf %1258, %1259 : vector<8x32xf32>
    %1261 = arith.index_cast %1228 : i32 to index
    %c0_368 = arith.constant 0 : index
    %c0_369 = arith.constant 0 : index
    %1262 = vector.load %arg2[%1261, %c0_368, %c0_369] : memref<8x8x1xf32, #tpu.memory_space<vmem>>, vector<1x8x1xf32>
    %1263 = vector.shape_cast %1262 : vector<1x8x1xf32> to vector<8x1xf32>
    %1264 = arith.subf %1260, %1227 : vector<8x32xf32>
    %1265 = vector.broadcast %1263 : vector<8x1xf32> to vector<8x32xf32>
    %1266 = arith.mulf %1265, %1264 : vector<8x32xf32>
    %1267 = arith.addf %1227, %1266 : vector<8x32xf32>
    %c5_i32_370 = arith.constant 5 : i32
    %c7_i32_371 = arith.constant 7 : i32
    %1268 = arith.subi %c7_i32_371, %c5_i32_370 : i32
    %1269 = arith.index_cast %1268 : i32 to index
    %c0_372 = arith.constant 0 : index
    %c0_373 = arith.constant 0 : index
    %1270 = vector.load %arg26[%1269, %c0_372, %c0_373] : memref<8x8x96xf32, #tpu.memory_space<vmem>>, vector<1x8x96xf32>
    %1271 = vector.shape_cast %1270 : vector<1x8x96xf32> to vector<8x96xf32>
    %cst_374 = arith.constant dense<0.000000e+00> : vector<8x96xf32>
    %1272 = tpu.matmul %1267, %1051, %cst_374 {dimension_numbers = #tpu.dot_dimension_numbers<[1], [0], [0], [1], [0, 0, 1, 1], [], []>} : vector<8x32xf32>, vector<32x96xf32>, vector<8x96xf32> -> vector<8x96xf32>
    %1273 = vector.extract_strided_slice %1271 {offsets = [0, 0], sizes = [8, 32], strides = [1, 1]} : vector<8x96xf32> to vector<8x32xf32>
    %1274 = vector.extract_strided_slice %1272 {offsets = [0, 0], sizes = [8, 32], strides = [1, 1]} : vector<8x96xf32> to vector<8x32xf32>
    %1275 = arith.addf %1273, %1274 : vector<8x32xf32>
    %1276 = arith.negf %1275 : vector<8x32xf32>
    %1277 = math.exp %1276 : vector<8x32xf32>
    %cst_375 = arith.constant 1.000000e+00 : f32
    %1278 = vector.broadcast %cst_375 : f32 to vector<8x32xf32>
    %1279 = arith.addf %1278, %1277 : vector<8x32xf32>
    %1280 = arith.divf %1278, %1279 : vector<8x32xf32>
    %1281 = vector.extract_strided_slice %1271 {offsets = [0, 32], sizes = [8, 32], strides = [1, 1]} : vector<8x96xf32> to vector<8x32xf32>
    %1282 = vector.extract_strided_slice %1272 {offsets = [0, 32], sizes = [8, 32], strides = [1, 1]} : vector<8x96xf32> to vector<8x32xf32>
    %1283 = arith.addf %1281, %1282 : vector<8x32xf32>
    %1284 = arith.negf %1283 : vector<8x32xf32>
    %1285 = math.exp %1284 : vector<8x32xf32>
    %cst_376 = arith.constant 1.000000e+00 : f32
    %1286 = vector.broadcast %cst_376 : f32 to vector<8x32xf32>
    %1287 = arith.addf %1286, %1285 : vector<8x32xf32>
    %1288 = arith.divf %1286, %1287 : vector<8x32xf32>
    %1289 = vector.extract_strided_slice %1271 {offsets = [0, 64], sizes = [8, 32], strides = [1, 1]} : vector<8x96xf32> to vector<8x32xf32>
    %1290 = vector.extract_strided_slice %1272 {offsets = [0, 64], sizes = [8, 32], strides = [1, 1]} : vector<8x96xf32> to vector<8x32xf32>
    %1291 = vector.broadcast %1053 : vector<1x32xf32> to vector<8x32xf32>
    %1292 = arith.addf %1290, %1291 : vector<8x32xf32>
    %1293 = arith.mulf %1280, %1292 : vector<8x32xf32>
    %1294 = arith.addf %1289, %1293 : vector<8x32xf32>
    %1295 = math.tanh %1294 : vector<8x32xf32>
    %cst_377 = arith.constant 1.000000e+00 : f32
    %1296 = vector.broadcast %cst_377 : f32 to vector<8x32xf32>
    %1297 = arith.subf %1296, %1288 : vector<8x32xf32>
    %1298 = arith.mulf %1297, %1295 : vector<8x32xf32>
    %1299 = arith.mulf %1288, %1267 : vector<8x32xf32>
    %1300 = arith.addf %1298, %1299 : vector<8x32xf32>
    %1301 = arith.index_cast %1268 : i32 to index
    %c0_378 = arith.constant 0 : index
    %c0_379 = arith.constant 0 : index
    %1302 = vector.load %arg2[%1301, %c0_378, %c0_379] : memref<8x8x1xf32, #tpu.memory_space<vmem>>, vector<1x8x1xf32>
    %1303 = vector.shape_cast %1302 : vector<1x8x1xf32> to vector<8x1xf32>
    %1304 = arith.subf %1300, %1267 : vector<8x32xf32>
    %1305 = vector.broadcast %1303 : vector<8x1xf32> to vector<8x32xf32>
    %1306 = arith.mulf %1305, %1304 : vector<8x32xf32>
    %1307 = arith.addf %1267, %1306 : vector<8x32xf32>
    %c6_i32_380 = arith.constant 6 : i32
    %c7_i32_381 = arith.constant 7 : i32
    %1308 = arith.subi %c7_i32_381, %c6_i32_380 : i32
    %1309 = arith.index_cast %1308 : i32 to index
    %c0_382 = arith.constant 0 : index
    %c0_383 = arith.constant 0 : index
    %1310 = vector.load %arg26[%1309, %c0_382, %c0_383] : memref<8x8x96xf32, #tpu.memory_space<vmem>>, vector<1x8x96xf32>
    %1311 = vector.shape_cast %1310 : vector<1x8x96xf32> to vector<8x96xf32>
    %cst_384 = arith.constant dense<0.000000e+00> : vector<8x96xf32>
    %1312 = tpu.matmul %1307, %1051, %cst_384 {dimension_numbers = #tpu.dot_dimension_numbers<[1], [0], [0], [1], [0, 0, 1, 1], [], []>} : vector<8x32xf32>, vector<32x96xf32>, vector<8x96xf32> -> vector<8x96xf32>
    %1313 = vector.extract_strided_slice %1311 {offsets = [0, 0], sizes = [8, 32], strides = [1, 1]} : vector<8x96xf32> to vector<8x32xf32>
    %1314 = vector.extract_strided_slice %1312 {offsets = [0, 0], sizes = [8, 32], strides = [1, 1]} : vector<8x96xf32> to vector<8x32xf32>
    %1315 = arith.addf %1313, %1314 : vector<8x32xf32>
    %1316 = arith.negf %1315 : vector<8x32xf32>
    %1317 = math.exp %1316 : vector<8x32xf32>
    %cst_385 = arith.constant 1.000000e+00 : f32
    %1318 = vector.broadcast %cst_385 : f32 to vector<8x32xf32>
    %1319 = arith.addf %1318, %1317 : vector<8x32xf32>
    %1320 = arith.divf %1318, %1319 : vector<8x32xf32>
    %1321 = vector.extract_strided_slice %1311 {offsets = [0, 32], sizes = [8, 32], strides = [1, 1]} : vector<8x96xf32> to vector<8x32xf32>
    %1322 = vector.extract_strided_slice %1312 {offsets = [0, 32], sizes = [8, 32], strides = [1, 1]} : vector<8x96xf32> to vector<8x32xf32>
    %1323 = arith.addf %1321, %1322 : vector<8x32xf32>
    %1324 = arith.negf %1323 : vector<8x32xf32>
    %1325 = math.exp %1324 : vector<8x32xf32>
    %cst_386 = arith.constant 1.000000e+00 : f32
    %1326 = vector.broadcast %cst_386 : f32 to vector<8x32xf32>
    %1327 = arith.addf %1326, %1325 : vector<8x32xf32>
    %1328 = arith.divf %1326, %1327 : vector<8x32xf32>
    %1329 = vector.extract_strided_slice %1311 {offsets = [0, 64], sizes = [8, 32], strides = [1, 1]} : vector<8x96xf32> to vector<8x32xf32>
    %1330 = vector.extract_strided_slice %1312 {offsets = [0, 64], sizes = [8, 32], strides = [1, 1]} : vector<8x96xf32> to vector<8x32xf32>
    %1331 = vector.broadcast %1053 : vector<1x32xf32> to vector<8x32xf32>
    %1332 = arith.addf %1330, %1331 : vector<8x32xf32>
    %1333 = arith.mulf %1320, %1332 : vector<8x32xf32>
    %1334 = arith.addf %1329, %1333 : vector<8x32xf32>
    %1335 = math.tanh %1334 : vector<8x32xf32>
    %cst_387 = arith.constant 1.000000e+00 : f32
    %1336 = vector.broadcast %cst_387 : f32 to vector<8x32xf32>
    %1337 = arith.subf %1336, %1328 : vector<8x32xf32>
    %1338 = arith.mulf %1337, %1335 : vector<8x32xf32>
    %1339 = arith.mulf %1328, %1307 : vector<8x32xf32>
    %1340 = arith.addf %1338, %1339 : vector<8x32xf32>
    %1341 = arith.index_cast %1308 : i32 to index
    %c0_388 = arith.constant 0 : index
    %c0_389 = arith.constant 0 : index
    %1342 = vector.load %arg2[%1341, %c0_388, %c0_389] : memref<8x8x1xf32, #tpu.memory_space<vmem>>, vector<1x8x1xf32>
    %1343 = vector.shape_cast %1342 : vector<1x8x1xf32> to vector<8x1xf32>
    %1344 = arith.subf %1340, %1307 : vector<8x32xf32>
    %1345 = vector.broadcast %1343 : vector<8x1xf32> to vector<8x32xf32>
    %1346 = arith.mulf %1345, %1344 : vector<8x32xf32>
    %1347 = arith.addf %1307, %1346 : vector<8x32xf32>
    %c7_i32_390 = arith.constant 7 : i32
    %c7_i32_391 = arith.constant 7 : i32
    %1348 = arith.subi %c7_i32_391, %c7_i32_390 : i32
    %1349 = arith.index_cast %1348 : i32 to index
    %c0_392 = arith.constant 0 : index
    %c0_393 = arith.constant 0 : index
    %1350 = vector.load %arg26[%1349, %c0_392, %c0_393] : memref<8x8x96xf32, #tpu.memory_space<vmem>>, vector<1x8x96xf32>
    %1351 = vector.shape_cast %1350 : vector<1x8x96xf32> to vector<8x96xf32>
    %cst_394 = arith.constant dense<0.000000e+00> : vector<8x96xf32>
    %1352 = tpu.matmul %1347, %1051, %cst_394 {dimension_numbers = #tpu.dot_dimension_numbers<[1], [0], [0], [1], [0, 0, 1, 1], [], []>} : vector<8x32xf32>, vector<32x96xf32>, vector<8x96xf32> -> vector<8x96xf32>
    %1353 = vector.extract_strided_slice %1351 {offsets = [0, 0], sizes = [8, 32], strides = [1, 1]} : vector<8x96xf32> to vector<8x32xf32>
    %1354 = vector.extract_strided_slice %1352 {offsets = [0, 0], sizes = [8, 32], strides = [1, 1]} : vector<8x96xf32> to vector<8x32xf32>
    %1355 = arith.addf %1353, %1354 : vector<8x32xf32>
    %1356 = arith.negf %1355 : vector<8x32xf32>
    %1357 = math.exp %1356 : vector<8x32xf32>
    %cst_395 = arith.constant 1.000000e+00 : f32
    %1358 = vector.broadcast %cst_395 : f32 to vector<8x32xf32>
    %1359 = arith.addf %1358, %1357 : vector<8x32xf32>
    %1360 = arith.divf %1358, %1359 : vector<8x32xf32>
    %1361 = vector.extract_strided_slice %1351 {offsets = [0, 32], sizes = [8, 32], strides = [1, 1]} : vector<8x96xf32> to vector<8x32xf32>
    %1362 = vector.extract_strided_slice %1352 {offsets = [0, 32], sizes = [8, 32], strides = [1, 1]} : vector<8x96xf32> to vector<8x32xf32>
    %1363 = arith.addf %1361, %1362 : vector<8x32xf32>
    %1364 = arith.negf %1363 : vector<8x32xf32>
    %1365 = math.exp %1364 : vector<8x32xf32>
    %cst_396 = arith.constant 1.000000e+00 : f32
    %1366 = vector.broadcast %cst_396 : f32 to vector<8x32xf32>
    %1367 = arith.addf %1366, %1365 : vector<8x32xf32>
    %1368 = arith.divf %1366, %1367 : vector<8x32xf32>
    %1369 = vector.extract_strided_slice %1351 {offsets = [0, 64], sizes = [8, 32], strides = [1, 1]} : vector<8x96xf32> to vector<8x32xf32>
    %1370 = vector.extract_strided_slice %1352 {offsets = [0, 64], sizes = [8, 32], strides = [1, 1]} : vector<8x96xf32> to vector<8x32xf32>
    %1371 = vector.broadcast %1053 : vector<1x32xf32> to vector<8x32xf32>
    %1372 = arith.addf %1370, %1371 : vector<8x32xf32>
    %1373 = arith.mulf %1360, %1372 : vector<8x32xf32>
    %1374 = arith.addf %1369, %1373 : vector<8x32xf32>
    %1375 = math.tanh %1374 : vector<8x32xf32>
    %cst_397 = arith.constant 1.000000e+00 : f32
    %1376 = vector.broadcast %cst_397 : f32 to vector<8x32xf32>
    %1377 = arith.subf %1376, %1368 : vector<8x32xf32>
    %1378 = arith.mulf %1377, %1375 : vector<8x32xf32>
    %1379 = arith.mulf %1368, %1347 : vector<8x32xf32>
    %1380 = arith.addf %1378, %1379 : vector<8x32xf32>
    %1381 = arith.index_cast %1348 : i32 to index
    %c0_398 = arith.constant 0 : index
    %c0_399 = arith.constant 0 : index
    %1382 = vector.load %arg2[%1381, %c0_398, %c0_399] : memref<8x8x1xf32, #tpu.memory_space<vmem>>, vector<1x8x1xf32>
    %1383 = vector.shape_cast %1382 : vector<1x8x1xf32> to vector<8x1xf32>
    %1384 = arith.subf %1380, %1347 : vector<8x32xf32>
    %1385 = vector.broadcast %1383 : vector<8x1xf32> to vector<8x32xf32>
    %1386 = arith.mulf %1385, %1384 : vector<8x32xf32>
    %1387 = arith.addf %1347, %1386 : vector<8x32xf32>
    %c8_i32_400 = arith.constant 8 : i32
    %1388 = tpu.concatenate %1049, %1387 in 1 : vector<8x32xf32>, vector<8x32xf32> -> vector<8x64xf32>
    %c0_401 = arith.constant 0 : index
    %c0_402 = arith.constant 0 : index
    %1389 = vector.load %arg19[%c0_401, %c0_402] : memref<64x32xf32, #tpu.memory_space<vmem>>, vector<64x32xf32>
    %c0_403 = arith.constant 0 : index
    %c0_404 = arith.constant 0 : index
    %1390 = vector.load %arg20[%c0_403, %c0_404] : memref<1x32xf32, #tpu.memory_space<vmem>>, vector<1x32xf32>
    %cst_405 = arith.constant dense<0.000000e+00> : vector<8x32xf32>
    %1391 = tpu.matmul %1388, %1389, %cst_405 {dimension_numbers = #tpu.dot_dimension_numbers<[1], [0], [0], [1], [0, 0, 1, 1], [], []>} : vector<8x64xf32>, vector<64x32xf32>, vector<8x32xf32> -> vector<8x32xf32>
    %1392 = vector.broadcast %1390 : vector<1x32xf32> to vector<8x32xf32>
    %1393 = arith.addf %1391, %1392 : vector<8x32xf32>
    %c0_406 = arith.constant 0 : index
    %c0_407 = arith.constant 0 : index
    %1394 = vector.load %arg21[%c0_406, %c0_407] : memref<32x32xf32, #tpu.memory_space<vmem>>, vector<32x32xf32>
    %c0_408 = arith.constant 0 : index
    %c0_409 = arith.constant 0 : index
    %1395 = vector.load %arg22[%c0_408, %c0_409] : memref<1x32xf32, #tpu.memory_space<vmem>>, vector<1x32xf32>
    %cst_410 = arith.constant dense<0.000000e+00> : vector<8x32xf32>
    %1396 = tpu.matmul %1393, %1394, %cst_410 {dimension_numbers = #tpu.dot_dimension_numbers<[1], [0], [0], [1], [0, 0, 1, 1], [], []>} : vector<8x32xf32>, vector<32x32xf32>, vector<8x32xf32> -> vector<8x32xf32>
    %1397 = vector.broadcast %1395 : vector<1x32xf32> to vector<8x32xf32>
    %1398 = arith.addf %1396, %1397 : vector<8x32xf32>
    %c0_411 = arith.constant 0 : index
    %c0_412 = arith.constant 0 : index
    %1399 = vector.load %arg23[%c0_411, %c0_412] : memref<32x1xf32, #tpu.memory_space<vmem>>, vector<32x1xf32>
    %c0_413 = arith.constant 0 : index
    %c0_414 = arith.constant 0 : index
    %1400 = vector.load %arg24[%c0_413, %c0_414] : memref<1x1xf32, #tpu.memory_space<vmem>>, vector<1x1xf32>
    %cst_415 = arith.constant dense<0.000000e+00> : vector<8x1xf32>
    %1401 = tpu.matmul %1398, %1399, %cst_415 {dimension_numbers = #tpu.dot_dimension_numbers<[1], [0], [0], [1], [0, 0, 1, 1], [], []>} : vector<8x32xf32>, vector<32x1xf32>, vector<8x1xf32> -> vector<8x1xf32>
    %1402 = vector.broadcast %1400 : vector<1x1xf32> to vector<8x1xf32>
    %1403 = arith.addf %1401, %1402 : vector<8x1xf32>
    %c0_416 = arith.constant 0 : index
    %c0_417 = arith.constant 0 : index
    %1404 = vector.load %arg25[%c0_416, %c0_417] : memref<8x1xf32, #tpu.memory_space<vmem>>, vector<8x1xf32>
    tpu.vector_store %arg25[%c0_416, %c0_417], %1403 {strides = array<i32>} : memref<8x1xf32, #tpu.memory_space<vmem>>, vector<8x1xf32>,
    return
  }
  func.func @transform_0(%arg0: i32) -> (i32, i32, i32) {
    %c0_i32 = arith.constant 0 : i32
    %c0_i32_0 = arith.constant 0 : i32
    %c0_i32_1 = arith.constant 0 : i32
    %c0_i32_2 = arith.constant 0 : i32
    return %c0_i32, %c0_i32_0, %c0_i32_1 : i32, i32, i32
  }
  func.func @transform_1(%arg0: i32) -> (i32, i32, i32) {
    %c0_i32 = arith.constant 0 : i32
    %c0_i32_0 = arith.constant 0 : i32
    %c0_i32_1 = arith.constant 0 : i32
    %c0_i32_2 = arith.constant 0 : i32
    return %c0_i32, %c0_i32_0, %c0_i32_1 : i32, i32, i32
  }
  func.func @transform_2(%arg0: i32) -> (i32, i32) {
    %c0_i32 = arith.constant 0 : i32
    %c0_i32_0 = arith.constant 0 : i32
    %c0_i32_1 = arith.constant 0 : i32
    return %c0_i32, %c0_i32_0 : i32, i32
  }
  func.func @transform_3(%arg0: i32) -> (i32, i32) {
    %c0_i32 = arith.constant 0 : i32
    %c0_i32_0 = arith.constant 0 : i32
    %c0_i32_1 = arith.constant 0 : i32
    return %c0_i32, %c0_i32_0 : i32, i32
  }
  func.func @transform_4(%arg0: i32) -> (i32, i32) {
    %c0_i32 = arith.constant 0 : i32
    %c0_i32_0 = arith.constant 0 : i32
    %c0_i32_1 = arith.constant 0 : i32
    return %c0_i32, %c0_i32_0 : i32, i32
  }
  func.func @transform_5(%arg0: i32) -> (i32, i32) {
    %c0_i32 = arith.constant 0 : i32
    %c0_i32_0 = arith.constant 0 : i32
    %c0_i32_1 = arith.constant 0 : i32
    return %c0_i32, %c0_i32_0 : i32, i32
  }
  func.func @transform_6(%arg0: i32) -> (i32, i32) {
    %c0_i32 = arith.constant 0 : i32
    %c0_i32_0 = arith.constant 0 : i32
    %c0_i32_1 = arith.constant 0 : i32
    return %c0_i32, %c0_i32_0 : i32, i32
  }
  func.func @transform_7(%arg0: i32) -> (i32, i32) {
    %c0_i32 = arith.constant 0 : i32
    %c0_i32_0 = arith.constant 0 : i32
    %c0_i32_1 = arith.constant 0 : i32
    return %c0_i32, %c0_i32_0 : i32, i32
  }
  func.func @transform_8(%arg0: i32) -> (i32, i32) {
    %c0_i32 = arith.constant 0 : i32
    %c0_i32_0 = arith.constant 0 : i32
    %c0_i32_1 = arith.constant 0 : i32
    return %c0_i32, %c0_i32_0 : i32, i32
  }
  func.func @transform_9(%arg0: i32) -> (i32, i32) {
    %c0_i32 = arith.constant 0 : i32
    %c0_i32_0 = arith.constant 0 : i32
    %c0_i32_1 = arith.constant 0 : i32
    return %c0_i32, %c0_i32_0 : i32, i32
  }
  func.func @transform_10(%arg0: i32) -> (i32, i32) {
    %c0_i32 = arith.constant 0 : i32
    %c0_i32_0 = arith.constant 0 : i32
    %c0_i32_1 = arith.constant 0 : i32
    return %c0_i32, %c0_i32_0 : i32, i32
  }
  func.func @transform_11(%arg0: i32) -> (i32, i32) {
    %c0_i32 = arith.constant 0 : i32
    %c0_i32_0 = arith.constant 0 : i32
    %c0_i32_1 = arith.constant 0 : i32
    return %c0_i32, %c0_i32_0 : i32, i32
  }
  func.func @transform_12(%arg0: i32) -> (i32, i32) {
    %c0_i32 = arith.constant 0 : i32
    %c0_i32_0 = arith.constant 0 : i32
    %c0_i32_1 = arith.constant 0 : i32
    return %c0_i32, %c0_i32_0 : i32, i32
  }
  func.func @transform_13(%arg0: i32) -> (i32, i32) {
    %c0_i32 = arith.constant 0 : i32
    %c0_i32_0 = arith.constant 0 : i32
    %c0_i32_1 = arith.constant 0 : i32
    return %c0_i32, %c0_i32_0 : i32, i32
  }
  func.func @transform_14(%arg0: i32) -> (i32, i32) {
    %c0_i32 = arith.constant 0 : i32
    %c0_i32_0 = arith.constant 0 : i32
    %c0_i32_1 = arith.constant 0 : i32
    return %c0_i32, %c0_i32_0 : i32, i32
  }
  func.func @transform_15(%arg0: i32) -> (i32, i32) {
    %c0_i32 = arith.constant 0 : i32
    %c0_i32_0 = arith.constant 0 : i32
    %c0_i32_1 = arith.constant 0 : i32
    return %c0_i32, %c0_i32_0 : i32, i32
  }
  func.func @transform_16(%arg0: i32) -> (i32, i32) {
    %c0_i32 = arith.constant 0 : i32
    %c0_i32_0 = arith.constant 0 : i32
    %c0_i32_1 = arith.constant 0 : i32
    return %c0_i32, %c0_i32_0 : i32, i32
  }
  func.func @transform_17(%arg0: i32) -> (i32, i32) {
    %c0_i32 = arith.constant 0 : i32
    %c0_i32_0 = arith.constant 0 : i32
    %c0_i32_1 = arith.constant 0 : i32
    return %c0_i32, %c0_i32_0 : i32, i32
  }
  func.func @transform_18(%arg0: i32) -> (i32, i32) {
    %c0_i32 = arith.constant 0 : i32
    %c0_i32_0 = arith.constant 0 : i32
    %c0_i32_1 = arith.constant 0 : i32
    return %c0_i32, %c0_i32_0 : i32, i32
  }
  func.func @transform_19(%arg0: i32) -> (i32, i32) {
    %c0_i32 = arith.constant 0 : i32
    %c0_i32_0 = arith.constant 0 : i32
    %c0_i32_1 = arith.constant 0 : i32
    return %c0_i32, %c0_i32_0 : i32, i32
  }
  func.func @transform_20(%arg0: i32) -> (i32, i32) {
    %c0_i32 = arith.constant 0 : i32
    %c0_i32_0 = arith.constant 0 : i32
    %c0_i32_1 = arith.constant 0 : i32
    return %c0_i32, %c0_i32_0 : i32, i32
  }
  func.func @transform_21(%arg0: i32) -> (i32, i32) {
    %c0_i32 = arith.constant 0 : i32
    %c0_i32_0 = arith.constant 0 : i32
    %c0_i32_1 = arith.constant 0 : i32
    return %c0_i32, %c0_i32_0 : i32, i32
  }
  func.func @transform_22(%arg0: i32) -> (i32, i32) {
    %c0_i32 = arith.constant 0 : i32
    %c0_i32_0 = arith.constant 0 : i32
    %c0_i32_1 = arith.constant 0 : i32
    return %c0_i32, %c0_i32_0 : i32, i32
  }
  func.func @transform_23(%arg0: i32) -> (i32, i32) {
    %c0_i32 = arith.constant 0 : i32
    %c0_i32_0 = arith.constant 0 : i32
    %c0_i32_1 = arith.constant 0 : i32
    return %c0_i32, %c0_i32_0 : i32, i32
  }
  func.func @transform_24(%arg0: i32) -> (i32, i32) {
    %c0_i32 = arith.constant 0 : i32
    %c0_i32_0 = arith.constant 0 : i32
    %c0_i32_1 = arith.constant 0 : i32
    return %c0_i32, %c0_i32_0 : i32, i32
  }
}

</mosaic_0001>

<bundles_post_ra>
// kernel: tpu_custom_call.1
= control target key start
LH: loop header
LB: loop body
LE: loop exit
PB: predicated region body
PF: predicated region fallthrough
CT: control target
= control target key end

     0   :  { %s8027_s0 = inlined_call_operand.vmem [shape: f32[8,8,32], index: 0, kind: input, shape index: {}]   ;;  %s8028_s1 = inlined_call_operand.vmem [shape: f32[8,8,1], index: 1, kind: input, shape index: {}]   ;;  %s8029_s2 = inlined_call_operand.hbm [shape: f32[32,96], index: 2, kind: input, shape index: {}]   ;;  %s8030_s3 = inlined_call_operand.hbm [shape: f32[32,96], index: 3, kind: input, shape index: {}]   ;;  %s8031_s4 = inlined_call_operand.vmem [shape: f32[1,96], index: 4, kind: input, shape index: {}]   ;;  %s8032_s5 = inlined_call_operand.hbm [shape: f32[1,32], index: 5, kind: input, shape index: {}]   ;;  %s8033_s6 = inlined_call_operand.hbm [shape: f32[32,96], index: 6, kind: input, shape index: {}]   ;;  %s8034_s7 = inlined_call_operand.hbm [shape: f32[32,96], index: 7, kind: input, shape index: {}]   ;;  %s8035_s8 = inlined_call_operand.hbm [shape: f32[1,96], index: 8, kind: input, shape index: {}]   ;;  %s8036_s9 = inlined_call_operand.hbm [shape: f32[1,32], index: 9, kind: input, shape index: {}]   ;;  %s8037_s10 = inlined_call_operand.vmem [shape: f32[64,96], index: 10, kind: input, shape index: {}]   ;;  %s8038_s11 = inlined_call_operand.hbm [shape: f32[32,96], index: 11, kind: input, shape index: {}]   ;;  %s8039_s12 = inlined_call_operand.hbm [shape: f32[1,96], index: 12, kind: input, shape index: {}]   ;;  %s8040_s13 = inlined_call_operand.hbm [shape: f32[1,32], index: 13, kind: input, shape index: {}]   ;;  %s8041_s14 = inlined_call_operand.vmem [shape: f32[64,96], index: 14, kind: input, shape index: {}]   ;;  %s8042_s15 = inlined_call_operand.vmem [shape: f32[32,96], index: 15, kind: input, shape index: {}]   ;;  %s8043_s16 = inlined_call_operand.vmem [shape: f32[1,96], index: 16, kind: input, shape index: {}]   ;;  %s8044_s17 = inlined_call_operand.vmem [shape: f32[1,32], index: 17, kind: input, shape index: {}]   ;;  %s8045_s18 = inlined_call_operand.vmem [shape: f32[64,32], index: 18, kind: input, shape index: {}]   ;;  %s8046_s19 = inlined_call_operand.vmem [shape: f32[1,32], index: 19, kind: input, shape index: {}]   ;;  %s8047_s20 = inlined_call_operand.hbm [shape: f32[32,32], index: 20, kind: input, shape index: {}]   ;;  %s8048_s21 = inlined_call_operand.vmem [shape: f32[1,32], index: 21, kind: input, shape index: {}]   ;;  %s8049_s22 = inlined_call_operand.vmem [shape: f32[32,1], index: 22, kind: input, shape index: {}]   ;;  %s8050_s23 = inlined_call_operand.<no memory space> [shape: f32[1,1], index: 23, kind: input, shape index: {}]   ;;  %s8051_s24 = inlined_call_operand.vmem [shape: f32[8,1], index: 24, kind: output, shape index: {}]  }
   0x1   :  { %8060 = sst [smem:[#allocation31_spill]] %s8027_s0  ;;  %v29_v0 = vstv %s8050_s23 }
   0x2   :  { %8061 = sst [smem:[#allocation32_spill]] %s8028_s1  ;;  %30 = vst [vmem:[#allocation7] sm:$0x1] %v29_v0 }
   0x3   :  { %8062 = sst [smem:[#allocation33_spill]] %s8029_s2 }
   0x4   :  { %8063 = sst [smem:[#allocation34_spill]] %s8030_s3 }
   0x5   :  { %8064 = sst [smem:[#allocation35_spill]] %s8031_s4 }
   0x6   :  { %8065 = sst [smem:[#allocation36_spill]] %s8032_s5 }
   0x7   :  { %8066 = sst [smem:[#allocation37_spill]] %s8033_s6 }
   0x8   :  { %8067 = sst [smem:[#allocation38_spill]] %s8034_s7 }
   0x9   :  { %8068 = sst [smem:[#allocation39_spill]] %s8035_s8 }
   0xa   :  { %8069 = sst [smem:[#allocation40_spill]] %s8048_s21 }
   0xb   :  { %8070 = sst [smem:[#allocation41_spill]] %s8051_s24 }
   0xc   :  { %31 = vsyncpa [#allocation9], 0 }
   0xd   :  { %32 = vsyncpa [#allocation11], 0 }
   0xe   :  { %33 = vsyncpa [#allocation14], 0 }
   0xf   :  { %34 = vsyncpa [#allocation17], 0 }
  0x10   :  { %35 = vsyncpa [#allocation20], 0 }
  0x11   :  { %36 = vsyncpa [#allocation23], 0  ;;  %s6758_s27 = smov [#allocation10]   ;;  %s6759_s6 = smov [#allocation13]  }
  0x12   :  { %s58_s28 = sshll.u32 %s6758_s27, 4  ;;  %s82_s2 = sshll.u32 %s6759_s6, 4  ;;  %s59_s28 = int_to_ptr.vmem [resolvable:$true] %s58_s28  ;;  %s6905_s2 = int_to_ptr.vmem [resolvable:$true] %s82_s2 }
  0x13   :  { %s8071_s7 = sld [smem:[#allocation34_spill]] }
  0x19   :  { %s6504_s30 = scalar_lea.hbm %s8071_s7, 512 }
  0x1a   :  { %p6505_p0 = scmp.ne.s32.totalorder %s8071_s7, %s6504_s30  ;;  %p6508_p1 = scmp.lt.u32.totalorder %s6504_s30, %s8071_s7 }
  0x1c   :  { %p6510_p2 = pnand %p6508_p1, %p6505_p0 }
  0x1e   :  { %6513 = shalt.err (!%p6510_p2)
}
  0x1f   :  { %s6514_s4 = scalar_lea.vmem %s59_s28, 512  ;;  %p6519_p4 = scmp.lt.s32.totalorder %s59_s28, %s59_s28 }
  0x20   :  { %p6515_p3 = scmp.ne.s32.totalorder %s59_s28, %s6514_s4  ;;  %p6520_p5 = scmp.lt.s32.totalorder %s6514_s4, %s6514_s4 }
  0x22   :  { %p6521_p6 = por %p6520_p5, %p6519_p4 }
  0x24   :  { %p6522_p7 = pnand %p6521_p6, %p6515_p3 }
  0x26   :  { %6525 = shalt.err (!%p6522_p7)
}
  0x27   :  { %s6760_s1 = smov 128   ;;  %s6761_s5 = smov 8  }
  0x28   :  { %64 = dma.hbm_to_vmem [thread:$0]  %s8071_s7, 512, %s59_s28, [#allocation11], %s6760_s1, %s6760_s1, %s6761_s5  }
  0x29   :  { %s8072_s0 = sld [smem:[#allocation37_spill]] }
  0x2f   :  { %s6526_s30 = scalar_lea.hbm %s8072_s0, 512 }
  0x30   :  { %p6527_p8 = scmp.ne.s32.totalorder %s8072_s0, %s6526_s30  ;;  %p6530_p9 = scmp.lt.u32.totalorder %s6526_s30, %s8072_s0 }
  0x32   :  { %p6532_p10 = pnand %p6530_p9, %p6527_p8 }
  0x34   :  { %6535 = shalt.err (!%p6532_p10)
}
  0x35   :  { %s6536_s4 = scalar_lea.vmem %s6905_s2, 512  ;;  %p6541_p12 = scmp.lt.s32.totalorder %s6905_s2, %s6905_s2 }
  0x36   :  { %p6537_p11 = scmp.ne.s32.totalorder %s6905_s2, %s6536_s4  ;;  %p6542_p13 = scmp.lt.s32.totalorder %s6536_s4, %s6536_s4 }
  0x38   :  { %p6543_p0 = por %p6542_p13, %p6541_p12 }
  0x3a   :  { %p6544_p1 = pnand %p6543_p0, %p6537_p11 }
  0x3c   :  { %6547 = shalt.err (!%p6544_p1)
}
  0x3d   :  { %88 = dma.hbm_to_vmem [thread:$0]  %s8072_s0, 512, %s6905_s2, [#allocation14], %s6760_s1, %s6760_s1, %s6761_s5  }
  0x3e   :  { %s6762_s26 = smov [#allocation16]   ;;  %s6763_s6 = smov [#allocation19]  }
  0x3f   :  { %s107_s27 = sshll.u32 %s6762_s26, 4  ;;  %s128_s29 = sshll.u32 %s6763_s6, 4  ;;  %s108_s27 = int_to_ptr.vmem [resolvable:$true] %s107_s27  ;;  %s6942_s29 = int_to_ptr.vmem [resolvable:$true] %s128_s29 }
  0x40   :  { %s8073_s23 = sld [smem:[#allocation39_spill]] }
  0x46   :  { %s6548_s25 = scalar_lea.hbm %s8073_s23, 16 }
  0x47   :  { %p6549_p2 = scmp.ne.s32.totalorder %s8073_s23, %s6548_s25  ;;  %p6552_p3 = scmp.lt.u32.totalorder %s6548_s25, %s8073_s23 }
  0x49   :  { %p6554_p4 = pnand %p6552_p3, %p6549_p2 }
  0x4b   :  { %6557 = shalt.err (!%p6554_p4)
}
  0x4c   :  { %s6558_s2 = scalar_lea.vmem %s108_s27, 16  ;;  %s6562_s0 = scalar_lea.vmem %s108_s27, 32 }
  0x4d   :  { %p6559_p5 = scmp.ne.s32.totalorder %s108_s27, %s6558_s2  ;;  %p6563_p6 = scmp.lt.s32.totalorder %s108_s27, %s108_s27 }
  0x4e   :  { %p6564_p7 = scmp.lt.s32.totalorder %s6562_s0, %s6558_s2 }
  0x50   :  { %p6565_p8 = por %p6564_p7, %p6563_p6 }
  0x52   :  { %p6566_p9 = pnand %p6565_p8, %p6559_p5 }
  0x54   :  { %6569 = shalt.err (!%p6566_p9)
}
  0x55   :  { %110 = dma.hbm_to_vmem [thread:$0]  %s8073_s23, 16, %s108_s27, [#allocation17]  }
  0x56   :  { %s6570_s30 = scalar_lea.hbm %s8038_s11, 512 }
  0x57   :  { %p6571_p10 = scmp.ne.s32.totalorder %s8038_s11, %s6570_s30  ;;  %p6574_p11 = scmp.lt.u32.totalorder %s6570_s30, %s8038_s11 }
  0x59   :  { %p6576_p12 = pnand %p6574_p11, %p6571_p10 }
  0x5b   :  { %6579 = shalt.err (!%p6576_p12)
}
  0x5c   :  { %s6580_s8 = scalar_lea.vmem %s6942_s29, 512  ;;  %p6585_p0 = scmp.lt.s32.totalorder %s6942_s29, %s6942_s29 }
  0x5d   :  { %p6581_p13 = scmp.ne.s32.totalorder %s6942_s29, %s6580_s8  ;;  %p6586_p1 = scmp.lt.s32.totalorder %s6580_s8, %s6580_s8 }
  0x5f   :  { %p6587_p2 = por %p6586_p1, %p6585_p0 }
  0x61   :  { %p6588_p3 = pnand %p6587_p2, %p6581_p13 }
  0x63   :  { %6591 = shalt.err (!%p6588_p3)
}
  0x64   :  { %134 = dma.hbm_to_vmem [thread:$0]  %s8038_s11, 512, %s6942_s29, [#allocation20], %s6760_s1, %s6760_s1, %s6761_s5  }
  0x65   :  { %s6764_s4 = smov [#allocation22]   ;;  %s6765_s0 = smov [#allocation8]  }
  0x66   :  { %s151_s2 = sshll.u32 %s6764_s4, 4  ;;  %s46_s28 = sshll.u32 %s6765_s0, 4  ;;  %s152_s2 = int_to_ptr.vmem [resolvable:$true] %s151_s2  ;;  %s6976_s28 = int_to_ptr.vmem [resolvable:$true] %s46_s28 }
  0x67   :  { %s6592_s6 = scalar_lea.hbm %s8040_s13, 16 }
  0x68   :  { %p6593_p4 = scmp.ne.s32.totalorder %s8040_s13, %s6592_s6  ;;  %p6596_p5 = scmp.lt.u32.totalorder %s6592_s6, %s8040_s13 }
  0x6a   :  { %p6598_p6 = pnand %p6596_p5, %p6593_p4 }
  0x6c   :  { %6601 = shalt.err (!%p6598_p6)
}
  0x6d   :  { %s6602_s11 = scalar_lea.vmem %s152_s2, 16  ;;  %s6606_s29 = scalar_lea.vmem %s152_s2, 32 }
  0x6e   :  { %p6603_p7 = scmp.ne.s32.totalorder %s152_s2, %s6602_s11  ;;  %p6607_p8 = scmp.lt.s32.totalorder %s152_s2, %s152_s2 }
  0x6f   :  { %p6608_p9 = scmp.lt.s32.totalorder %s6606_s29, %s6602_s11 }
  0x71   :  { %p6609_p10 = por %p6608_p9, %p6607_p8 }
  0x73   :  { %p6610_p11 = pnand %p6609_p10, %p6603_p7 }
  0x75   :  { %6613 = shalt.err (!%p6610_p11)
}
  0x76   :  { %154 = dma.hbm_to_vmem [thread:$0]  %s8040_s13, 16, %s152_s2, [#allocation23]  }
  0x77   :  { %s8074_s4 = sld [smem:[#allocation33_spill]] }
  0x7d   :  { %s6614_s0 = scalar_lea.hbm %s8074_s4, 512 }
  0x7e   :  { %p6615_p12 = scmp.ne.s32.totalorder %s8074_s4, %s6614_s0  ;;  %p6618_p13 = scmp.lt.u32.totalorder %s6614_s0, %s8074_s4 }
  0x80   :  { %p6620_p0 = pnand %p6618_p13, %p6615_p12 }
  0x82   :  { %6623 = shalt.err (!%p6620_p0)
}
  0x83   :  { %s6624_s21 = scalar_lea.vmem %s6976_s28, 512  ;;  %p6629_p2 = scmp.lt.s32.totalorder %s6976_s28, %s6976_s28 }
  0x84   :  { %p6625_p1 = scmp.ne.s32.totalorder %s6976_s28, %s6624_s21  ;;  %p6630_p3 = scmp.lt.s32.totalorder %s6624_s21, %s6624_s21 }
  0x86   :  { %p6631_p4 = por %p6630_p3, %p6629_p2 }
  0x88   :  { %p6632_p5 = pnand %p6631_p4, %p6625_p1 }
  0x8a   :  { %6635 = shalt.err (!%p6632_p5)
}
  0x8b   :  { %52 = dma.hbm_to_vmem [thread:$0]  %s8074_s4, 512, %s6976_s28, [#allocation9], %s6760_s1, %s6760_s1, %s6761_s5  }
  0x8c   :  { %s6766_s24 = smov [#allocation12]   ;;  %s6767_s11 = smov [#allocation15]  }
  0x8d   :  { %s73_s3 = sshll.u32 %s6766_s24, 4  ;;  %s94_s29 = sshll.u32 %s6767_s11, 4  ;;  %s74_s3 = int_to_ptr.vmem [resolvable:$true] %s73_s3  ;;  %s7010_s29 = int_to_ptr.vmem [resolvable:$true] %s94_s29 }
  0x8e   :  { %s8075_s27 = sld [smem:[#allocation36_spill]] }
  0x94   :  { %s6636_s23 = scalar_lea.hbm %s8075_s27, 16 }
  0x95   :  { %p6637_p6 = scmp.ne.s32.totalorder %s8075_s27, %s6636_s23  ;;  %p6640_p7 = scmp.lt.u32.totalorder %s6636_s23, %s8075_s27 }
  0x97   :  { %p6642_p8 = pnand %p6640_p7, %p6637_p6 }
  0x99   :  { %6645 = shalt.err (!%p6642_p8)
}
  0x9a   :  { %s6646_s28 = scalar_lea.vmem %s74_s3, 16  ;;  %s6650_s4 = scalar_lea.vmem %s74_s3, 32 }
  0x9b   :  { %p6647_p9 = scmp.ne.s32.totalorder %s74_s3, %s6646_s28  ;;  %p6651_p10 = scmp.lt.s32.totalorder %s74_s3, %s74_s3 }
  0x9c   :  { %p6652_p11 = scmp.lt.s32.totalorder %s6650_s4, %s6646_s28 }
  0x9e   :  { %p6653_p12 = por %p6652_p11, %p6651_p10 }
  0xa0   :  { %p6654_p13 = pnand %p6653_p12, %p6647_p9 }
  0xa2   :  { %6657 = shalt.err (!%p6654_p13)
}
  0xa3   :  { %76 = dma.hbm_to_vmem [thread:$0]  %s8075_s27, 16, %s74_s3, [#allocation11]  }
  0xa4   :  { %s8076_s24 = sld [smem:[#allocation38_spill]] }
  0xaa   :  { %s6658_s11 = scalar_lea.hbm %s8076_s24, 512 }
  0xab   :  { %p6659_p0 = scmp.ne.s32.totalorder %s8076_s24, %s6658_s11  ;;  %p6662_p1 = scmp.lt.u32.totalorder %s6658_s11, %s8076_s24 }
  0xad   :  { %p6664_p2 = pnand %p6662_p1, %p6659_p0 }
  0xaf   :  { %6667 = shalt.err (!%p6664_p2)
}
  0xb0   :  { %s6668_s7 = scalar_lea.vmem %s7010_s29, 512  ;;  %p6673_p4 = scmp.lt.s32.totalorder %s7010_s29, %s7010_s29 }
  0xb1   :  { %p6669_p3 = scmp.ne.s32.totalorder %s7010_s29, %s6668_s7  ;;  %p6674_p5 = scmp.lt.s32.totalorder %s6668_s7, %s6668_s7 }
  0xb3   :  { %p6675_p6 = por %p6674_p5, %p6673_p4 }
  0xb5   :  { %p6676_p7 = pnand %p6675_p6, %p6669_p3 }
  0xb7   :  { %6679 = shalt.err (!%p6676_p7)
}
  0xb8   :  { %100 = dma.hbm_to_vmem [thread:$0]  %s8076_s24, 512, %s7010_s29, [#allocation14], %s6760_s1, %s6760_s1, %s6761_s5  }
  0xb9   :  { %s6768_s26 = smov [#allocation18]   ;;  %s6769_s28 = smov [#allocation21]  }
  0xba   :  { %s117_s6 = sshll.u32 %s6768_s26, 4  ;;  %s141_s4 = sshll.u32 %s6769_s28, 4  ;;  %s118_s6 = int_to_ptr.vmem [resolvable:$true] %s117_s6  ;;  %s142_s4 = int_to_ptr.vmem [resolvable:$true] %s141_s4 }
  0xbb   :  { %s6680_s13 = scalar_lea.hbm %s8036_s9, 16 }
  0xbc   :  { %p6681_p8 = scmp.ne.s32.totalorder %s8036_s9, %s6680_s13  ;;  %p6684_p9 = scmp.lt.u32.totalorder %s6680_s13, %s8036_s9 }
  0xbe   :  { %p6686_p10 = pnand %p6684_p9, %p6681_p8 }
  0xc0   :  { %6689 = shalt.err (!%p6686_p10)
}
  0xc1   :  { %s6690_s29 = scalar_lea.vmem %s118_s6, 16  ;;  %s6694_s24 = scalar_lea.vmem %s118_s6, 32 }
  0xc2   :  { %p6691_p11 = scmp.ne.s32.totalorder %s118_s6, %s6690_s29  ;;  %p6695_p12 = scmp.lt.s32.totalorder %s118_s6, %s118_s6 }
  0xc3   :  { %p6696_p13 = scmp.lt.s32.totalorder %s6694_s24, %s6690_s29 }
  0xc5   :  { %p6697_p0 = por %p6696_p13, %p6695_p12 }
  0xc7   :  { %p6698_p1 = pnand %p6697_p0, %p6691_p11 }
  0xc9   :  { %6701 = shalt.err (!%p6698_p1)
}
  0xca   :  { %120 = dma.hbm_to_vmem [thread:$0]  %s8036_s9, 16, %s118_s6, [#allocation17]  }
  0xcb   :  { %s6702_s27 = scalar_lea.hbm %s8039_s12, 16 }
  0xcc   :  { %p6703_p2 = scmp.ne.s32.totalorder %s8039_s12, %s6702_s27  ;;  %p6706_p3 = scmp.lt.u32.totalorder %s6702_s27, %s8039_s12 }
  0xce   :  { %p6708_p4 = pnand %p6706_p3, %p6703_p2 }
  0xd0   :  { %6711 = shalt.err (!%p6708_p4)
}
  0xd1   :  { %s6712_s13 = scalar_lea.vmem %s142_s4, 16  ;;  %s6716_s2 = scalar_lea.vmem %s142_s4, 32 }
  0xd2   :  { %p6713_p5 = scmp.ne.s32.totalorder %s142_s4, %s6712_s13  ;;  %p6717_p6 = scmp.lt.s32.totalorder %s142_s4, %s142_s4 }
  0xd3   :  { %p6718_p7 = scmp.lt.s32.totalorder %s6716_s2, %s6712_s13 }
  0xd5   :  { %p6719_p8 = por %p6718_p7, %p6717_p6 }
  0xd7   :  { %p6720_p9 = pnand %p6719_p8, %p6713_p5 }
  0xd9   :  { %6723 = shalt.err (!%p6720_p9)
}
  0xda   :  { %144 = dma.hbm_to_vmem [thread:$0]  %s8039_s12, 16, %s142_s4, [#allocation20]  }
  0xdb   :  { %s6770_s11 = smov [#allocation24]   ;;  %s6724_s24 = scalar_lea.hbm %s8047_s20, 512 }
  0xdc   :  { %s172_s25 = sshll.u32 %s6770_s11, 4  ;;  %p6725_p10 = scmp.ne.s32.totalorder %s8047_s20, %s6724_s24  ;;  %s173_s25 = int_to_ptr.vmem [resolvable:$true] %s172_s25 }
  0xdd   :  { %p6728_p11 = scmp.lt.u32.totalorder %s6724_s24, %s8047_s20 }
  0xdf   :  { %p6730_p12 = pnand %p6728_p11, %p6725_p10 }
  0xe1   :  { %6733 = shalt.err (!%p6730_p12)
}
  0xe2   :  { %s6734_s27 = scalar_lea.vmem %s173_s25, 512  ;;  %p6739_p0 = scmp.lt.s32.totalorder %s173_s25, %s173_s25 }
  0xe3   :  { %p6735_p13 = scmp.ne.s32.totalorder %s173_s25, %s6734_s27  ;;  %p6740_p1 = scmp.lt.s32.totalorder %s6734_s27, %s6734_s27 }
  0xe5   :  { %p6741_p2 = por %p6740_p1, %p6739_p0 }
  0xe7   :  { %p6742_p3 = pnand %p6741_p2, %p6735_p13 }
  0xe9   :  { %6745 = shalt.err (!%p6742_p3)
}
  0xea   :  { %178 = dma.hbm_to_vmem [thread:$0]  %s8047_s20, 512, %s173_s25, [#allocation23], %s6760_s1, %s6760_s1, %s6761_s5  }
  0xeb   :  { %6746 = dma.done.wait [#allocation9], 512  }
  0xec   :  { %6747 = vsyncadd [#allocation9], 4294966784 }
  0xed   :  { %6748 = dma.done.wait [#allocation11], 528  }
  0xee   :  { %6749 = vsyncadd [#allocation11], 4294966768 }
  0xef   :  { %6750 = dma.done.wait [#allocation14], 1024  }
  0xf0   :  { %6751 = vsyncadd [#allocation14], 4294966272 }
  0xf1   :  { %6752 = dma.done.wait [#allocation17], 32  }
  0xf2   :  { %6753 = vsyncadd [#allocation17], 4294967264 }
  0xf3   :  { %6754 = dma.done.wait [#allocation20], 528  }
  0xf4   :  { %6755 = vsyncadd [#allocation20], 4294966768 }
  0xf5   :  { %6756 = dma.done.wait [#allocation23], 528  }
  0xf6   :  { %6757 = vsyncadd [#allocation23], 4294966768  ;;  %v6771_v1 = vmov 0.0|0.0   ;;  %vm6772_vm0 = vmmov 0   ;;  %v6773_v2 = vmov 0.0   ;;  %v218_v3 = vld [vmem:[#allocation8] sm:$0xff] }
  0xf7   :  { %6019 = vmatprep.subr.bf16.mxu1 %v6771_v1  ;;  %5526 = vmatprep.mubr.msk.f32.mxu1 %vm6772_vm0, %v6773_v2  ;;  %v219_v4 = vld [vmem:[#allocation8 + $0x8] sm:$0xff]  ;;  %v222_v5 = vld [vmem:[#allocation10] sm:$0xff]  ;;  %vm242_vm1 = vcmask 261120   ;;  %v220_v8 = vld [vmem:[#allocation8 + $0x10] sm:$0xff]  ;;  %s8077_s5 = sld [smem:[#allocation31_spill]]  ;;  %s6774_s26 = smov 64  }
  0xf8   :  { %v6011_v6 = vpack.c.bf16 %v219_v4, %v218_v3  ;;  %v223_v7 = vld [vmem:[#allocation10 + $0x8] sm:$0xff]  ;;  %v221_v9 = vld [vmem:[#allocation8 + $0x18] sm:$0xff]  ;;  %v224_v12 = vld [vmem:[#allocation10 + $0x10] sm:$0xff]  ;;  %s8078_s2 = sld [smem:[#allocation35_spill]]  ;;  %vm372_vm2 = vcmask 785408   ;;  %v6775_v32 = vmov 0  }
  0xf9   :  { %v7086_v10 = vpack.c.bf16 %v223_v7, %v222_v5  ;;  %v6015_v11 = vpack.c.bf16 %v221_v9, %v220_v8  ;;  %v225_v13 = vld [vmem:[#allocation10 + $0x18] sm:$0xff]  ;;  %v5107_v15 = vld [vmem:[#allocation12] ss:$0 sm:$0xff]  ;;  %6310 = vset.pattern.permute.xlu1 %v6775_v32  ;;  %6311 = vset.pattern.permute.xlu0 %v6775_v32  ;;  %s8079_s11 = sld [smem:[#allocation32_spill]]  ;;  %s6776_s25 = smov 96   ;;  %vm4843_vm3 = vcmask 523264  }
  0xfa   :  { %6012 = vmatprep.subr.bf16.mxu0 %v6011_v6  ;;  %v7096_v16 = vpack.c.bf16 %v225_v13, %v224_v12  ;;  %467 = vrot.lane.b32.xlu0 %v5107_v15, %s6774_s26  ;;  %s8080_s24 = sld [smem:[#allocation40_spill]]  ;;  %vm5085_vm4 = vcmask 7168   ;;  %s8081_s0 = sld [smem:[#allocation41_spill]] }
  0xfb   :  { %6021 = vmatpush3.bf16.msra.mxu1 %v7086_v10  ;;  %6014 = vmatpush3.bf16.msra.mxu0 %v6011_v6 }
  0xfc   :  { %6022 = vmatprep.subr.bf16.mxu1 %v6771_v1  ;;  %6016 = vmatprep.subr.bf16.mxu0 %v6015_v11 }
  0xfd   :  { %v7091_v14 = vld [vmem:[%s8077_s5] sm:$0xff]  ;;  %v7104_v17 = vld [vmem:[%s8077_s5 + $0x8] sm:$0xff]  ;;  %v7157_v62 = vld [vmem:[%s8077_s5 + $0x10] sm:$0xff] }
  0xfe   :  { %5506 = vmatprep.mubr.msk.f32.mxu0 %vm242_vm1, %v7091_v14  ;;  %v7126_v19 = vld [vmem:[%s8078_s2] ss:$0 sm:$0xff]  ;;  %v7162_v63 = vld [vmem:[%s8077_s5 + $0x18] sm:$0xff]  ;;  %v7179_v4 = vld [vmem:[%s8077_s5 + $0x28] sm:$0xff] }
  0xff   :  { %6024 = vmatpush3.bf16.msra.mxu1 %v7096_v16  ;;  %6018 = vmatpush3.bf16.msra.mxu0 %v6015_v11  ;;  %v490_v36 = vld [vmem:[%s8079_s11] sm:$0xff]  ;;  %v5110_v56 = vld [vmem:[%s8079_s11 + $0x8] sm:$0xff]  ;;  %v7184_v5 = vld [vmem:[%s8077_s5 + $0x30] sm:$0xff] }
 0x100   :  { %6025 = vmatprep.subr.bf16.mxu1 %v6771_v1  ;;  %6031 = vmatprep.subr.bf16.mxu0 %v6771_v1  ;;  %v7167_v0 = vld [vmem:[%s8077_s5 + $0x20] sm:$0xff]  ;;  %v7193_v6 = vld [vmem:[%s8077_s5 + $0x38] sm:$0xff] }
 0x102   :  { %5527 = vmatmul.mubr.f32.vlgmr.msra.gmra.mrb[0].mxu1 %v6773_v2  ;;  %5507 = vmatmul.mubr.msk.f32.vlgmr.msra.gmra.mrb[0].mxu0 %vm242_vm1, %v7104_v17 }
 0x103   :  { %6027 = vmatpush3.bf16.msra.mxu1 %v7086_v10  ;;  %5537 = vmatprep.mubr.msk.f32.mxu1 %vm6772_vm0, %v6773_v2 }
 0x104   :  { %6028 = vmatprep.subr.bf16.mxu1 %v6771_v1  ;;  %6033 = vmatpush3.bf16.msra.mxu0 %v7086_v10 }
 0x105   :  { %6034 = vmatprep.subr.bf16.mxu0 %v6771_v1  ;;  %5509 = vmatprep.mubr.msk.f32.mxu0 %vm242_vm1, %v7157_v62 }
 0x106   :  { %5510 = vmatmul.mubr.msk.f32.gmra.mrb[2].mxu0 %vm242_vm1, %v7162_v63 }
 0x107   :  { %6030 = vmatpush3.bf16.msra.mxu1 %v7096_v16  ;;  %5512 = vmatprep.mubr.msk.f32.mxu0 %vm242_vm1, %v7167_v0 }
 0x108   :  { %6036 = vmatpush3.bf16.msra.mxu0 %v7096_v16  ;;  %6037 = vmatprep.subr.bf16.mxu1 %v6771_v1 }
 0x109   :  { %6043 = vmatprep.subr.bf16.mxu0 %v6771_v1 }
 0x10a   :  { %5513 = vmatmul.mubr.msk.f32.gmra.mrb[4].mxu0 %vm242_vm1, %v7179_v4 }
 0x10b   :  { %5515 = vmatprep.mubr.msk.f32.mxu0 %vm242_vm1, %v7184_v5 }
 0x10e   :  { %5516 = vmatmul.mubr.msk.f32.gmra.mrb[6].mxu0 %vm242_vm1, %v7193_v6 }
 0x10f   :  { %5548 = vmatprep.mubr.msk.f32.mxu0 %vm6772_vm0, %v6773_v2 }
 0x16c   :  { %v7121_v18 = vpop.permute.xlu0 %467 }
 0x1d5   :  { %v451_v20 = vpop.f32.mrb[0].mxu1  ;;  %v5508_v21 = vpop.f32.mrb[0].mxu0 }
 0x1d6   :  { %v470_v22 = vadd.f32 %v7121_v18, %v451_v20  ;;  %v339_v23 = vadd.f32 %v5508_v21, %v7126_v19  ;;  %v5528_v24 = vpop.f32.mrb[1].mxu1  ;;  %v333_v25 = vpop.f32.mrb[1].mxu0 }
 0x1d7   :  { %v334_v26 = vadd.f32 %v7126_v19, %v333_v25 }
 0x1d8   :  { %374 = vst.msk [vmem:[#allocation2 + $0x8] sm:$0xff] %vm372_vm2, %v339_v23  ;;  %472 = vrot.lane.b32.xlu0 %v470_v22, %s6774_s26 }
 0x1d9   :  { %373 = vst.msk [vmem:[#allocation2] sm:$0xff] %vm372_vm2, %v334_v26  ;;  %v5511_v22 = vpop.f32.mrb[2].mxu0 }
 0x1da   :  { %v349_v23 = vadd.f32 %v5511_v22, %v7126_v19  ;;  %v343_v24 = vpop.f32.mrb[3].mxu0 }
 0x1db   :  { %v344_v25 = vadd.f32 %v7126_v19, %v343_v24 }
 0x1dc   :  { %376 = vst.msk [vmem:[#allocation2 + $0x18] sm:$0xff] %vm372_vm2, %v349_v23 }
 0x1dd   :  { %375 = vst.msk [vmem:[#allocation2 + $0x10] sm:$0xff] %vm372_vm2, %v344_v25  ;;  %v5514_v26 = vpop.f32.mrb[4].mxu0 }
 0x1df   :  { %v504_v51 = vld [vmem:[#allocation2 + $0x8] sm:$0xff] }
 0x1e0   :  { %v381_v27 = vld [vmem:[#allocation2] sm:$0xff] }
 0x1e1   :  { %v455_v28 = vadd.f32 %v451_v20, %v381_v27 }
 0x1e3   :  { %v5106_v29 = vmul.f32 -1.442695, %v455_v28  ;;  %v353_v28 = vpop.f32.mrb[5].mxu0 }
 0x1e5   :  { %6312 = vpow2.f32 %v5106_v29  ;;  %v354_v29 = vadd.f32 %v7126_v19, %v353_v28 }
 0x1e7   :  { %377 = vst.msk [vmem:[#allocation2 + $0x20] sm:$0xff] %vm372_vm2, %v354_v29 }
 0x1ef   :  { %v6313_v30 = vpop.eup %6312 }
 0x1f0   :  { %v459_v31 = vadd.f32 1.0, %v6313_v30  ;;  %v5517_v30 = vpop.f32.mrb[6].mxu0 }
 0x1f1   :  { %v363_v32 = vpop.f32.mrb[7].mxu0 }
 0x1f2   :  { %6314 = vrcp.f32 %v459_v31  ;;  %v369_v31 = vadd.f32 %v5517_v30, %v7126_v19 }
 0x1f4   :  { %380 = vst.msk [vmem:[#allocation2 + $0x38] sm:$0xff] %vm372_vm2, %v369_v31 }
 0x1fc   :  { %v6315_v33 = vpop.eup %6314 }
 0x1fd   :  { %v482_v40 = vsub.f32 1.0, %v6315_v33  ;;  %v488_v43 = vmul.f32 0.0, %v6315_v33 }
 0x24a   :  { %v473_v34 = vpop.permute.xlu0 %472 }
 0x24b   :  { %v475_v35 = vmul.f32 %v6315_v33, %v473_v34  ;;  %v364_v33 = vadd.f32 %v7126_v19, %v363_v32 }
 0x24d   :  { %477 = vrot.lane.b32.xlu1 %v475_v35, %s6774_s26  ;;  %379 = vst.msk [vmem:[#allocation2 + $0x30] sm:$0xff] %vm372_vm2, %v364_v33 }
 0x251   :  { %493 = vperm.xlu1 %6310, %v490_v36  }
 0x2bf   :  { %v478_v37 = vpop.permute.xlu1 %477 }
 0x2c0   :  { %v480_v38 = vadd.f32 %v478_v37, %v381_v27  ;;  %v359_v27 = vadd.f32 %v5514_v26, %v7126_v19  ;;  %v7225_v37 = vld [vmem:[%s8079_s11 + $0x10] sm:$0xff] }
 0x2c2   :  { %6316 = vtanh.f32 %v480_v38  ;;  %378 = vst.msk [vmem:[#allocation2 + $0x28] sm:$0xff] %vm372_vm2, %v359_v27  ;;  %v621_v38 = vld [vmem:[#allocation2 + $0x10] sm:$0xff] }
 0x2cc   :  { %v6317_v39 = vpop.eup %6316 }
 0x2cd   :  { %484 = vrot.lane.b32.xlu0 %v6317_v39, %s6776_s25 }
 0x2d0   :  { %v494_v44 = vpop.permute.xlu1 %493 }
 0x33f   :  { %v485_v41 = vpop.permute.xlu0 %484 }
 0x340   :  { %v487_v42 = vmul.f32 %v485_v41, %v482_v40 }
 0x342   :  { %v489_v45 = vadd.f32 %v488_v43, %v487_v42 }
 0x344   :  { %v496_v46 = vmul.f32 %v494_v44, %v489_v45 }
 0x346   :  { %499 = vrot.lane.b32.xlu1 %v496_v46, %s6776_s25 }
 0x3b8   :  { %v500_v47 = vpop.permute.xlu1 %499 }
 0x3b9   :  { %502 = vst.msk [vmem:[#allocation3] sm:$0xff] %vm242_vm1, %v500_v47  ;;  %5538 = vmatmul.mubr.msk.f32.vlgmr.msra.gmra.mrb[2].mxu1 %vm242_vm1, %v500_v47 }
 0x3ba   :  { %6039 = vmatpush3.bf16.msra.mxu1 %v7086_v10  ;;  %5559 = vmatprep.mubr.msk.f32.mxu1 %vm6772_vm0, %v6773_v2 }
 0x3bb   :  { %6040 = vmatprep.subr.bf16.mxu1 %v6771_v1 }
 0x3be   :  { %6042 = vmatpush3.bf16.msra.mxu1 %v7096_v16 }
 0x3bf   :  { %6049 = vmatprep.subr.bf16.mxu1 %v6771_v1 }
 0x48c   :  { %v573_v48 = vpop.f32.mrb[2].mxu1 }
 0x48d   :  { %v584_v49 = vadd.f32 %v573_v48, %v7121_v18  ;;  %v5539_v50 = vpop.f32.mrb[3].mxu1  ;;  %v577_v52 = vadd.f32 %v573_v48, %v504_v51 }
 0x48f   :  { %586 = vrot.lane.b32.xlu0 %v584_v49, %s6774_s26  ;;  %v5109_v53 = vmul.f32 -1.442695, %v577_v52 }
 0x491   :  { %6318 = vpow2.f32 %v5109_v53 }
 0x493   :  { %609 = vperm.xlu0 %6311, %v5110_v56  }
 0x49b   :  { %v6319_v54 = vpop.eup %6318 }
 0x49c   :  { %v581_v55 = vadd.f32 1.0, %v6319_v54 }
 0x49e   :  { %6320 = vrcp.f32 %v581_v55 }
 0x4a8   :  { %v6321_v57 = vpop.eup %6320 }
 0x4a9   :  { %v596_v7 = vsub.f32 1.0, %v6321_v57  ;;  %v602_v9 = vmul.f32 %v6321_v57, %v496_v46 }
 0x501   :  { %v587_v58 = vpop.permute.xlu0 %586 }
 0x502   :  { %v589_v59 = vmul.f32 %v6321_v57, %v587_v58 }
 0x504   :  { %591 = vrot.lane.b32.xlu1 %v589_v59, %s6774_s26 }
 0x512   :  { %v610_v13 = vpop.permute.xlu0 %609 }
 0x576   :  { %v592_v60 = vpop.permute.xlu1 %591 }
 0x577   :  { %v594_v61 = vadd.f32 %v592_v60, %v504_v51 }
 0x579   :  { %6322 = vtanh.f32 %v594_v61 }
 0x583   :  { %v6323_v3 = vpop.eup %6322 }
 0x584   :  { %598 = vrot.lane.b32.xlu1 %v6323_v3, %s6776_s25  ;;  %v7244_v3 = vld [vmem:[%s8079_s11 + $0x18] sm:$0xff] }
 0x5f6   :  { %v599_v8 = vpop.permute.xlu1 %598 }
 0x5f7   :  { %v601_v11 = vmul.f32 %v599_v8, %v596_v7  ;;  %v738_v7 = vld [vmem:[#allocation2 + $0x18] sm:$0xff] }
 0x5f9   :  { %v603_v12 = vadd.f32 %v602_v9, %v601_v11 }
 0x5fb   :  { %v606_v15 = vsub.f32 %v603_v12, %v496_v46 }
 0x5fd   :  { %v612_v20 = vmul.f32 %v610_v13, %v606_v15 }
 0x5ff   :  { %v613_v21 = vadd.f32 %v612_v20, %v496_v46 }
 0x601   :  { %615 = vrot.lane.b32.xlu1 %v613_v21, %s6776_s25 }
 0x673   :  { %v616_v34 = vpop.permute.xlu1 %615 }
 0x674   :  { %619 = vst.msk [vmem:[#allocation3 + $0x8] sm:$0xff] %vm242_vm1, %v616_v34  ;;  %5549 = vmatmul.mubr.msk.f32.vlgmr.msra.gmra.mrb[8].mxu0 %vm242_vm1, %v616_v34 }
 0x675   :  { %6045 = vmatpush3.bf16.msra.mxu0 %v7086_v10  ;;  %5570 = vmatprep.mubr.msk.f32.mxu0 %vm6772_vm0, %v6773_v2 }
 0x676   :  { %6046 = vmatprep.subr.bf16.mxu0 %v6771_v1 }
 0x679   :  { %6048 = vmatpush3.bf16.msra.mxu0 %v7096_v16 }
 0x67a   :  { %6055 = vmatprep.subr.bf16.mxu0 %v6771_v1 }
 0x747   :  { %v690_v19 = vpop.f32.mrb[8].mxu0 }
 0x748   :  { %v701_v35 = vadd.f32 %v690_v19, %v7121_v18  ;;  %v5550_v36 = vpop.f32.mrb[9].mxu0  ;;  %v694_v39 = vadd.f32 %v690_v19, %v621_v38 }
 0x749   :  { %v7262_v36 = vld [vmem:[%s8079_s11 + $0x20] sm:$0xff] }
 0x74a   :  { %703 = vrot.lane.b32.xlu0 %v701_v35, %s6774_s26  ;;  %v5112_v40 = vmul.f32 -1.442695, %v694_v39 }
 0x74c   :  { %6324 = vpow2.f32 %v5112_v40 }
 0x74e   :  { %726 = vperm.xlu0 %6311, %v7225_v37  }
 0x756   :  { %v6325_v41 = vpop.eup %6324 }
 0x757   :  { %v698_v42 = vadd.f32 1.0, %v6325_v41 }
 0x759   :  { %6326 = vrcp.f32 %v698_v42 }
 0x763   :  { %v6327_v43 = vpop.eup %6326 }
 0x764   :  { %v713_v49 = vsub.f32 1.0, %v6327_v43  ;;  %v719_v51 = vmul.f32 %v6327_v43, %v613_v21 }
 0x7bc   :  { %v704_v44 = vpop.permute.xlu0 %703 }
 0x7bd   :  { %v706_v45 = vmul.f32 %v6327_v43, %v704_v44 }
 0x7bf   :  { %708 = vrot.lane.b32.xlu1 %v706_v45, %s6774_s26 }
 0x7cd   :  { %v727_v55 = vpop.permute.xlu0 %726 }
 0x831   :  { %v709_v46 = vpop.permute.xlu1 %708 }
 0x832   :  { %v711_v47 = vadd.f32 %v709_v46, %v621_v38  ;;  %v855_v38 = vld [vmem:[#allocation2 + $0x20] sm:$0xff] }
 0x834   :  { %6328 = vtanh.f32 %v711_v47 }
 0x83e   :  { %v6329_v48 = vpop.eup %6328 }
 0x83f   :  { %715 = vrot.lane.b32.xlu1 %v6329_v48, %s6776_s25 }
 0x8b1   :  { %v716_v50 = vpop.permute.xlu1 %715 }
 0x8b2   :  { %v718_v52 = vmul.f32 %v716_v50, %v713_v49 }
 0x8b4   :  { %v720_v53 = vadd.f32 %v719_v51, %v718_v52 }
 0x8b6   :  { %v723_v54 = vsub.f32 %v720_v53, %v613_v21 }
 0x8b8   :  { %v729_v56 = vmul.f32 %v727_v55, %v723_v54 }
 0x8ba   :  { %v730_v57 = vadd.f32 %v729_v56, %v613_v21 }
 0x8bc   :  { %732 = vrot.lane.b32.xlu0 %v730_v57, %s6776_s25 }
 0x92e   :  { %v733_v58 = vpop.permute.xlu0 %732 }
 0x92f   :  { %736 = vst.msk [vmem:[#allocation3 + $0x10] sm:$0xff] %vm242_vm1, %v733_v58  ;;  %5560 = vmatmul.mubr.msk.f32.vlgmr.msra.gmra.mrb[4].mxu1 %vm242_vm1, %v733_v58 }
 0x930   :  { %6051 = vmatpush3.bf16.msra.mxu1 %v7086_v10  ;;  %5581 = vmatprep.mubr.msk.f32.mxu1 %vm6772_vm0, %v6773_v2 }
 0x931   :  { %6052 = vmatprep.subr.bf16.mxu1 %v6771_v1 }
 0x934   :  { %6054 = vmatpush3.bf16.msra.mxu1 %v7096_v16 }
 0x935   :  { %6061 = vmatprep.subr.bf16.mxu1 %v6771_v1 }
 0xa02   :  { %v807_v59 = vpop.f32.mrb[4].mxu1 }
 0xa03   :  { %v818_v60 = vadd.f32 %v807_v59, %v7121_v18  ;;  %v5561_v61 = vpop.f32.mrb[5].mxu1  ;;  %v811_v8 = vadd.f32 %v807_v59, %v738_v7 }
 0xa05   :  { %820 = vrot.lane.b32.xlu1 %v818_v60, %s6774_s26  ;;  %v5115_v9 = vmul.f32 -1.442695, %v811_v8 }
 0xa07   :  { %6330 = vpow2.f32 %v5115_v9 }
 0xa09   :  { %843 = vperm.xlu1 %6310, %v7244_v3  }
 0xa11   :  { %v6331_v11 = vpop.eup %6330 }
 0xa12   :  { %v815_v12 = vadd.f32 1.0, %v6331_v11 }
 0xa14   :  { %6332 = vrcp.f32 %v815_v12 }
 0xa1e   :  { %v6333_v13 = vpop.eup %6332 }
 0xa1f   :  { %v830_v24 = vsub.f32 1.0, %v6333_v13  ;;  %v836_v26 = vmul.f32 %v6333_v13, %v730_v57 }
 0xa77   :  { %v821_v15 = vpop.permute.xlu1 %820 }
 0xa78   :  { %v823_v20 = vmul.f32 %v6333_v13, %v821_v15 }
 0xa7a   :  { %825 = vrot.lane.b32.xlu0 %v823_v20, %s6774_s26 }
 0xa88   :  { %v844_v30 = vpop.permute.xlu1 %843 }
 0xaec   :  { %v826_v21 = vpop.permute.xlu0 %825 }
 0xaed   :  { %v828_v22 = vadd.f32 %v826_v21, %v738_v7  ;;  %v7281_v7 = vld [vmem:[%s8079_s11 + $0x28] sm:$0xff] }
 0xaef   :  { %6334 = vtanh.f32 %v828_v22 }
 0xaf9   :  { %v6335_v23 = vpop.eup %6334 }
 0xafa   :  { %832 = vrot.lane.b32.xlu0 %v6335_v23, %s6776_s25 }
 0xb6c   :  { %v833_v25 = vpop.permute.xlu0 %832 }
 0xb6d   :  { %v835_v27 = vmul.f32 %v833_v25, %v830_v24 }
 0xb6f   :  { %v837_v28 = vadd.f32 %v836_v26, %v835_v27 }
 0xb71   :  { %v840_v29 = vsub.f32 %v837_v28, %v730_v57 }
 0xb73   :  { %v846_v31 = vmul.f32 %v844_v30, %v840_v29 }
 0xb75   :  { %v847_v32 = vadd.f32 %v846_v31, %v730_v57 }
 0xb77   :  { %849 = vrot.lane.b32.xlu1 %v847_v32, %s6776_s25 }
 0xbe9   :  { %v850_v33 = vpop.permute.xlu1 %849 }
 0xbea   :  { %853 = vst.msk [vmem:[#allocation3 + $0x18] sm:$0xff] %vm242_vm1, %v850_v33  ;;  %5571 = vmatmul.mubr.msk.f32.vlgmr.msra.gmra.mrb[10].mxu0 %vm242_vm1, %v850_v33 }
 0xbeb   :  { %6057 = vmatpush3.bf16.msra.mxu0 %v7086_v10  ;;  %5592 = vmatprep.mubr.msk.f32.mxu0 %vm6772_vm0, %v6773_v2 }
 0xbec   :  { %6058 = vmatprep.subr.bf16.mxu0 %v6771_v1 }
 0xbef   :  { %6060 = vmatpush3.bf16.msra.mxu0 %v7096_v16 }
 0xcbd   :  { %v924_v34 = vpop.f32.mrb[10].mxu0 }
 0xcbe   :  { %v935_v19 = vadd.f32 %v924_v34, %v7121_v18  ;;  %v5572_v35 = vpop.f32.mrb[11].mxu0  ;;  %v928_v39 = vadd.f32 %v924_v34, %v855_v38 }
 0xcbf   :  { %v7299_v35 = vld [vmem:[%s8079_s11 + $0x30] sm:$0xff] }
 0xcc0   :  { %937 = vrot.lane.b32.xlu0 %v935_v19, %s6774_s26  ;;  %v5118_v40 = vmul.f32 -1.442695, %v928_v39 }
 0xcc2   :  { %6336 = vpow2.f32 %v5118_v40 }
 0xcc4   :  { %960 = vperm.xlu0 %6311, %v7262_v36  }
 0xccc   :  { %v6337_v41 = vpop.eup %6336 }
 0xccd   :  { %v932_v42 = vadd.f32 1.0, %v6337_v41 }
 0xccf   :  { %6338 = vrcp.f32 %v932_v42 }
 0xcd9   :  { %v6339_v43 = vpop.eup %6338 }
 0xcda   :  { %v947_v49 = vsub.f32 1.0, %v6339_v43  ;;  %v953_v51 = vmul.f32 %v6339_v43, %v847_v32 }
 0xd32   :  { %v938_v44 = vpop.permute.xlu0 %937 }
 0xd33   :  { %v940_v45 = vmul.f32 %v6339_v43, %v938_v44 }
 0xd35   :  { %942 = vrot.lane.b32.xlu1 %v940_v45, %s6774_s26 }
 0xd43   :  { %v961_v55 = vpop.permute.xlu0 %960 }
 0xda7   :  { %v943_v46 = vpop.permute.xlu1 %942 }
 0xda8   :  { %v945_v47 = vadd.f32 %v943_v46, %v855_v38  ;;  %v1089_v38 = vld [vmem:[#allocation2 + $0x30] sm:$0xff] }
 0xdaa   :  { %6340 = vtanh.f32 %v945_v47  ;;  %v1322_v47 = vld [vmem:[#allocation13] sm:$0xff] }
 0xdb4   :  { %v6341_v48 = vpop.eup %6340 }
 0xdb5   :  { %949 = vrot.lane.b32.xlu1 %v6341_v48, %s6776_s25  ;;  %v1323_v48 = vld [vmem:[#allocation13 + $0x8] sm:$0xff] }
 0xe27   :  { %v950_v50 = vpop.permute.xlu1 %949 }
 0xe28   :  { %v952_v52 = vmul.f32 %v950_v50, %v947_v49  ;;  %v1324_v49 = vld [vmem:[#allocation13 + $0x10] sm:$0xff]  ;;  %v6067_v50 = vpack.c.bf16 %v1323_v48, %v1322_v47 }
 0xe2a   :  { %v954_v53 = vadd.f32 %v953_v51, %v952_v52  ;;  %v1325_v51 = vld [vmem:[#allocation13 + $0x18] sm:$0xff]  ;;  %6068 = vmatprep.subr.bf16.mxu0 %v6067_v50 }
 0xe2c   :  { %v957_v54 = vsub.f32 %v954_v53, %v847_v32  ;;  %v6071_v53 = vpack.c.bf16 %v1325_v51, %v1324_v49 }
 0xe2e   :  { %v963_v56 = vmul.f32 %v961_v55, %v957_v54  ;;  %v1329_v55 = vld [vmem:[#allocation15 + $0x18] sm:$0xff] }
 0xe30   :  { %v964_v57 = vadd.f32 %v963_v56, %v847_v32 }
 0xe32   :  { %966 = vrot.lane.b32.xlu0 %v964_v57, %s6776_s25 }
 0xea4   :  { %v967_v58 = vpop.permute.xlu0 %966 }
 0xea5   :  { %970 = vst.msk [vmem:[#allocation3 + $0x20] sm:$0xff] %vm242_vm1, %v967_v58  ;;  %5582 = vmatmul.mubr.msk.f32.vlgmr.msra.gmra.mrb[6].mxu1 %vm242_vm1, %v967_v58 }
 0xea6   :  { %6063 = vmatpush3.bf16.msra.mxu1 %v7086_v10  ;;  %5603 = vmatprep.mubr.msk.f32.mxu1 %vm6772_vm0, %v6773_v2  ;;  %v972_v10 = vld [vmem:[#allocation2 + $0x28] sm:$0xff] }
 0xea7   :  { %6064 = vmatprep.subr.bf16.mxu1 %v6771_v1 }
 0xeaa   :  { %6066 = vmatpush3.bf16.msra.mxu1 %v7096_v16 }
 0xeab   :  { %6075 = vmatprep.subr.bf16.mxu1 %v6771_v1 }
 0xf78   :  { %v1041_v59 = vpop.f32.mrb[6].mxu1 }
 0xf79   :  { %v1052_v60 = vadd.f32 %v1041_v59, %v7121_v18  ;;  %v5583_v61 = vpop.f32.mrb[7].mxu1  ;;  %v1045_v8 = vadd.f32 %v1041_v59, %v972_v10 }
 0xf7b   :  { %1054 = vrot.lane.b32.xlu1 %v1052_v60, %s6774_s26  ;;  %v5121_v9 = vmul.f32 -1.442695, %v1045_v8  ;;  %v5139_v60 = vld [vmem:[#allocation18] ss:$0 sm:$0xff] }
 0xf7d   :  { %6342 = vpow2.f32 %v5121_v9  ;;  %v5129_v9 = vld [vmem:[#allocation16] ss:$0 sm:$0xff] }
 0xf7f   :  { %1077 = vperm.xlu1 %6310, %v7281_v7  }
 0xf87   :  { %v6343_v16 = vpop.eup %6342 }
 0xf88   :  { %v1049_v11 = vadd.f32 1.0, %v6343_v16 }
 0xf8a   :  { %6344 = vrcp.f32 %v1049_v11 }
 0xf94   :  { %v6345_v12 = vpop.eup %6344 }
 0xf95   :  { %v1064_v23 = vsub.f32 1.0, %v6345_v12  ;;  %v1070_v25 = vmul.f32 %v6345_v12, %v964_v57 }
 0xfed   :  { %v1055_v13 = vpop.permute.xlu1 %1054 }
 0xfee   :  { %v1057_v15 = vmul.f32 %v6345_v12, %v1055_v13 }
 0xff0   :  { %1059 = vrot.lane.b32.xlu0 %v1057_v15, %s6774_s26 }
 0xffe   :  { %v1078_v29 = vpop.permute.xlu1 %1077 }
0x1062   :  { %v1060_v20 = vpop.permute.xlu0 %1059 }
0x1063   :  { %v1062_v21 = vadd.f32 %v1060_v20, %v972_v10 }
0x1065   :  { %6346 = vtanh.f32 %v1062_v21 }
0x106f   :  { %v6347_v22 = vpop.eup %6346 }
0x1070   :  { %1066 = vrot.lane.b32.xlu0 %v6347_v22, %s6776_s25 }
0x10e2   :  { %v1067_v24 = vpop.permute.xlu0 %1066 }
0x10e3   :  { %v1069_v26 = vmul.f32 %v1067_v24, %v1064_v23 }
0x10e5   :  { %v1071_v27 = vadd.f32 %v1070_v25, %v1069_v26 }
0x10e7   :  { %v1074_v28 = vsub.f32 %v1071_v27, %v964_v57 }
0x10e9   :  { %v1080_v30 = vmul.f32 %v1078_v29, %v1074_v28  ;;  %v7343_v28 = vld [vmem:[#allocation2 + $0x38] sm:$0xff] }
0x10eb   :  { %v7286_v31 = vadd.f32 %v1080_v30, %v964_v57 }
0x10ed   :  { %1083 = vrot.lane.b32.xlu1 %v7286_v31, %s6776_s25 }
0x115f   :  { %v1084_v32 = vpop.permute.xlu1 %1083 }
0x1160   :  { %1087 = vst.msk [vmem:[#allocation3 + $0x28] sm:$0xff] %vm242_vm1, %v1084_v32  ;;  %5593 = vmatmul.mubr.msk.f32.vlgmr.msra.gmra.mrb[12].mxu0 %vm242_vm1, %v1084_v32 }
0x1161   :  { %5614 = vmatprep.mubr.msk.f32.mxu0 %vm242_vm1, %v7091_v14  ;;  %6070 = vmatpush3.bf16.msra.mxu0 %v6067_v50 }
0x1162   :  { %6072 = vmatprep.subr.bf16.mxu0 %v6071_v53 }
0x1165   :  { %6074 = vmatpush3.bf16.msra.mxu0 %v6071_v53 }
0x1166   :  { %6087 = vmatprep.subr.bf16.mxu0 %v6771_v1 }
0x1168   :  { %5615 = vmatmul.mubr.msk.f32.vlgmr.msra.gmra.mrb[14].mxu0 %vm242_vm1, %v7104_v17  ;;  %v1326_v17 = vld [vmem:[#allocation15] sm:$0xff] }
0x1169   :  { %5617 = vmatprep.mubr.msk.f32.mxu0 %vm242_vm1, %v7157_v62  ;;  %v1327_v62 = vld [vmem:[#allocation15 + $0x8] sm:$0xff] }
0x116a   :  { %v7321_v54 = vpack.c.bf16 %v1327_v62, %v1326_v17 }
0x116c   :  { %5618 = vmatmul.mubr.msk.f32.gmra.mrb[16].mxu0 %vm242_vm1, %v7162_v63 }
0x116d   :  { %5620 = vmatprep.mubr.msk.f32.mxu0 %vm242_vm1, %v7167_v0  ;;  %6089 = vmatpush3.bf16.msra.mxu0 %v7321_v54 }
0x116e   :  { %6090 = vmatprep.subr.bf16.mxu0 %v6771_v1 }
0x1170   :  { %5621 = vmatmul.mubr.msk.f32.gmra.mrb[18].mxu0 %vm242_vm1, %v7179_v4  ;;  %v1328_v4 = vld [vmem:[#allocation15 + $0x10] sm:$0xff] }
0x1171   :  { %5623 = vmatprep.mubr.msk.f32.mxu0 %vm242_vm1, %v7184_v5  ;;  %v7326_v57 = vpack.c.bf16 %v1329_v55, %v1328_v4 }
0x1173   :  { %6092 = vmatpush3.bf16.msra.mxu0 %v7326_v57 }
0x1174   :  { %5624 = vmatmul.mubr.msk.f32.gmra.mrb[20].mxu0 %vm242_vm1, %v7193_v6  ;;  %6099 = vmatprep.subr.bf16.mxu0 %v6771_v1 }
0x1175   :  { %5656 = vmatprep.mubr.msk.f32.mxu0 %vm6772_vm0, %v6773_v2 }
0x1233   :  { %v1158_v33 = vpop.f32.mrb[12].mxu0 }
0x1234   :  { %v1169_v34 = vadd.f32 %v1158_v33, %v7121_v18  ;;  %v5594_v19 = vpop.f32.mrb[13].mxu0  ;;  %v1162_v39 = vadd.f32 %v1158_v33, %v1089_v38 }
0x1236   :  { %1171 = vrot.lane.b32.xlu0 %v1169_v34, %s6774_s26  ;;  %v5124_v40 = vmul.f32 -1.442695, %v1162_v39 }
0x1238   :  { %6348 = vpow2.f32 %v5124_v40  ;;  %v7371_v40 = vld [vmem:[%s8079_s11 + $0x38] sm:$0xff] }
0x123a   :  { %1194 = vperm.xlu0 %6311, %v7299_v35  }
0x123b   :  { %v5616_v8 = vpop.f32.mrb[14].mxu0 }
0x123c   :  { %v1442_v16 = vadd.f32 %v5616_v8, %v5129_v9  ;;  %v1436_v11 = vpop.f32.mrb[15].mxu0 }
0x123d   :  { %v1437_v12 = vadd.f32 %v5129_v9, %v1436_v11 }
0x123e   :  { %1476 = vst.msk [vmem:[#allocation2 + $0x8] sm:$0xff] %vm372_vm2, %v1442_v16 }
0x123f   :  { %1475 = vst.msk [vmem:[#allocation2] sm:$0xff] %vm372_vm2, %v1437_v12  ;;  %v5619_v13 = vpop.f32.mrb[16].mxu0 }
0x1240   :  { %v1452_v15 = vadd.f32 %v5619_v13, %v5129_v9  ;;  %v1446_v20 = vpop.f32.mrb[17].mxu0 }
0x1241   :  { %v1447_v21 = vadd.f32 %v5129_v9, %v1446_v20 }
0x1242   :  { %v6349_v41 = vpop.eup %6348  ;;  %1478 = vst.msk [vmem:[#allocation2 + $0x18] sm:$0xff] %vm372_vm2, %v1452_v15 }
0x1243   :  { %v1166_v42 = vadd.f32 1.0, %v6349_v41  ;;  %1477 = vst.msk [vmem:[#allocation2 + $0x10] sm:$0xff] %vm372_vm2, %v1447_v21  ;;  %v5622_v22 = vpop.f32.mrb[18].mxu0 }
0x1244   :  { %v1462_v23 = vadd.f32 %v5622_v22, %v5129_v9  ;;  %v1456_v24 = vpop.f32.mrb[19].mxu0 }
0x1245   :  { %6350 = vrcp.f32 %v1166_v42  ;;  %v1457_v25 = vadd.f32 %v5129_v9, %v1456_v24 }
0x1246   :  { %1480 = vst.msk [vmem:[#allocation2 + $0x28] sm:$0xff] %vm372_vm2, %v1462_v23 }
0x1247   :  { %1479 = vst.msk [vmem:[#allocation2 + $0x20] sm:$0xff] %vm372_vm2, %v1457_v25  ;;  %v5625_v26 = vpop.f32.mrb[20].mxu0 }
0x1248   :  { %v1472_v27 = vadd.f32 %v5625_v26, %v5129_v9  ;;  %v1466_v30 = vpop.f32.mrb[21].mxu0 }
0x124a   :  { %1482 = vst.msk [vmem:[#allocation2 + $0x38] sm:$0xff] %vm372_vm2, %v1472_v27 }
0x124f   :  { %v6351_v14 = vpop.eup %6350 }
0x1250   :  { %v1181_v63 = vsub.f32 1.0, %v6351_v14  ;;  %v1187_v5 = vmul.f32 %v6351_v14, %v7286_v31 }
0x1251   :  { %v1483_v41 = vld [vmem:[#allocation2 + $0x38] sm:$0xff] }
0x12a8   :  { %v1172_v43 = vpop.permute.xlu0 %1171 }
0x12a9   :  { %v1174_v44 = vmul.f32 %v6351_v14, %v1172_v43 }
0x12ab   :  { %1176 = vrot.lane.b32.xlu1 %v1174_v44, %s6774_s26 }
0x12b9   :  { %v1195_v59 = vpop.permute.xlu0 %1194 }
0x131d   :  { %v1177_v45 = vpop.permute.xlu1 %1176 }
0x131e   :  { %v1179_v46 = vadd.f32 %v1177_v45, %v1089_v38 }
0x1320   :  { %6352 = vtanh.f32 %v1179_v46 }
0x132a   :  { %v6353_v52 = vpop.eup %6352 }
0x132b   :  { %1183 = vrot.lane.b32.xlu1 %v6353_v52, %s6776_s25 }
0x132f   :  { %1566 = vrot.lane.b32.xlu1 %v5139_v60, %s6774_s26 }
0x139d   :  { %v1184_v0 = vpop.permute.xlu1 %1183 }
0x139e   :  { %v1186_v56 = vmul.f32 %v1184_v0, %v1181_v63 }
0x13a0   :  { %v1188_v6 = vadd.f32 %v1187_v5, %v1186_v56 }
0x13a1   :  { %v7364_v34 = vpop.permute.xlu1 %1566 }
0x13a2   :  { %v1191_v58 = vsub.f32 %v1188_v6, %v7286_v31 }
0x13a4   :  { %v1197_v61 = vmul.f32 %v1195_v59, %v1191_v58 }
0x13a6   :  { %v7333_v10 = vadd.f32 %v1197_v61, %v7286_v31  ;;  %v1467_v31 = vadd.f32 %v5129_v9, %v1466_v30 }
0x13a8   :  { %1200 = vrot.lane.b32.xlu0 %v7333_v10, %s6776_s25  ;;  %1481 = vst.msk [vmem:[#allocation2 + $0x30] sm:$0xff] %vm372_vm2, %v1467_v31 }
0x13af   :  { %v1603_v6 = vld [vmem:[#allocation2 + $0x30] sm:$0xff] }
0x141a   :  { %v1201_v29 = vpop.permute.xlu0 %1200 }
0x141b   :  { %1204 = vst.msk [vmem:[#allocation3 + $0x30] sm:$0xff] %vm242_vm1, %v1201_v29  ;;  %5604 = vmatmul.mubr.msk.f32.vlgmr.msra.gmra.mrb[8].mxu1 %vm242_vm1, %v1201_v29 }
0x141c   :  { %6077 = vmatpush3.bf16.msra.mxu1 %v7321_v54  ;;  %5634 = vmatprep.mubr.msk.f32.mxu1 %vm6772_vm0, %v6773_v2 }
0x141d   :  { %6078 = vmatprep.subr.bf16.mxu1 %v6771_v1 }
0x1420   :  { %6080 = vmatpush3.bf16.msra.mxu1 %v7326_v57 }
0x1421   :  { %6081 = vmatprep.subr.bf16.mxu1 %v6771_v1 }
0x1423   :  { %5635 = vmatmul.mubr.f32.vlgmr.msra.gmra.mrb[10].mxu1 %v6773_v2 }
0x1424   :  { %6083 = vmatpush3.bf16.msra.mxu1 %v7321_v54  ;;  %5645 = vmatprep.mubr.msk.f32.mxu1 %vm6772_vm0, %v6773_v2 }
0x1425   :  { %6084 = vmatprep.subr.bf16.mxu1 %v6771_v1 }
0x1428   :  { %6086 = vmatpush3.bf16.msra.mxu1 %v7326_v57 }
0x1429   :  { %6093 = vmatprep.subr.bf16.mxu1 %v6771_v1 }
0x14ee   :  { %v7362_v32 = vpop.f32.mrb[8].mxu1 }
0x14ef   :  { %v5605_v33 = vpop.f32.mrb[9].mxu1 }
0x14f0   :  { %v1718_v33 = vld [vmem:[#allocation2 + $0x28] sm:$0xff] }
0x14f6   :  { %v1550_v19 = vpop.f32.mrb[10].mxu1 }
0x14f7   :  { %v1569_v38 = vadd.f32 %v7364_v34, %v1550_v19  ;;  %v5636_v39 = vpop.f32.mrb[11].mxu1  ;;  %v1554_v42 = vadd.f32 %v1550_v19, %v1483_v41 }
0x14f9   :  { %1571 = vrot.lane.b32.xlu0 %v1569_v38, %s6774_s26  ;;  %v5138_v14 = vmul.f32 -1.442695, %v1554_v42 }
0x14fb   :  { %6354 = vpow2.f32 %v5138_v14 }
0x14fd   :  { %1592 = vperm.xlu0 %6311, %v7371_v40  }
0x1505   :  { %v6355_v43 = vpop.eup %6354 }
0x1506   :  { %v1558_v44 = vadd.f32 1.0, %v6355_v43 }
0x1508   :  { %6356 = vrcp.f32 %v1558_v44 }
0x1512   :  { %v6357_v45 = vpop.eup %6356 }
0x1513   :  { %v1581_v51 = vsub.f32 1.0, %v6357_v45  ;;  %v1587_v53 = vmul.f32 0.0, %v6357_v45 }
0x156b   :  { %v1572_v46 = vpop.permute.xlu0 %1571 }
0x156c   :  { %v1574_v47 = vmul.f32 %v6357_v45, %v1572_v46 }
0x156e   :  { %1576 = vrot.lane.b32.xlu1 %v1574_v47, %s6774_s26 }
0x157c   :  { %v1593_v63 = vpop.permute.xlu0 %1592 }
0x15e0   :  { %v1577_v48 = vpop.permute.xlu1 %1576 }
0x15e1   :  { %v1579_v49 = vadd.f32 %v1577_v48, %v1483_v41 }
0x15e3   :  { %6358 = vtanh.f32 %v1579_v49 }
0x15ed   :  { %v6359_v50 = vpop.eup %6358 }
0x15ee   :  { %1583 = vrot.lane.b32.xlu1 %v6359_v50, %s6776_s25 }
0x1660   :  { %v1584_v52 = vpop.permute.xlu1 %1583 }
0x1661   :  { %v1586_v17 = vmul.f32 %v1584_v52, %v1581_v51 }
0x1663   :  { %v1588_v62 = vadd.f32 %v1587_v53, %v1586_v17 }
0x1665   :  { %v1595_v0 = vmul.f32 %v1593_v63, %v1588_v62 }
0x1667   :  { %1598 = vrot.lane.b32.xlu0 %v1595_v0, %s6776_s25 }
0x16d9   :  { %v1599_v4 = vpop.permute.xlu0 %1598 }
0x16da   :  { %1602 = vst.msk [vmem:[#allocation4 + $0x38] sm:$0xff] %vm242_vm1, %v1599_v4  ;;  %5646 = vmatmul.mubr.msk.f32.vlgmr.msra.gmra.mrb[12].mxu1 %vm242_vm1, %v1599_v4 }
0x16db   :  { %6095 = vmatpush3.bf16.msra.mxu1 %v7321_v54  ;;  %5667 = vmatprep.mubr.msk.f32.mxu1 %vm6772_vm0, %v6773_v2 }
0x16dc   :  { %6096 = vmatprep.subr.bf16.mxu1 %v6771_v1 }
0x16df   :  { %6098 = vmatpush3.bf16.msra.mxu1 %v7326_v57 }
0x16e0   :  { %6105 = vmatprep.subr.bf16.mxu1 %v6771_v1 }
0x17ad   :  { %v1672_v55 = vpop.f32.mrb[12].mxu1 }
0x17ae   :  { %v1683_v5 = vadd.f32 %v1672_v55, %v7364_v34  ;;  %v5647_v56 = vpop.f32.mrb[13].mxu1  ;;  %v1676_v58 = vadd.f32 %v1672_v55, %v1603_v6  ;;  %v1833_v55 = vld [vmem:[#allocation2 + $0x20] sm:$0xff] }
0x17b0   :  { %1685 = vrot.lane.b32.xlu1 %v1683_v5, %s6774_s26  ;;  %v5142_v59 = vmul.f32 -1.442695, %v1676_v58 }
0x17b2   :  { %6360 = vpow2.f32 %v5142_v59 }
0x17b4   :  { %1707 = vperm.xlu1 %6310, %v7299_v35  }
0x17bc   :  { %v6361_v60 = vpop.eup %6360 }
0x17bd   :  { %v1680_v61 = vadd.f32 1.0, %v6361_v60 }
0x17bf   :  { %6362 = vrcp.f32 %v1680_v61 }
0x17c9   :  { %v6363_v8 = vpop.eup %6362 }
0x17ca   :  { %v1695_v15 = vsub.f32 1.0, %v6363_v8  ;;  %v1701_v20 = vmul.f32 %v6363_v8, %v1595_v0 }
0x1822   :  { %v1686_v9 = vpop.permute.xlu1 %1685 }
0x1823   :  { %v1688_v16 = vmul.f32 %v6363_v8, %v1686_v9 }
0x1825   :  { %1690 = vrot.lane.b32.xlu0 %v1688_v16, %s6774_s26 }
0x1833   :  { %v1708_v24 = vpop.permute.xlu1 %1707 }
0x1897   :  { %v1691_v11 = vpop.permute.xlu0 %1690 }
0x1898   :  { %v1693_v12 = vadd.f32 %v1691_v11, %v1603_v6 }
0x189a   :  { %6364 = vtanh.f32 %v1693_v12 }
0x18a4   :  { %v6365_v13 = vpop.eup %6364 }
0x18a5   :  { %1697 = vrot.lane.b32.xlu0 %v6365_v13, %s6776_s25 }
0x1917   :  { %v1698_v35 = vpop.permute.xlu0 %1697 }
0x1918   :  { %v1700_v21 = vmul.f32 %v1698_v35, %v1695_v15 }
0x191a   :  { %v1702_v22 = vadd.f32 %v1701_v20, %v1700_v21 }
0x191c   :  { %v1704_v23 = vsub.f32 %v1702_v22, %v1595_v0 }
0x191e   :  { %v1710_v25 = vmul.f32 %v1708_v24, %v1704_v23 }
0x1920   :  { %v1711_v26 = vadd.f32 %v1710_v25, %v1595_v0 }
0x1922   :  { %1713 = vrot.lane.b32.xlu1 %v1711_v26, %s6776_s25 }
0x1994   :  { %v1714_v27 = vpop.permute.xlu1 %1713 }
0x1995   :  { %1717 = vst.msk [vmem:[#allocation4 + $0x30] sm:$0xff] %vm242_vm1, %v1714_v27  ;;  %5657 = vmatmul.mubr.msk.f32.vlgmr.msra.gmra.mrb[22].mxu0 %vm242_vm1, %v1714_v27  ;;  %v1948_v27 = vld [vmem:[#allocation2 + $0x18] sm:$0xff] }
0x1996   :  { %6101 = vmatpush3.bf16.msra.mxu0 %v7321_v54  ;;  %5678 = vmatprep.mubr.msk.f32.mxu0 %vm6772_vm0, %v6773_v2 }
0x1997   :  { %6102 = vmatprep.subr.bf16.mxu0 %v6771_v1 }
0x199a   :  { %6104 = vmatpush3.bf16.msra.mxu0 %v7326_v57 }
0x199b   :  { %6111 = vmatprep.subr.bf16.mxu0 %v6771_v1 }
0x1a68   :  { %v1787_v29 = vpop.f32.mrb[22].mxu0 }
0x1a69   :  { %v1798_v30 = vadd.f32 %v1787_v29, %v7364_v34  ;;  %v5658_v31 = vpop.f32.mrb[23].mxu0  ;;  %v1791_v19 = vadd.f32 %v1787_v29, %v1718_v33 }
0x1a6b   :  { %1800 = vrot.lane.b32.xlu0 %v1798_v30, %s6774_s26  ;;  %v5145_v38 = vmul.f32 -1.442695, %v1791_v19 }
0x1a6d   :  { %6366 = vpow2.f32 %v5145_v38 }
0x1a6f   :  { %1822 = vperm.xlu0 %6311, %v7281_v7  }
0x1a77   :  { %v6367_v39 = vpop.eup %6366 }
0x1a78   :  { %v1795_v41 = vadd.f32 1.0, %v6367_v39 }
0x1a7a   :  { %6368 = vrcp.f32 %v1795_v41 }
0x1a84   :  { %v6369_v42 = vpop.eup %6368 }
0x1a85   :  { %v1810_v47 = vsub.f32 1.0, %v6369_v42  ;;  %v1816_v48 = vmul.f32 %v6369_v42, %v1711_v26 }
0x1add   :  { %v1801_v14 = vpop.permute.xlu0 %1800 }
0x1ade   :  { %v1803_v43 = vmul.f32 %v6369_v42, %v1801_v14 }
0x1ae0   :  { %1805 = vrot.lane.b32.xlu1 %v1803_v43, %s6774_s26 }
0x1aee   :  { %v1823_v52 = vpop.permute.xlu0 %1822 }
0x1b52   :  { %v1806_v44 = vpop.permute.xlu1 %1805 }
0x1b53   :  { %v1808_v45 = vadd.f32 %v1806_v44, %v1718_v33 }
0x1b55   :  { %6370 = vtanh.f32 %v1808_v45 }
0x1b5f   :  { %v6371_v46 = vpop.eup %6370 }
0x1b60   :  { %1812 = vrot.lane.b32.xlu1 %v6371_v46, %s6776_s25 }
0x1bd2   :  { %v1813_v7 = vpop.permute.xlu1 %1812 }
0x1bd3   :  { %v1815_v49 = vmul.f32 %v1813_v7, %v1810_v47 }
0x1bd5   :  { %v1817_v50 = vadd.f32 %v1816_v48, %v1815_v49 }
0x1bd7   :  { %v1819_v51 = vsub.f32 %v1817_v50, %v1711_v26 }
0x1bd9   :  { %v1825_v53 = vmul.f32 %v1823_v52, %v1819_v51 }
0x1bdb   :  { %v1826_v17 = vadd.f32 %v1825_v53, %v1711_v26 }
0x1bdd   :  { %1828 = vrot.lane.b32.xlu0 %v1826_v17, %s6776_s25 }
0x1c4f   :  { %v1829_v62 = vpop.permute.xlu0 %1828 }
0x1c50   :  { %1832 = vst.msk [vmem:[#allocation4 + $0x28] sm:$0xff] %vm242_vm1, %v1829_v62  ;;  %5668 = vmatmul.mubr.msk.f32.vlgmr.msra.gmra.mrb[14].mxu1 %vm242_vm1, %v1829_v62 }
0x1c51   :  { %6107 = vmatpush3.bf16.msra.mxu1 %v7321_v54  ;;  %5689 = vmatprep.mubr.msk.f32.mxu1 %vm6772_vm0, %v6773_v2 }
0x1c52   :  { %6108 = vmatprep.subr.bf16.mxu1 %v6771_v1 }
0x1c55   :  { %6110 = vmatpush3.bf16.msra.mxu1 %v7326_v57 }
0x1c56   :  { %6117 = vmatprep.subr.bf16.mxu1 %v6771_v1 }
0x1d23   :  { %v1902_v63 = vpop.f32.mrb[14].mxu1 }
0x1d24   :  { %v1913_v0 = vadd.f32 %v1902_v63, %v7364_v34  ;;  %v5669_v4 = vpop.f32.mrb[15].mxu1  ;;  %v1906_v5 = vadd.f32 %v1902_v63, %v1833_v55 }
0x1d26   :  { %1915 = vrot.lane.b32.xlu1 %v1913_v0, %s6774_s26  ;;  %v5148_v56 = vmul.f32 -1.442695, %v1906_v5 }
0x1d28   :  { %6372 = vpow2.f32 %v5148_v56 }
0x1d2a   :  { %1937 = vperm.xlu1 %6310, %v7262_v36  }
0x1d32   :  { %v6373_v6 = vpop.eup %6372 }
0x1d33   :  { %v1910_v58 = vadd.f32 1.0, %v6373_v6 }
0x1d35   :  { %6374 = vrcp.f32 %v1910_v58 }
0x1d3f   :  { %v6375_v59 = vpop.eup %6374 }
0x1d40   :  { %v1925_v11 = vsub.f32 1.0, %v6375_v59  ;;  %v1931_v12 = vmul.f32 %v6375_v59, %v1826_v17 }
0x1d98   :  { %v1916_v60 = vpop.permute.xlu1 %1915 }
0x1d99   :  { %v1918_v61 = vmul.f32 %v6375_v59, %v1916_v60 }
0x1d9b   :  { %1920 = vrot.lane.b32.xlu0 %v1918_v61, %s6774_s26 }
0x1da9   :  { %v1938_v20 = vpop.permute.xlu1 %1937 }
0x1e0d   :  { %v1921_v8 = vpop.permute.xlu0 %1920 }
0x1e0e   :  { %v1923_v9 = vadd.f32 %v1921_v8, %v1833_v55 }
0x1e10   :  { %6376 = vtanh.f32 %v1923_v9 }
0x1e1a   :  { %v6377_v16 = vpop.eup %6376 }
0x1e1b   :  { %1927 = vrot.lane.b32.xlu0 %v6377_v16, %s6776_s25 }
0x1e8d   :  { %v1928_v36 = vpop.permute.xlu0 %1927 }
0x1e8e   :  { %v1930_v13 = vmul.f32 %v1928_v36, %v1925_v11 }
0x1e90   :  { %v1932_v15 = vadd.f32 %v1931_v12, %v1930_v13 }
0x1e92   :  { %v1934_v35 = vsub.f32 %v1932_v15, %v1826_v17 }
0x1e94   :  { %v1940_v21 = vmul.f32 %v1938_v20, %v1934_v35  ;;  %v7453_v35 = vld [vmem:[%s8079_s11 + $0x8] sm:$0xff] }
0x1e95   :  { %v2178_v20 = vld [vmem:[#allocation2 + $0x8] sm:$0xff] }
0x1e96   :  { %v1941_v22 = vadd.f32 %v1940_v21, %v1826_v17  ;;  %v2063_v17 = vld [vmem:[#allocation2 + $0x10] sm:$0xff] }
0x1e98   :  { %1943 = vrot.lane.b32.xlu1 %v1941_v22, %s6776_s25 }
0x1f0a   :  { %v1944_v23 = vpop.permute.xlu1 %1943 }
0x1f0b   :  { %1947 = vst.msk [vmem:[#allocation4 + $0x20] sm:$0xff] %vm242_vm1, %v1944_v23  ;;  %5679 = vmatmul.mubr.msk.f32.vlgmr.msra.gmra.mrb[24].mxu0 %vm242_vm1, %v1944_v23 }
0x1f0c   :  { %6113 = vmatpush3.bf16.msra.mxu0 %v7321_v54  ;;  %5700 = vmatprep.mubr.msk.f32.mxu0 %vm6772_vm0, %v6773_v2 }
0x1f0d   :  { %6114 = vmatprep.subr.bf16.mxu0 %v6771_v1 }
0x1f10   :  { %6116 = vmatpush3.bf16.msra.mxu0 %v7326_v57 }
0x1fde   :  { %v2017_v24 = vpop.f32.mrb[24].mxu0 }
0x1fdf   :  { %v2028_v25 = vadd.f32 %v2017_v24, %v7364_v34  ;;  %v5680_v26 = vpop.f32.mrb[25].mxu0  ;;  %v2021_v29 = vadd.f32 %v2017_v24, %v1948_v27 }
0x1fe1   :  { %2030 = vrot.lane.b32.xlu0 %v2028_v25, %s6774_s26  ;;  %v5151_v30 = vmul.f32 -1.442695, %v2021_v29 }
0x1fe3   :  { %6378 = vpow2.f32 %v5151_v30 }
0x1fe5   :  { %2052 = vperm.xlu0 %6311, %v7244_v3  }
0x1fed   :  { %v6379_v31 = vpop.eup %6378 }
0x1fee   :  { %v2025_v33 = vadd.f32 1.0, %v6379_v31 }
0x1ff0   :  { %6380 = vrcp.f32 %v2025_v33 }
0x1ffa   :  { %v6381_v19 = vpop.eup %6380 }
0x1ffb   :  { %v2040_v43 = vsub.f32 1.0, %v6381_v19  ;;  %v2046_v44 = vmul.f32 %v6381_v19, %v1941_v22 }
0x2053   :  { %v2031_v38 = vpop.permute.xlu0 %2030 }
0x2054   :  { %v2033_v39 = vmul.f32 %v6381_v19, %v2031_v38 }
0x2056   :  { %2035 = vrot.lane.b32.xlu1 %v2033_v39, %s6774_s26 }
0x2064   :  { %v2053_v7 = vpop.permute.xlu0 %2052 }
0x20c8   :  { %v2036_v41 = vpop.permute.xlu1 %2035 }
0x20c9   :  { %v2038_v42 = vadd.f32 %v2036_v41, %v1948_v27 }
0x20cb   :  { %6382 = vtanh.f32 %v2038_v42 }
0x20d5   :  { %v6383_v14 = vpop.eup %6382 }
0x20d6   :  { %2042 = vrot.lane.b32.xlu1 %v6383_v14, %s6776_s25 }
0x2148   :  { %v2043_v3 = vpop.permute.xlu1 %2042 }
0x2149   :  { %v2045_v45 = vmul.f32 %v2043_v3, %v2040_v43 }
0x214b   :  { %v2047_v46 = vadd.f32 %v2046_v44, %v2045_v45 }
0x214d   :  { %v2049_v47 = vsub.f32 %v2047_v46, %v1941_v22 }
0x214f   :  { %v2055_v48 = vmul.f32 %v2053_v7, %v2049_v47  ;;  %v7471_v7 = vld [vmem:[%s8079_s11] sm:$0xff] }
0x2151   :  { %v2056_v49 = vadd.f32 %v2055_v48, %v1941_v22  ;;  %v2415_v48 = vld [vmem:[#allocation19] sm:$0xff] }
0x2153   :  { %2058 = vrot.lane.b32.xlu0 %v2056_v49, %s6776_s25 }
0x21c5   :  { %v2059_v50 = vpop.permute.xlu0 %2058 }
0x21c6   :  { %2062 = vst.msk [vmem:[#allocation4 + $0x18] sm:$0xff] %vm242_vm1, %v2059_v50  ;;  %5690 = vmatmul.mubr.msk.f32.vlgmr.msra.gmra.mrb[16].mxu1 %vm242_vm1, %v2059_v50  ;;  %v2417_v50 = vld [vmem:[#allocation19 + $0x10] sm:$0xff] }
0x21c7   :  { %6119 = vmatpush3.bf16.msra.mxu1 %v7321_v54  ;;  %5711 = vmatprep.mubr.msk.f32.mxu1 %vm6772_vm0, %v6773_v2 }
0x21c8   :  { %6120 = vmatprep.subr.bf16.mxu1 %v6771_v1 }
0x21cb   :  { %6122 = vmatpush3.bf16.msra.mxu1 %v7326_v57 }
0x21cc   :  { %6139 = vmatprep.subr.bf16.mxu1 %v6771_v1 }
0x2299   :  { %v2132_v51 = vpop.f32.mrb[16].mxu1 }
0x229a   :  { %v2143_v52 = vadd.f32 %v2132_v51, %v7364_v34  ;;  %v5691_v53 = vpop.f32.mrb[17].mxu1  ;;  %v2136_v62 = vadd.f32 %v2132_v51, %v2063_v17 }
0x229c   :  { %2145 = vrot.lane.b32.xlu1 %v2143_v52, %s6774_s26  ;;  %v5154_v54 = vmul.f32 -1.442695, %v2136_v62  ;;  %v2418_v52 = vld [vmem:[#allocation19 + $0x18] sm:$0xff] }
0x229d   :  { %v7477_v53 = vpack.c.bf16 %v2418_v52, %v2417_v50  ;;  %v7590_v50 = vld [vmem:[#allocation3 + $0x30] sm:$0xff]  ;;  %v7594_v52 = vld [vmem:[#allocation21] ss:$0 sm:$0xff] }
0x229e   :  { %6384 = vpow2.f32 %v5154_v54 }
0x22a0   :  { %2167 = vperm.xlu1 %6310, %v7225_v37  }
0x22a8   :  { %v6385_v63 = vpop.eup %6384 }
0x22a9   :  { %v2140_v0 = vadd.f32 1.0, %v6385_v63 }
0x22ab   :  { %6386 = vrcp.f32 %v2140_v0 }
0x22b5   :  { %v6387_v4 = vpop.eup %6386 }
0x22b6   :  { %v2155_v58 = vsub.f32 1.0, %v6387_v4  ;;  %v2161_v59 = vmul.f32 %v6387_v4, %v2056_v49 }
0x230e   :  { %v2146_v55 = vpop.permute.xlu1 %2145 }
0x230f   :  { %v2148_v57 = vmul.f32 %v6387_v4, %v2146_v55 }
0x2311   :  { %2150 = vrot.lane.b32.xlu0 %v2148_v57, %s6774_s26 }
0x231f   :  { %v2168_v9 = vpop.permute.xlu1 %2167 }
0x2383   :  { %v2151_v5 = vpop.permute.xlu0 %2150 }
0x2384   :  { %v2153_v56 = vadd.f32 %v2151_v5, %v2063_v17 }
0x2386   :  { %6388 = vtanh.f32 %v2153_v56 }
0x2390   :  { %v6389_v6 = vpop.eup %6388 }
0x2391   :  { %2157 = vrot.lane.b32.xlu0 %v6389_v6, %s6776_s25 }
0x2403   :  { %v2158_v37 = vpop.permute.xlu0 %2157 }
0x2404   :  { %v2160_v60 = vmul.f32 %v2158_v37, %v2155_v58  ;;  %v5179_v37 = vld [vmem:[#allocation22] ss:$0 sm:$0xff] }
0x2406   :  { %v2162_v61 = vadd.f32 %v2161_v59, %v2160_v60  ;;  %v2411_v59 = vld [vmem:[%s8037_s10 + $0x20] sm:$0xff]  ;;  %v2412_v60 = vld [vmem:[%s8037_s10 + $0x28] sm:$0xff] }
0x2408   :  { %v2164_v8 = vsub.f32 %v2162_v61, %v2056_v49  ;;  %v6123_v61 = vpack.c.bf16 %v2412_v60, %v2411_v59 }
0x240a   :  { %v2170_v16 = vmul.f32 %v2168_v9, %v2164_v8  ;;  %v2413_v8 = vld [vmem:[%s8037_s10 + $0x30] sm:$0xff]  ;;  %v2414_v9 = vld [vmem:[%s8037_s10 + $0x38] sm:$0xff]  ;;  %6124 = vmatprep.subr.bf16.mxu0 %v6123_v61 }
0x240c   :  { %v2171_v11 = vadd.f32 %v2170_v16, %v2056_v49  ;;  %v2416_v49 = vld [vmem:[#allocation19 + $0x8] sm:$0xff] }
0x240d   :  { %v7474_v51 = vpack.c.bf16 %v2416_v49, %v2415_v48  ;;  %v7580_v48 = vld [vmem:[#allocation3 + $0x20] sm:$0xff]  ;;  %v7586_v49 = vld [vmem:[#allocation3 + $0x28] sm:$0xff] }
0x240e   :  { %2173 = vrot.lane.b32.xlu1 %v2171_v11, %s6776_s25 }
0x2480   :  { %v2174_v36 = vpop.permute.xlu1 %2173 }
0x2481   :  { %2177 = vst.msk [vmem:[#allocation4 + $0x10] sm:$0xff] %vm242_vm1, %v2174_v36  ;;  %5701 = vmatmul.mubr.msk.f32.vlgmr.msra.gmra.mrb[26].mxu0 %vm242_vm1, %v2174_v36 }
0x2482   :  { %6126 = vmatpush3.bf16.msra.mxu0 %v6123_v61 }
0x2554   :  { %v2247_v12 = vpop.f32.mrb[26].mxu0 }
0x2555   :  { %v2258_v13 = vadd.f32 %v2247_v12, %v7364_v34  ;;  %v5702_v15 = vpop.f32.mrb[27].mxu0  ;;  %v2251_v21 = vadd.f32 %v2247_v12, %v2178_v20 }
0x2557   :  { %2260 = vrot.lane.b32.xlu0 %v2258_v13, %s6774_s26  ;;  %v5157_v22 = vmul.f32 -1.442695, %v2251_v21 }
0x2559   :  { %6390 = vpow2.f32 %v5157_v22  ;;  %v2407_v22 = vld [vmem:[%s8037_s10] sm:$0xff] }
0x255b   :  { %2282 = vperm.xlu0 %6311, %v7453_v35  }
0x2563   :  { %v6391_v23 = vpop.eup %6390 }
0x2564   :  { %v2255_v24 = vadd.f32 1.0, %v6391_v23  ;;  %v2408_v23 = vld [vmem:[%s8037_s10 + $0x8] sm:$0xff] }
0x2566   :  { %6392 = vrcp.f32 %v2255_v24 }
0x2570   :  { %v6393_v25 = vpop.eup %6392 }
0x2571   :  { %v2270_v33 = vsub.f32 1.0, %v6393_v25  ;;  %v2276_v38 = vmul.f32 %v6393_v25, %v2171_v11 }
0x25c9   :  { %v2261_v26 = vpop.permute.xlu0 %2260 }
0x25ca   :  { %v2263_v27 = vmul.f32 %v6393_v25, %v2261_v26  ;;  %v6131_v25 = vpack.c.bf16 %v2408_v23, %v2407_v22 }
0x25cc   :  { %2265 = vrot.lane.b32.xlu1 %v2263_v27, %s6774_s26 }
0x25da   :  { %v2283_v14 = vpop.permute.xlu0 %2282 }
0x263e   :  { %v2266_v29 = vpop.permute.xlu1 %2265 }
0x263f   :  { %v2268_v30 = vadd.f32 %v2266_v29, %v2178_v20 }
0x2641   :  { %6394 = vtanh.f32 %v2268_v30 }
0x264b   :  { %v6395_v31 = vpop.eup %6394 }
0x264c   :  { %2272 = vrot.lane.b32.xlu1 %v6395_v31, %s6776_s25  ;;  %v2409_v31 = vld [vmem:[%s8037_s10 + $0x10] sm:$0xff] }
0x26be   :  { %v2273_v19 = vpop.permute.xlu1 %2272 }
0x26bf   :  { %v2275_v39 = vmul.f32 %v2273_v19, %v2270_v33  ;;  %v2410_v33 = vld [vmem:[%s8037_s10 + $0x18] sm:$0xff] }
0x26c1   :  { %v2277_v41 = vadd.f32 %v2276_v38, %v2275_v39  ;;  %v6135_v38 = vpack.c.bf16 %v2410_v33, %v2409_v31 }
0x26c3   :  { %v2279_v42 = vsub.f32 %v2277_v41, %v2171_v11  ;;  %v7537_v41 = vld [vmem:[#allocation4 + $0x10] sm:$0xff] }
0x26c5   :  { %v2285_v43 = vmul.f32 %v2283_v14, %v2279_v42  ;;  %v7541_v42 = vld [vmem:[#allocation4 + $0x18] sm:$0xff]  ;;  %v7545_v14 = vld [vmem:[#allocation4 + $0x20] sm:$0xff] }
0x26c7   :  { %v7458_v3 = vadd.f32 %v2285_v43, %v2171_v11  ;;  %v6127_v11 = vpack.c.bf16 %v2414_v9, %v2413_v8  ;;  %v7550_v43 = vld [vmem:[#allocation4 + $0x28] sm:$0xff] }
0x26c9   :  { %2288 = vrot.lane.b32.xlu0 %v7458_v3, %s6776_s25  ;;  %6128 = vmatprep.subr.bf16.mxu0 %v6127_v11 }
0x26ca   :  { %6130 = vmatpush3.bf16.msra.mxu0 %v6127_v11 }
0x26cb   :  { %6132 = vmatprep.subr.bf16.mxu0 %v6131_v25 }
0x273b   :  { %v2289_v44 = vpop.permute.xlu0 %2288 }
0x273c   :  { %2292 = vst.msk [vmem:[#allocation4 + $0x8] sm:$0xff] %vm242_vm1, %v2289_v44  ;;  %5712 = vmatmul.mubr.msk.f32.vlgmr.msra.gmra.mrb[18].mxu1 %vm242_vm1, %v2289_v44  ;;  %v7558_v44 = vld [vmem:[#allocation4 + $0x38] sm:$0xff] }
0x273d   :  { %5762 = vmatprep.mubr.msk.f32.mxu1 %vm6772_vm0, %v6773_v2  ;;  %6141 = vmatpush3.bf16.msra.mxu1 %v7474_v51 }
0x273e   :  { %6142 = vmatprep.subr.bf16.mxu1 %v6771_v1 }
0x2741   :  { %6144 = vmatpush3.bf16.msra.mxu1 %v7477_v53 }
0x2742   :  { %6145 = vmatprep.subr.bf16.mxu1 %v6771_v1 }
0x2743   :  { %v7533_v39 = vld [vmem:[#allocation4 + $0x8] sm:$0xff] }
0x2744   :  { %5763 = vmatmul.mubr.f32.vlgmr.msra.gmra.mrb[20].mxu1 %v6773_v2 }
0x2745   :  { %6147 = vmatpush3.bf16.msra.mxu1 %v7474_v51  ;;  %5773 = vmatprep.mubr.msk.f32.mxu1 %vm6772_vm0, %v6773_v2 }
0x2746   :  { %6148 = vmatprep.subr.bf16.mxu1 %v6771_v1 }
0x2749   :  { %6150 = vmatpush3.bf16.msra.mxu1 %v7477_v53 }
0x274a   :  { %6151 = vmatprep.subr.bf16.mxu1 %v6771_v1 }
0x280f   :  { %v2362_v45 = vpop.f32.mrb[18].mxu1 }
0x2810   :  { %v2373_v46 = vadd.f32 %v2362_v45, %v7364_v34  ;;  %v5713_v47 = vpop.f32.mrb[19].mxu1  ;;  %v2293_v34 = vld [vmem:[#allocation2] sm:$0xff] }
0x2811   :  { %v2366_v17 = vadd.f32 %v2362_v45, %v2293_v34  ;;  %v7562_v45 = vld [vmem:[#allocation3] sm:$0xff]  ;;  %v7570_v47 = vld [vmem:[#allocation3 + $0x10] sm:$0xff] }
0x2812   :  { %2375 = vrot.lane.b32.xlu1 %v2373_v46, %s6774_s26  ;;  %v7566_v46 = vld [vmem:[#allocation3 + $0x8] sm:$0xff] }
0x2813   :  { %v5160_v62 = vmul.f32 -1.442695, %v2366_v17 }
0x2815   :  { %6396 = vpow2.f32 %v5160_v62 }
0x2816   :  { %2397 = vperm.xlu1 %6310, %v7471_v7  }
0x2817   :  { %v7490_v56 = vpop.f32.mrb[20].mxu1 }
0x2818   :  { %v5764_v6 = vpop.f32.mrb[21].mxu1 }
0x281f   :  { %v6397_v54 = vpop.eup %6396 }
0x2820   :  { %v2370_v63 = vadd.f32 1.0, %v6397_v54 }
0x2822   :  { %6398 = vrcp.f32 %v2370_v63 }
0x282c   :  { %v6399_v0 = vpop.eup %6398 }
0x282d   :  { %v2385_v16 = vsub.f32 1.0, %v6399_v0  ;;  %v2391_v12 = vmul.f32 %v6399_v0, %v7458_v3 }
0x2884   :  { %v2376_v4 = vpop.permute.xlu1 %2375 }
0x2885   :  { %v2378_v55 = vmul.f32 %v6399_v0, %v2376_v4 }
0x2887   :  { %2380 = vrot.lane.b32.xlu0 %v2378_v55, %s6774_s26 }
0x2895   :  { %v2398_v21 = vpop.permute.xlu1 %2397 }
0x28f9   :  { %v2381_v57 = vpop.permute.xlu0 %2380 }
0x28fa   :  { %v2383_v5 = vadd.f32 %v2381_v57, %v2293_v34 }
0x28fc   :  { %6400 = vtanh.f32 %v2383_v5 }
0x2906   :  { %v6401_v58 = vpop.eup %6400 }
0x2907   :  { %2387 = vrot.lane.b32.xlu0 %v6401_v58, %s6776_s25 }
0x290b   :  { %2800 = vrot.lane.b32.xlu0 %v5179_v37, %s6774_s26 }
0x2979   :  { %v2388_v36 = vpop.permute.xlu0 %2387 }
0x297a   :  { %v2390_v13 = vmul.f32 %v2388_v36, %v2385_v16 }
0x297c   :  { %v2392_v15 = vadd.f32 %v2391_v12, %v2390_v13 }
0x297d   :  { %v7514_v26 = vpop.permute.xlu0 %2800 }
0x297e   :  { %v2394_v20 = vsub.f32 %v2392_v15, %v7458_v3  ;;  %v2803_v29 = vadd.f32 %v7514_v26, %v7490_v56 }
0x2980   :  { %v2400_v24 = vmul.f32 %v2398_v21, %v2394_v20 }
0x2982   :  { %v2401_v27 = vadd.f32 %v2400_v24, %v7458_v3  ;;  %v7554_v3 = vld [vmem:[#allocation4 + $0x30] sm:$0xff] }
0x2984   :  { %2403 = vrot.lane.b32.xlu1 %v2401_v27, %s6776_s25 }
0x2988   :  { %2805 = vrot.lane.b32.xlu1 %v2803_v29, %s6774_s26 }
0x298c   :  { %2826 = vperm.xlu1 %6310, %v7471_v7   ;;  %v7576_v7 = vld [vmem:[#allocation3 + $0x18] sm:$0xff] }
0x29f6   :  { %v2404_v30 = vpop.permute.xlu1 %2403 }
0x29f7   :  { %2406 = vst.msk [vmem:[#allocation4] sm:$0xff] %vm242_vm1, %v2404_v30 }
0x29fa   :  { %v2806_v16 = vpop.permute.xlu1 %2805 }
0x29fe   :  { %v7529_v19 = vld [vmem:[#allocation4] sm:$0xff] }
0x29ff   :  { %5722 = vmatprep.mubr.msk.f32.mxu0 %vm242_vm1, %v7529_v19 }
0x2a00   :  { %5723 = vmatmul.mubr.msk.f32.vlgmr.msra.gmra.mrb[28].mxu0 %vm242_vm1, %v7533_v39 }
0x2a01   :  { %6134 = vmatpush3.bf16.msra.mxu0 %v6131_v25  ;;  %5725 = vmatprep.mubr.msk.f32.mxu0 %vm242_vm1, %v7537_v41 }
0x2a02   :  { %6136 = vmatprep.subr.bf16.mxu0 %v6135_v38 }
0x2a04   :  { %5726 = vmatmul.mubr.msk.f32.gmra.mrb[30].mxu0 %vm242_vm1, %v7541_v42 }
0x2a05   :  { %5728 = vmatprep.mubr.msk.f32.mxu0 %vm242_vm1, %v7545_v14  ;;  %6138 = vmatpush3.bf16.msra.mxu0 %v6135_v38 }
0x2a06   :  { %6163 = vmatprep.subr.bf16.mxu0 %v6771_v1 }
0x2a08   :  { %5729 = vmatmul.mubr.msk.f32.gmra.mrb[32].mxu0 %vm242_vm1, %v7550_v43 }
0x2a09   :  { %5731 = vmatprep.mubr.msk.f32.mxu0 %vm242_vm1, %v7554_v3 }
0x2a0b   :  { %v2827_v23 = vpop.permute.xlu1 %2826 }
0x2a0c   :  { %5732 = vmatmul.mubr.msk.f32.gmra.mrb[34].mxu0 %vm242_vm1, %v7558_v44 }
0x2a0d   :  { %5742 = vmatprep.mubr.msk.f32.mxu0 %vm242_vm1, %v7562_v45 }
0x2a10   :  { %5743 = vmatmul.mubr.msk.f32.vlgmr.msra.gmra.mrb[28].mxu0 %vm242_vm1, %v7566_v46 }
0x2a11   :  { %5745 = vmatprep.mubr.msk.f32.mxu0 %vm242_vm1, %v7570_v47  ;;  %6165 = vmatpush3.bf16.msra.mxu0 %v7474_v51 }
0x2a12   :  { %6166 = vmatprep.subr.bf16.mxu0 %v6771_v1 }
0x2a14   :  { %5746 = vmatmul.mubr.msk.f32.gmra.mrb[30].mxu0 %vm242_vm1, %v7576_v7 }
0x2a15   :  { %5748 = vmatprep.mubr.msk.f32.mxu0 %vm242_vm1, %v7580_v48  ;;  %6168 = vmatpush3.bf16.msra.mxu0 %v7477_v53 }
0x2a16   :  { %6175 = vmatprep.subr.bf16.mxu0 %v6771_v1 }
0x2a18   :  { %5749 = vmatmul.mubr.msk.f32.gmra.mrb[32].mxu0 %vm242_vm1, %v7586_v49 }
0x2a19   :  { %5751 = vmatprep.mubr.msk.f32.mxu0 %vm242_vm1, %v7590_v50 }
0x2ae3   :  { %v5744_v34 = vpop.f32.mrb[28].mxu0 }
0x2ae4   :  { %v2702_v17 = vadd.f32 %v5744_v34, %v7594_v52  ;;  %v2656_v62 = vpop.f32.mrb[29].mxu0 }
0x2ae5   :  { %v2701_v54 = vadd.f32 %v7594_v52, %v2656_v62 }
0x2ae6   :  { %2710 = vst.msk [vmem:[#allocation2 + $0x8] sm:$0xff] %vm372_vm2, %v2702_v17 }
0x2ae7   :  { %2709 = vst.msk [vmem:[#allocation2] sm:$0xff] %vm372_vm2, %v2701_v54  ;;  %v5747_v63 = vpop.f32.mrb[30].mxu0 }
0x2ae8   :  { %v2704_v0 = vadd.f32 %v5747_v63, %v7594_v52  ;;  %v2666_v4 = vpop.f32.mrb[31].mxu0 }
0x2ae9   :  { %v2703_v55 = vadd.f32 %v7594_v52, %v2666_v4 }
0x2aea   :  { %2712 = vst.msk [vmem:[#allocation2 + $0x18] sm:$0xff] %vm372_vm2, %v2704_v0 }
0x2aeb   :  { %2711 = vst.msk [vmem:[#allocation2 + $0x10] sm:$0xff] %vm372_vm2, %v2703_v55  ;;  %v5750_v57 = vpop.f32.mrb[32].mxu0 }
0x2aec   :  { %v2706_v5 = vadd.f32 %v5750_v57, %v7594_v52  ;;  %v2676_v6 = vpop.f32.mrb[33].mxu0 }
0x2aed   :  { %v2705_v58 = vadd.f32 %v7594_v52, %v2676_v6  ;;  %v2831_v31 = vld [vmem:[#allocation2 + $0x8] sm:$0xff] }
0x2aee   :  { %2714 = vst.msk [vmem:[#allocation2 + $0x28] sm:$0xff] %vm372_vm2, %v2706_v5  ;;  %v2717_v37 = vld [vmem:[#allocation2] sm:$0xff] }
0x2aef   :  { %2713 = vst.msk [vmem:[#allocation2 + $0x20] sm:$0xff] %vm372_vm2, %v2705_v58  ;;  %v2788_v59 = vadd.f32 %v7490_v56, %v2717_v37 }
0x2af1   :  { %v5178_v60 = vmul.f32 -1.442695, %v2788_v59 }
0x2af3   :  { %6402 = vpow2.f32 %v5178_v60 }
0x2afd   :  { %v6403_v61 = vpop.eup %6402 }
0x2afe   :  { %v2792_v8 = vadd.f32 1.0, %v6403_v61 }
0x2b00   :  { %6404 = vrcp.f32 %v2792_v8 }
0x2b0a   :  { %v6405_v9 = vpop.eup %6404 }
0x2b0b   :  { %v2808_v11 = vmul.f32 %v6405_v9, %v2806_v16  ;;  %v2815_v15 = vsub.f32 1.0, %v6405_v9  ;;  %v2821_v21 = vmul.f32 0.0, %v6405_v9 }
0x2b0d   :  { %2810 = vrot.lane.b32.xlu0 %v2808_v11, %s6774_s26 }
0x2b7f   :  { %v2811_v36 = vpop.permute.xlu0 %2810 }
0x2b80   :  { %v2813_v12 = vadd.f32 %v2811_v36, %v2717_v37  ;;  %v7637_v36 = vld [vmem:[%s8079_s11 + $0x10] sm:$0xff] }
0x2b82   :  { %6406 = vtanh.f32 %v2813_v12  ;;  %v2943_v12 = vld [vmem:[#allocation2 + $0x10] sm:$0xff] }
0x2b8c   :  { %v6407_v13 = vpop.eup %6406 }
0x2b8d   :  { %2817 = vrot.lane.b32.xlu0 %v6407_v13, %s6776_s25 }
0x2bff   :  { %v2818_v20 = vpop.permute.xlu0 %2817 }
0x2c00   :  { %v2820_v56 = vmul.f32 %v2818_v20, %v2815_v15 }
0x2c02   :  { %v2822_v22 = vadd.f32 %v2821_v21, %v2820_v56 }
0x2c04   :  { %v2829_v24 = vmul.f32 %v2827_v23, %v2822_v22 }
0x2c06   :  { %2833 = vrot.lane.b32.xlu1 %v2829_v24, %s6776_s25 }
0x2c78   :  { %v2834_v25 = vpop.permute.xlu1 %2833 }
0x2c79   :  { %5774 = vmatmul.mubr.msk.f32.vlgmr.msra.gmra.mrb[22].mxu1 %vm242_vm1, %v2834_v25 }
0x2c7a   :  { %6153 = vmatpush3.bf16.msra.mxu1 %v7474_v51  ;;  %5784 = vmatprep.mubr.msk.f32.mxu1 %vm6772_vm0, %v6773_v2 }
0x2c7b   :  { %6154 = vmatprep.subr.bf16.mxu1 %v6771_v1 }
0x2c7e   :  { %6156 = vmatpush3.bf16.msra.mxu1 %v7477_v53 }
0x2c7f   :  { %6157 = vmatprep.subr.bf16.mxu1 %v6771_v1 }
0x2d4c   :  { %v2903_v27 = vpop.f32.mrb[22].mxu1 }
0x2d4d   :  { %v2914_v29 = vadd.f32 %v2903_v27, %v7514_v26  ;;  %v5775_v30 = vpop.f32.mrb[23].mxu1  ;;  %v2907_v33 = vadd.f32 %v2903_v27, %v2831_v31 }
0x2d4e   :  { %v1279_v30 = vadd.f32 %v7362_v32, %v7343_v28 }
0x2d4f   :  { %2916 = vrot.lane.b32.xlu0 %v2914_v29, %s6774_s26  ;;  %v5181_v38 = vmul.f32 -1.442695, %v2907_v33  ;;  %v1286_v29 = vadd.f32 %v7362_v32, %v7121_v18  ;;  %v7653_v32 = vld [vmem:[%s8079_s11 + $0x18] sm:$0xff] }
0x2d51   :  { %6408 = vpow2.f32 %v5181_v38 }
0x2d53   :  { %2938 = vperm.xlu0 %6311, %v7453_v35  }
0x2d5b   :  { %v6409_v34 = vpop.eup %6408 }
0x2d5c   :  { %v2911_v17 = vadd.f32 1.0, %v6409_v34 }
0x2d5e   :  { %6410 = vrcp.f32 %v2911_v17 }
0x2d68   :  { %v6411_v62 = vpop.eup %6410 }
0x2d69   :  { %v2926_v57 = vsub.f32 1.0, %v6411_v62  ;;  %v2932_v5 = vmul.f32 %v6411_v62, %v2829_v24 }
0x2dc1   :  { %v2917_v54 = vpop.permute.xlu0 %2916 }
0x2dc2   :  { %v2919_v63 = vmul.f32 %v6411_v62, %v2917_v54 }
0x2dc4   :  { %2921 = vrot.lane.b32.xlu1 %v2919_v63, %s6774_s26 }
0x2dd2   :  { %v2939_v59 = vpop.permute.xlu0 %2938 }
0x2e36   :  { %v2922_v0 = vpop.permute.xlu1 %2921 }
0x2e37   :  { %v2924_v4 = vadd.f32 %v2922_v0, %v2831_v31  ;;  %v5127_v31 = vmul.f32 -1.442695, %v1279_v30 }
0x2e39   :  { %6412 = vtanh.f32 %v2924_v4 }
0x2e43   :  { %v6413_v55 = vpop.eup %6412 }
0x2e44   :  { %2928 = vrot.lane.b32.xlu1 %v6413_v55, %s6776_s25 }
0x2eb6   :  { %v2929_v35 = vpop.permute.xlu1 %2928 }
0x2eb7   :  { %v2931_v6 = vmul.f32 %v2929_v35, %v2926_v57 }
0x2eb9   :  { %v2933_v58 = vadd.f32 %v2932_v5, %v2931_v6 }
0x2ebb   :  { %v2935_v37 = vsub.f32 %v2933_v58, %v2829_v24 }
0x2ebd   :  { %v2941_v60 = vmul.f32 %v2939_v59, %v2935_v37  ;;  %v3055_v59 = vld [vmem:[#allocation2 + $0x18] sm:$0xff] }
0x2ebf   :  { %v2942_v61 = vadd.f32 %v2941_v60, %v2829_v24 }
0x2ec1   :  { %2945 = vrot.lane.b32.xlu0 %v2942_v61, %s6776_s25 }
0x2f33   :  { %v2946_v8 = vpop.permute.xlu0 %2945 }
0x2f34   :  { %5785 = vmatmul.mubr.msk.f32.vlgmr.msra.gmra.mrb[24].mxu1 %vm242_vm1, %v2946_v8 }
0x2f35   :  { %6159 = vmatpush3.bf16.msra.mxu1 %v7474_v51  ;;  %5795 = vmatprep.mubr.msk.f32.mxu1 %vm6772_vm0, %v6773_v2 }
0x2f36   :  { %6160 = vmatprep.subr.bf16.mxu1 %v6771_v1 }
0x2f39   :  { %6162 = vmatpush3.bf16.msra.mxu1 %v7477_v53 }
0x2f3a   :  { %6169 = vmatprep.subr.bf16.mxu1 %v6771_v1 }
0x3007   :  { %v3015_v9 = vpop.f32.mrb[24].mxu1 }
0x3008   :  { %v3026_v16 = vadd.f32 %v3015_v9, %v7514_v26  ;;  %v5786_v11 = vpop.f32.mrb[25].mxu1  ;;  %v3019_v13 = vadd.f32 %v3015_v9, %v2943_v12 }
0x300a   :  { %3028 = vrot.lane.b32.xlu1 %v3026_v16, %s6774_s26  ;;  %v5184_v15 = vmul.f32 -1.442695, %v3019_v13 }
0x300c   :  { %6414 = vpow2.f32 %v5184_v15 }
0x300e   :  { %3050 = vperm.xlu1 %6310, %v7637_v36  }
0x3016   :  { %v6415_v20 = vpop.eup %6414 }
0x3017   :  { %v3023_v21 = vadd.f32 1.0, %v6415_v20 }
0x3019   :  { %6416 = vrcp.f32 %v3023_v21 }
0x3023   :  { %v6417_v56 = vpop.eup %6416 }
0x3024   :  { %v3038_v34 = vsub.f32 1.0, %v6417_v56  ;;  %v3044_v62 = vmul.f32 %v6417_v56, %v2942_v61 }
0x307c   :  { %v3029_v22 = vpop.permute.xlu1 %3028 }
0x307d   :  { %v3031_v23 = vmul.f32 %v6417_v56, %v3029_v22 }
0x307f   :  { %3033 = vrot.lane.b32.xlu0 %v3031_v23, %s6774_s26 }
0x308d   :  { %v3051_v18 = vpop.permute.xlu1 %3050 }
0x30f1   :  { %v3034_v24 = vpop.permute.xlu0 %3033 }
0x30f2   :  { %v3036_v25 = vadd.f32 %v3034_v24, %v2943_v12 }
0x30f4   :  { %6418 = vtanh.f32 %v3036_v25 }
0x30f5   :  { %6420 = vpow2.f32 %v5127_v31 }
0x30fe   :  { %v6419_v27 = vpop.eup %6418 }
0x30ff   :  { %3040 = vrot.lane.b32.xlu0 %v6419_v27, %s6776_s25  ;;  %v6421_v33 = vpop.eup %6420 }
0x3100   :  { %v1283_v38 = vadd.f32 1.0, %v6421_v33 }
0x3102   :  { %6422 = vrcp.f32 %v1283_v38 }
0x3103   :  { %1288 = vrot.lane.b32.xlu0 %v1286_v29, %s6774_s26 }
0x310c   :  { %v6423_v0 = vpop.eup %6422 }
0x310d   :  { %v1298_v22 = vsub.f32 1.0, %v6423_v0  ;;  %v1304_v24 = vmul.f32 %v6423_v0, %v7333_v10 }
0x3171   :  { %v3041_v17 = vpop.permute.xlu0 %3040 }
0x3172   :  { %v3043_v54 = vmul.f32 %v3041_v17, %v3038_v34 }
0x3174   :  { %v3045_v63 = vadd.f32 %v3044_v62, %v3043_v54 }
0x3175   :  { %v1289_v4 = vpop.permute.xlu0 %1288 }
0x3176   :  { %v3047_v55 = vsub.f32 %v3045_v63, %v2942_v61  ;;  %v1291_v57 = vmul.f32 %v6423_v0, %v1289_v4 }
0x3178   :  { %v3053_v35 = vmul.f32 %v3051_v18, %v3047_v55  ;;  %1293 = vrot.lane.b32.xlu0 %v1291_v57, %s6774_s26 }
0x317a   :  { %v3054_v5 = vadd.f32 %v3053_v35, %v2942_v61 }
0x317c   :  { %3057 = vrot.lane.b32.xlu1 %v3054_v5, %s6776_s25  ;;  %1311 = vperm.xlu0 %6311, %v7371_v40  }
0x3180   :  { %3162 = vperm.xlu0 %6311, %v7653_v32  }
0x31ea   :  { %v1294_v16 = vpop.permute.xlu0 %1293 }
0x31eb   :  { %v1296_v11 = vadd.f32 %v1294_v16, %v7343_v28 }
0x31ee   :  { %v3058_v6 = vpop.permute.xlu1 %3057 }
0x31ef   :  { %5796 = vmatmul.mubr.msk.f32.vlgmr.msra.gmra.mrb[26].mxu1 %vm242_vm1, %v3058_v6 }
0x31f0   :  { %6171 = vmatpush3.bf16.msra.mxu1 %v7474_v51  ;;  %5817 = vmatprep.mubr.msk.f32.mxu1 %vm6772_vm0, %v6773_v2 }
0x31f1   :  { %6172 = vmatprep.subr.bf16.mxu1 %v6771_v1 }
0x31f4   :  { %6174 = vmatpush3.bf16.msra.mxu1 %v7477_v53 }
0x31f5   :  { %6181 = vmatprep.subr.bf16.mxu1 %v6771_v1 }
0x31fb   :  { %v1312_v29 = vpop.permute.xlu0 %1311 }
0x31ff   :  { %v3163_v38 = vpop.permute.xlu0 %3162 }
0x32c2   :  { %v3127_v40 = vpop.f32.mrb[26].mxu1 }
0x32c3   :  { %v3138_v58 = vadd.f32 %v3127_v40, %v7514_v26  ;;  %v5797_v37 = vpop.f32.mrb[27].mxu1  ;;  %v3131_v60 = vadd.f32 %v3127_v40, %v3055_v59 }
0x32c5   :  { %3140 = vrot.lane.b32.xlu1 %v3138_v58, %s6774_s26  ;;  %v5187_v61 = vmul.f32 -1.442695, %v3131_v60  ;;  %v7696_v60 = vld [vmem:[%s8079_s11 + $0x20] sm:$0xff] }
0x32c7   :  { %6424 = vpow2.f32 %v5187_v61  ;;  %v3167_v61 = vld [vmem:[#allocation2 + $0x20] sm:$0xff] }
0x32d1   :  { %v6425_v8 = vpop.eup %6424 }
0x32d2   :  { %v3135_v9 = vadd.f32 1.0, %v6425_v8 }
0x32d4   :  { %6426 = vrcp.f32 %v3135_v9 }
0x32d5   :  { %6428 = vtanh.f32 %v1296_v11 }
0x32de   :  { %v6427_v12 = vpop.eup %6426 }
0x32df   :  { %v6429_v20 = vpop.eup %6428  ;;  %v3150_v34 = vsub.f32 1.0, %v6427_v12  ;;  %v3156_v62 = vmul.f32 %v6427_v12, %v3054_v5 }
0x3337   :  { %v3141_v13 = vpop.permute.xlu1 %3140 }
0x3338   :  { %v3143_v15 = vmul.f32 %v6427_v12, %v3141_v13 }
0x333a   :  { %3145 = vrot.lane.b32.xlu1 %v3143_v15, %s6774_s26 }
0x333e   :  { %1300 = vrot.lane.b32.xlu1 %v6429_v20, %s6776_s25 }
0x33ac   :  { %v3146_v21 = vpop.permute.xlu1 %3145 }
0x33ad   :  { %v3148_v56 = vadd.f32 %v3146_v21, %v3055_v59 }
0x33af   :  { %6430 = vtanh.f32 %v3148_v56 }
0x33b0   :  { %v1301_v23 = vpop.permute.xlu1 %1300 }
0x33b1   :  { %v1303_v25 = vmul.f32 %v1301_v23, %v1298_v22 }
0x33b3   :  { %v1305_v27 = vadd.f32 %v1304_v24, %v1303_v25 }
0x33b5   :  { %v1308_v28 = vsub.f32 %v1305_v27, %v7333_v10 }
0x33b7   :  { %v1314_v30 = vmul.f32 %v1312_v29, %v1308_v28 }
0x33b9   :  { %v6431_v31 = vpop.eup %6430  ;;  %v1315_v33 = vadd.f32 %v1314_v30, %v7333_v10 }
0x33ba   :  { %3152 = vrot.lane.b32.xlu1 %v6431_v31, %s6776_s25 }
0x33bb   :  { %1317 = vrot.lane.b32.xlu0 %v1315_v33, %s6776_s25 }
0x342c   :  { %v3153_v17 = vpop.permute.xlu1 %3152 }
0x342d   :  { %v3155_v54 = vmul.f32 %v3153_v17, %v3150_v34  ;;  %v1318_v63 = vpop.permute.xlu0 %1317  ;;  %v7714_v17 = vld [vmem:[%s8079_s11 + $0x28] sm:$0xff] }
0x342e   :  { %1321 = vst.msk [vmem:[#allocation3 + $0x38] sm:$0xff] %vm242_vm1, %v1318_v63 }
0x342f   :  { %v3157_v0 = vadd.f32 %v3156_v62, %v3155_v54 }
0x3431   :  { %v3159_v4 = vsub.f32 %v3157_v0, %v3054_v5 }
0x3433   :  { %v3165_v55 = vmul.f32 %v3163_v38, %v3159_v4 }
0x3435   :  { %v7674_v57 = vld [vmem:[#allocation3 + $0x38] sm:$0xff]  ;;  %v3166_v18 = vadd.f32 %v3165_v55, %v3054_v5 }
0x3436   :  { %5752 = vmatmul.mubr.msk.f32.gmra.mrb[34].mxu0 %vm242_vm1, %v7674_v57 }
0x3437   :  { %3169 = vrot.lane.b32.xlu1 %v3166_v18, %s6776_s25  ;;  %5806 = vmatprep.mubr.msk.f32.mxu0 %vm6772_vm0, %v6773_v2 }
0x34a9   :  { %v3170_v10 = vpop.permute.xlu1 %3169 }
0x34aa   :  { %5807 = vmatmul.mubr.msk.f32.vlgmr.msra.gmra.mrb[36].mxu0 %vm242_vm1, %v3170_v10 }
0x34ab   :  { %6177 = vmatpush3.bf16.msra.mxu0 %v7474_v51  ;;  %5828 = vmatprep.mubr.msk.f32.mxu0 %vm6772_vm0, %v6773_v2 }
0x34ac   :  { %6178 = vmatprep.subr.bf16.mxu0 %v6771_v1 }
0x34af   :  { %6180 = vmatpush3.bf16.msra.mxu0 %v7477_v53 }
0x3509   :  { %v5753_v35 = vpop.f32.mrb[34].mxu0 }
0x350a   :  { %v2708_v5 = vadd.f32 %v5753_v35, %v7594_v52  ;;  %v2686_v6 = vpop.f32.mrb[35].mxu0  ;;  %v3619_v35 = vld [vmem:[%s8041_s14 + $0x20] sm:$0xff] }
0x350b   :  { %v2707_v40 = vadd.f32 %v7594_v52, %v2686_v6 }
0x350c   :  { %2716 = vst.msk [vmem:[#allocation2 + $0x38] sm:$0xff] %vm372_vm2, %v2708_v5  ;;  %v3620_v5 = vld [vmem:[%s8041_s14 + $0x28] sm:$0xff] }
0x350d   :  { %2715 = vst.msk [vmem:[#allocation2 + $0x30] sm:$0xff] %vm372_vm2, %v2707_v40  ;;  %v6187_v6 = vpack.c.bf16 %v3620_v5, %v3619_v35  ;;  %v3624_v35 = vld [vmem:[%s8042_s15 + $0x8] sm:$0xff] }
0x350f   :  { %6188 = vmatprep.subr.bf16.mxu0 %v6187_v6 }
0x357d   :  { %v3239_v58 = vpop.f32.mrb[36].mxu0 }
0x357e   :  { %v3250_v37 = vadd.f32 %v3239_v58, %v7514_v26  ;;  %v5808_v59 = vpop.f32.mrb[37].mxu0  ;;  %v3243_v8 = vadd.f32 %v3239_v58, %v3167_v61 }
0x3580   :  { %3252 = vrot.lane.b32.xlu0 %v3250_v37, %s6774_s26  ;;  %v5190_v52 = vmul.f32 -1.442695, %v3243_v8 }
0x3582   :  { %6432 = vpow2.f32 %v5190_v52 }
0x3584   :  { %3274 = vperm.xlu0 %6311, %v7696_v60  }
0x358c   :  { %v6433_v9 = vpop.eup %6432 }
0x358d   :  { %v3247_v16 = vadd.f32 1.0, %v6433_v9 }
0x358f   :  { %6434 = vrcp.f32 %v3247_v16 }
0x3599   :  { %v6435_v11 = vpop.eup %6434 }
0x359a   :  { %v3262_v56 = vsub.f32 1.0, %v6435_v11  ;;  %v3268_v23 = vmul.f32 %v6435_v11, %v3166_v18 }
0x35f2   :  { %v3253_v12 = vpop.permute.xlu0 %3252 }
0x35f3   :  { %v3255_v13 = vmul.f32 %v6435_v11, %v3253_v12  ;;  %v3621_v12 = vld [vmem:[%s8041_s14 + $0x30] sm:$0xff] }
0x35f5   :  { %3257 = vrot.lane.b32.xlu1 %v3255_v13, %s6774_s26  ;;  %v3622_v13 = vld [vmem:[%s8041_s14 + $0x38] sm:$0xff] }
0x3603   :  { %v3275_v28 = vpop.permute.xlu0 %3274 }
0x3667   :  { %v3258_v15 = vpop.permute.xlu1 %3257 }
0x3668   :  { %v3260_v20 = vadd.f32 %v3258_v15, %v3167_v61  ;;  %v6191_v15 = vpack.c.bf16 %v3622_v13, %v3621_v12  ;;  %v5219_v12 = vld [vmem:[%s8044_s17] ss:$0 sm:$0xff] }
0x366a   :  { %6436 = vtanh.f32 %v3260_v20 }
0x3674   :  { %v6437_v21 = vpop.eup %6436 }
0x3675   :  { %3264 = vrot.lane.b32.xlu1 %v6437_v21, %s6776_s25  ;;  %v3615_v21 = vld [vmem:[%s8041_s14] sm:$0xff] }
0x36e7   :  { %v3265_v22 = vpop.permute.xlu1 %3264 }
0x36e8   :  { %v3267_v24 = vmul.f32 %v3265_v22, %v3262_v56  ;;  %v3616_v56 = vld [vmem:[%s8041_s14 + $0x8] sm:$0xff] }
0x36e9   :  { %v6195_v22 = vpack.c.bf16 %v3616_v56, %v3615_v21 }
0x36ea   :  { %v3269_v25 = vadd.f32 %v3268_v23, %v3267_v24  ;;  %v3617_v23 = vld [vmem:[%s8041_s14 + $0x10] sm:$0xff]  ;;  %v3618_v24 = vld [vmem:[%s8041_s14 + $0x18] sm:$0xff] }
0x36ec   :  { %v3271_v27 = vsub.f32 %v3269_v25, %v3166_v18  ;;  %v6199_v25 = vpack.c.bf16 %v3618_v24, %v3617_v23 }
0x36ee   :  { %v3277_v29 = vmul.f32 %v3275_v28, %v3271_v27 }
0x36f0   :  { %v3278_v30 = vadd.f32 %v3277_v29, %v3166_v18 }
0x36f2   :  { %3281 = vrot.lane.b32.xlu0 %v3278_v30, %s6776_s25 }
0x3764   :  { %v3282_v31 = vpop.permute.xlu0 %3281 }
0x3765   :  { %5818 = vmatmul.mubr.msk.f32.vlgmr.msra.gmra.mrb[28].mxu1 %vm242_vm1, %v3282_v31 }
0x3766   :  { %6183 = vmatpush3.bf16.msra.mxu1 %v7474_v51  ;;  %5839 = vmatprep.mubr.msk.f32.mxu1 %vm6772_vm0, %v6773_v2  ;;  %v3279_v51 = vld [vmem:[#allocation2 + $0x28] sm:$0xff] }
0x3767   :  { %6184 = vmatprep.subr.bf16.mxu1 %v6771_v1 }
0x376a   :  { %6186 = vmatpush3.bf16.msra.mxu1 %v7477_v53 }
0x376b   :  { %6203 = vmatprep.subr.bf16.mxu1 %v6771_v1 }
0x3838   :  { %v3351_v33 = vpop.f32.mrb[28].mxu1 }
0x3839   :  { %v3362_v38 = vadd.f32 %v3351_v33, %v7514_v26  ;;  %v5819_v34 = vpop.f32.mrb[29].mxu1  ;;  %v3355_v62 = vadd.f32 %v3351_v33, %v3279_v51  ;;  %v7800_v33 = vld [vmem:[#allocation2 + $0x38] sm:$0xff] }
0x383b   :  { %3364 = vrot.lane.b32.xlu1 %v3362_v38, %s6774_s26  ;;  %v5193_v54 = vmul.f32 -1.442695, %v3355_v62  ;;  %v3391_v38 = vld [vmem:[#allocation2 + $0x30] sm:$0xff] }
0x383d   :  { %6438 = vpow2.f32 %v5193_v54 }
0x383f   :  { %3386 = vperm.xlu1 %6310, %v7714_v17  }
0x3847   :  { %v6439_v53 = vpop.eup %6438 }
0x3848   :  { %v3359_v63 = vadd.f32 1.0, %v6439_v53 }
0x384a   :  { %6440 = vrcp.f32 %v3359_v63 }
0x3854   :  { %v6441_v0 = vpop.eup %6440 }
0x3855   :  { %v3374_v58 = vsub.f32 1.0, %v6441_v0  ;;  %v3380_v59 = vmul.f32 %v6441_v0, %v3278_v30 }
0x38ad   :  { %v3365_v4 = vpop.permute.xlu1 %3364 }
0x38ae   :  { %v3367_v55 = vmul.f32 %v6441_v0, %v3365_v4 }
0x38b0   :  { %3369 = vrot.lane.b32.xlu0 %v3367_v55, %s6774_s26 }
0x38be   :  { %v3387_v9 = vpop.permute.xlu1 %3386 }
0x3922   :  { %v3370_v18 = vpop.permute.xlu0 %3369 }
0x3923   :  { %v3372_v10 = vadd.f32 %v3370_v18, %v3279_v51 }
0x3925   :  { %6442 = vtanh.f32 %v3372_v10  ;;  %v3623_v10 = vld [vmem:[%s8042_s15] sm:$0xff] }
0x3926   :  { %v7812_v5 = vpack.c.bf16 %v3624_v35, %v3623_v10 }
0x392f   :  { %v6443_v40 = vpop.eup %6442 }
0x3930   :  { %3376 = vrot.lane.b32.xlu0 %v6443_v40, %s6776_s25 }
0x39a2   :  { %v3377_v37 = vpop.permute.xlu0 %3376 }
0x39a3   :  { %v3379_v61 = vmul.f32 %v3377_v37, %v3374_v58  ;;  %v3625_v58 = vld [vmem:[%s8042_s15 + $0x10] sm:$0xff]  ;;  %v3626_v37 = vld [vmem:[%s8042_s15 + $0x18] sm:$0xff] }
0x39a5   :  { %v3381_v8 = vadd.f32 %v3380_v59, %v3379_v61 }
0x39a7   :  { %v3383_v52 = vsub.f32 %v3381_v8, %v3278_v30  ;;  %v7823_v8 = vpack.c.bf16 %v3626_v37, %v3625_v58 }
0x39a9   :  { %v3389_v16 = vmul.f32 %v3387_v9, %v3383_v52 }
0x39ab   :  { %v7725_v11 = vadd.f32 %v3389_v16, %v3278_v30 }
0x39ad   :  { %3393 = vrot.lane.b32.xlu1 %v7725_v11, %s6776_s25 }
0x3a1f   :  { %v3394_v20 = vpop.permute.xlu1 %3393 }
0x3a20   :  { %5829 = vmatmul.mubr.msk.f32.vlgmr.msra.gmra.mrb[38].mxu0 %vm242_vm1, %v3394_v20 }
0x3a21   :  { %6190 = vmatpush3.bf16.msra.mxu0 %v6187_v6  ;;  %5850 = vmatprep.mubr.msk.f32.mxu0 %vm242_vm1, %v7529_v19 }
0x3a22   :  { %6192 = vmatprep.subr.bf16.mxu0 %v6191_v15 }
0x3a25   :  { %6194 = vmatpush3.bf16.msra.mxu0 %v6191_v15 }
0x3a26   :  { %6196 = vmatprep.subr.bf16.mxu0 %v6195_v22 }
0x3a28   :  { %5851 = vmatmul.mubr.msk.f32.vlgmr.msra.gmra.mrb[40].mxu0 %vm242_vm1, %v7533_v39 }
0x3a29   :  { %5853 = vmatprep.mubr.msk.f32.mxu0 %vm242_vm1, %v7537_v41  ;;  %6198 = vmatpush3.bf16.msra.mxu0 %v6195_v22 }
0x3a2a   :  { %6200 = vmatprep.subr.bf16.mxu0 %v6199_v25 }
0x3a2c   :  { %5854 = vmatmul.mubr.msk.f32.gmra.mrb[42].mxu0 %vm242_vm1, %v7541_v42  ;;  %v7788_v42 = vld [vmem:[%s8079_s11 + $0x30] sm:$0xff] }
0x3a2d   :  { %5856 = vmatprep.mubr.msk.f32.mxu0 %vm242_vm1, %v7545_v14  ;;  %6202 = vmatpush3.bf16.msra.mxu0 %v6199_v25  ;;  %v5217_v14 = vld [vmem:[%s8043_s16] ss:$0 sm:$0xff]  ;;  %v7860_v25 = vld [vmem:[%s8079_s11 + $0x38] sm:$0xff] }
0x3a2e   :  { %6227 = vmatprep.subr.bf16.mxu0 %v6771_v1 }
0x3a30   :  { %5857 = vmatmul.mubr.msk.f32.gmra.mrb[44].mxu0 %vm242_vm1, %v7550_v43 }
0x3a31   :  { %5859 = vmatprep.mubr.msk.f32.mxu0 %vm242_vm1, %v7554_v3 }
0x3a34   :  { %5860 = vmatmul.mubr.msk.f32.gmra.mrb[46].mxu0 %vm242_vm1, %v7558_v44 }
0x3a35   :  { %5870 = vmatprep.mubr.msk.f32.mxu0 %vm242_vm1, %v7562_v45 }
0x3a38   :  { %5871 = vmatmul.mubr.msk.f32.vlgmr.msra.gmra.mrb[40].mxu0 %vm242_vm1, %v7566_v46 }
0x3a39   :  { %5873 = vmatprep.mubr.msk.f32.mxu0 %vm242_vm1, %v7570_v47  ;;  %6229 = vmatpush3.bf16.msra.mxu0 %v7812_v5 }
0x3a3a   :  { %6230 = vmatprep.subr.bf16.mxu0 %v6771_v1 }
0x3a3c   :  { %5874 = vmatmul.mubr.msk.f32.gmra.mrb[42].mxu0 %vm242_vm1, %v7576_v7 }
0x3a3d   :  { %5876 = vmatprep.mubr.msk.f32.mxu0 %vm242_vm1, %v7580_v48  ;;  %6232 = vmatpush3.bf16.msra.mxu0 %v7823_v8 }
0x3a3e   :  { %6239 = vmatprep.subr.bf16.mxu0 %v6771_v1 }
0x3a40   :  { %5877 = vmatmul.mubr.msk.f32.gmra.mrb[44].mxu0 %vm242_vm1, %v7586_v49 }
0x3a41   :  { %5879 = vmatprep.mubr.msk.f32.mxu0 %vm242_vm1, %v7590_v50 }
0x3a44   :  { %5880 = vmatmul.mubr.msk.f32.gmra.mrb[46].mxu0 %vm242_vm1, %v7674_v57 }
0x3a45   :  { %5934 = vmatprep.mubr.msk.f32.mxu0 %vm6772_vm0, %v6773_v2 }
0x3af3   :  { %v3463_v19 = vpop.f32.mrb[38].mxu0 }
0x3af4   :  { %v3474_v39 = vadd.f32 %v3463_v19, %v7514_v26  ;;  %v5830_v41 = vpop.f32.mrb[39].mxu0  ;;  %v3467_v34 = vadd.f32 %v3463_v19, %v3391_v38 }
0x3af6   :  { %3476 = vrot.lane.b32.xlu0 %v3474_v39, %s6774_s26  ;;  %v5196_v51 = vmul.f32 -1.442695, %v3467_v34 }
0x3af8   :  { %6444 = vpow2.f32 %v5196_v51 }
0x3afa   :  { %3498 = vperm.xlu0 %6311, %v7788_v42  }
0x3b02   :  { %v6445_v62 = vpop.eup %6444 }
0x3b03   :  { %v3471_v54 = vadd.f32 1.0, %v6445_v62 }
0x3b05   :  { %6446 = vrcp.f32 %v3471_v54 }
0x3b0b   :  { %v5872_v43 = vpop.f32.mrb[40].mxu0 }
0x3b0c   :  { %v3910_v3 = vadd.f32 %v5872_v43, %v5217_v14  ;;  %v3864_v44 = vpop.f32.mrb[41].mxu0 }
0x3b0d   :  { %v3909_v45 = vadd.f32 %v5217_v14, %v3864_v44 }
0x3b0e   :  { %3918 = vst.msk [vmem:[#allocation2 + $0x8] sm:$0xff] %vm372_vm2, %v3910_v3 }
0x3b0f   :  { %3917 = vst.msk [vmem:[#allocation2] sm:$0xff] %vm372_vm2, %v3909_v45  ;;  %v5875_v46 = vpop.f32.mrb[42].mxu0  ;;  %v6447_v53 = vpop.eup %6446 }
0x3b10   :  { %v3912_v47 = vadd.f32 %v5875_v46, %v5217_v14  ;;  %v3874_v7 = vpop.f32.mrb[43].mxu0  ;;  %v3486_v6 = vsub.f32 1.0, %v6447_v53  ;;  %v3492_v59 = vmul.f32 %v6447_v53, %v7725_v11 }
0x3b11   :  { %v3911_v48 = vadd.f32 %v5217_v14, %v3874_v7 }
0x3b12   :  { %3920 = vst.msk [vmem:[#allocation2 + $0x18] sm:$0xff] %vm372_vm2, %v3912_v47 }
0x3b13   :  { %3919 = vst.msk [vmem:[#allocation2 + $0x10] sm:$0xff] %vm372_vm2, %v3911_v48  ;;  %v5878_v49 = vpop.f32.mrb[44].mxu0 }
0x3b14   :  { %v3914_v50 = vadd.f32 %v5878_v49, %v5217_v14  ;;  %v3884_v57 = vpop.f32.mrb[45].mxu0 }
0x3b15   :  { %v3913_v27 = vadd.f32 %v5217_v14, %v3884_v57 }
0x3b16   :  { %3922 = vst.msk [vmem:[#allocation2 + $0x28] sm:$0xff] %vm372_vm2, %v3914_v50 }
0x3b17   :  { %3921 = vst.msk [vmem:[#allocation2 + $0x20] sm:$0xff] %vm372_vm2, %v3913_v27  ;;  %v5881_v28 = vpop.f32.mrb[46].mxu0 }
0x3b18   :  { %v3916_v29 = vadd.f32 %v5881_v28, %v5217_v14  ;;  %v3894_v30 = vpop.f32.mrb[47].mxu0 }
0x3b19   :  { %v3915_v31 = vadd.f32 %v5217_v14, %v3894_v30 }
0x3b1a   :  { %3924 = vst.msk [vmem:[#allocation2 + $0x38] sm:$0xff] %vm372_vm2, %v3916_v29 }
0x3b1b   :  { %3923 = vst.msk [vmem:[#allocation2 + $0x30] sm:$0xff] %vm372_vm2, %v3915_v31 }
0x3b21   :  { %v3925_v19 = vld [vmem:[#allocation2 + $0x38] sm:$0xff] }
0x3b22   :  { %v4039_v51 = vld [vmem:[#allocation2 + $0x30] sm:$0xff] }
0x3b68   :  { %v3477_v63 = vpop.permute.xlu0 %3476 }
0x3b69   :  { %v3479_v0 = vmul.f32 %v6447_v53, %v3477_v63 }
0x3b6b   :  { %3481 = vrot.lane.b32.xlu1 %v3479_v0, %s6774_s26 }
0x3b79   :  { %v3499_v16 = vpop.permute.xlu0 %3498 }
0x3bdd   :  { %v3482_v4 = vpop.permute.xlu1 %3481 }
0x3bde   :  { %v3484_v55 = vadd.f32 %v3482_v4, %v3391_v38 }
0x3be0   :  { %6448 = vtanh.f32 %v3484_v55 }
0x3bea   :  { %v6449_v18 = vpop.eup %6448 }
0x3beb   :  { %3488 = vrot.lane.b32.xlu1 %v6449_v18, %s6776_s25 }
0x3bef   :  { %4008 = vrot.lane.b32.xlu1 %v5219_v12, %s6774_s26 }
0x3c5d   :  { %v3489_v40 = vpop.permute.xlu1 %3488 }
0x3c5e   :  { %v3491_v61 = vmul.f32 %v3489_v40, %v3486_v6 }
0x3c60   :  { %v3493_v52 = vadd.f32 %v3492_v59, %v3491_v61 }
0x3c61   :  { %v7853_v56 = vpop.permute.xlu1 %4008 }
0x3c62   :  { %v3495_v9 = vsub.f32 %v3493_v52, %v7725_v11 }
0x3c64   :  { %v3501_v13 = vmul.f32 %v3499_v16, %v3495_v9 }
0x3c66   :  { %v7833_v15 = vadd.f32 %v3501_v13, %v7725_v11 }
0x3c68   :  { %3505 = vrot.lane.b32.xlu0 %v7833_v15, %s6776_s25 }
0x3cda   :  { %v3506_v20 = vpop.permute.xlu0 %3505 }
0x3cdb   :  { %5840 = vmatmul.mubr.msk.f32.vlgmr.msra.gmra.mrb[30].mxu1 %vm242_vm1, %v3506_v20 }
0x3cdc   :  { %6205 = vmatpush3.bf16.msra.mxu1 %v7812_v5  ;;  %5890 = vmatprep.mubr.msk.f32.mxu1 %vm6772_vm0, %v6773_v2 }
0x3cdd   :  { %6206 = vmatprep.subr.bf16.mxu1 %v6771_v1 }
0x3ce0   :  { %6208 = vmatpush3.bf16.msra.mxu1 %v7823_v8 }
0x3ce1   :  { %6209 = vmatprep.subr.bf16.mxu1 %v6771_v1 }
0x3ce3   :  { %5891 = vmatmul.mubr.f32.vlgmr.msra.gmra.mrb[32].mxu1 %v6773_v2 }
0x3ce4   :  { %6211 = vmatpush3.bf16.msra.mxu1 %v7812_v5  ;;  %5901 = vmatprep.mubr.msk.f32.mxu1 %vm6772_vm0, %v6773_v2 }
0x3ce5   :  { %6212 = vmatprep.subr.bf16.mxu1 %v6771_v1 }
0x3ce8   :  { %6214 = vmatpush3.bf16.msra.mxu1 %v7823_v8 }
0x3ce9   :  { %6215 = vmatprep.subr.bf16.mxu1 %v6771_v1 }
0x3dae   :  { %v7851_v11 = vpop.f32.mrb[30].mxu1 }
0x3daf   :  { %v5841_v21 = vpop.f32.mrb[31].mxu1 }
0x3db0   :  { %v4151_v21 = vld [vmem:[#allocation2 + $0x28] sm:$0xff] }
0x3db6   :  { %v3992_v22 = vpop.f32.mrb[32].mxu1 }
0x3db7   :  { %v5892_v23 = vpop.f32.mrb[33].mxu1  ;;  %v4011_v24 = vadd.f32 %v7853_v56, %v3992_v22  ;;  %v3996_v39 = vadd.f32 %v3992_v22, %v3925_v19 }
0x3db9   :  { %4013 = vrot.lane.b32.xlu0 %v4011_v24, %s6774_s26  ;;  %v5218_v41 = vmul.f32 -1.442695, %v3996_v39 }
0x3dbb   :  { %6450 = vpow2.f32 %v5218_v41 }
0x3dbd   :  { %4034 = vperm.xlu0 %6311, %v7860_v25  }
0x3dc5   :  { %v6451_v14 = vpop.eup %6450 }
0x3dc6   :  { %v4000_v43 = vadd.f32 1.0, %v6451_v14 }
0x3dc8   :  { %6452 = vrcp.f32 %v4000_v43 }
0x3dd2   :  { %v6453_v3 = vpop.eup %6452 }
0x3dd3   :  { %v4023_v48 = vsub.f32 1.0, %v6453_v3  ;;  %v4029_v50 = vmul.f32 0.0, %v6453_v3 }
0x3e2b   :  { %v4014_v44 = vpop.permute.xlu0 %4013 }
0x3e2c   :  { %v4016_v45 = vmul.f32 %v6453_v3, %v4014_v44 }
0x3e2e   :  { %4018 = vrot.lane.b32.xlu1 %v4016_v45, %s6774_s26 }
0x3e3c   :  { %v4035_v28 = vpop.permute.xlu0 %4034 }
0x3ea0   :  { %v4019_v46 = vpop.permute.xlu1 %4018 }
0x3ea1   :  { %v4021_v47 = vadd.f32 %v4019_v46, %v3925_v19 }
0x3ea3   :  { %6454 = vtanh.f32 %v4021_v47 }
0x3ead   :  { %v6455_v7 = vpop.eup %6454 }
0x3eae   :  { %4025 = vrot.lane.b32.xlu1 %v6455_v7, %s6776_s25 }
0x3f20   :  { %v4026_v49 = vpop.permute.xlu1 %4025 }
0x3f21   :  { %v4028_v57 = vmul.f32 %v4026_v49, %v4023_v48 }
0x3f23   :  { %v4030_v27 = vadd.f32 %v4029_v50, %v4028_v57 }
0x3f25   :  { %v4037_v29 = vmul.f32 %v4035_v28, %v4030_v27 }
0x3f27   :  { %4041 = vrot.lane.b32.xlu0 %v4037_v29, %s6776_s25 }
0x3f99   :  { %v4042_v30 = vpop.permute.xlu0 %4041 }
0x3f9a   :  { %5902 = vmatmul.mubr.msk.f32.vlgmr.msra.gmra.mrb[34].mxu1 %vm242_vm1, %v4042_v30 }
0x3f9b   :  { %6217 = vmatpush3.bf16.msra.mxu1 %v7812_v5  ;;  %5912 = vmatprep.mubr.msk.f32.mxu1 %vm6772_vm0, %v6773_v2 }
0x3f9c   :  { %6218 = vmatprep.subr.bf16.mxu1 %v6771_v1 }
0x3f9f   :  { %6220 = vmatpush3.bf16.msra.mxu1 %v7823_v8 }
0x3fa0   :  { %6221 = vmatprep.subr.bf16.mxu1 %v6771_v1 }
0x406d   :  { %v4111_v31 = vpop.f32.mrb[34].mxu1 }
0x406e   :  { %v4122_v38 = vadd.f32 %v4111_v31, %v7853_v56  ;;  %v5903_v34 = vpop.f32.mrb[35].mxu1  ;;  %v4115_v62 = vadd.f32 %v4111_v31, %v4039_v51  ;;  %v4263_v31 = vld [vmem:[#allocation2 + $0x20] sm:$0xff] }
0x4070   :  { %4124 = vrot.lane.b32.xlu1 %v4122_v38, %s6774_s26  ;;  %v5222_v54 = vmul.f32 -1.442695, %v4115_v62 }
0x4072   :  { %6456 = vpow2.f32 %v5222_v54 }
0x4074   :  { %4146 = vperm.xlu1 %6310, %v7788_v42  }
0x407c   :  { %v6457_v53 = vpop.eup %6456 }
0x407d   :  { %v4119_v63 = vadd.f32 1.0, %v6457_v53 }
0x407f   :  { %6458 = vrcp.f32 %v4119_v63 }
0x4089   :  { %v6459_v0 = vpop.eup %6458 }
0x408a   :  { %v4134_v6 = vsub.f32 1.0, %v6459_v0  ;;  %v4140_v40 = vmul.f32 %v6459_v0, %v4037_v29 }
0x40e2   :  { %v4125_v4 = vpop.permute.xlu1 %4124 }
0x40e3   :  { %v4127_v55 = vmul.f32 %v6459_v0, %v4125_v4 }
0x40e5   :  { %4129 = vrot.lane.b32.xlu0 %v4127_v55, %s6774_s26 }
0x40f3   :  { %v4147_v61 = vpop.permute.xlu1 %4146 }
0x4157   :  { %v4130_v18 = vpop.permute.xlu0 %4129 }
0x4158   :  { %v4132_v10 = vadd.f32 %v4130_v18, %v4039_v51 }
0x415a   :  { %6460 = vtanh.f32 %v4132_v10 }
0x4164   :  { %v6461_v35 = vpop.eup %6460 }
0x4165   :  { %4136 = vrot.lane.b32.xlu0 %v6461_v35, %s6776_s25 }
0x41d7   :  { %v4137_v42 = vpop.permute.xlu0 %4136 }
0x41d8   :  { %v4139_v58 = vmul.f32 %v4137_v42, %v4134_v6 }
0x41da   :  { %v4141_v37 = vadd.f32 %v4140_v40, %v4139_v58 }
0x41dc   :  { %v4143_v59 = vsub.f32 %v4141_v37, %v4037_v29 }
0x41de   :  { %v4149_v52 = vmul.f32 %v4147_v61, %v4143_v59 }
0x41e0   :  { %v4150_v9 = vadd.f32 %v4149_v52, %v4037_v29 }
0x41e2   :  { %4153 = vrot.lane.b32.xlu1 %v4150_v9, %s6776_s25 }
0x4254   :  { %v4154_v16 = vpop.permute.xlu1 %4153 }
0x4255   :  { %5913 = vmatmul.mubr.msk.f32.vlgmr.msra.gmra.mrb[36].mxu1 %vm242_vm1, %v4154_v16  ;;  %v4375_v16 = vld [vmem:[#allocation2 + $0x18] sm:$0xff] }
0x4256   :  { %6223 = vmatpush3.bf16.msra.mxu1 %v7812_v5  ;;  %5923 = vmatprep.mubr.msk.f32.mxu1 %vm6772_vm0, %v6773_v2 }
0x4257   :  { %6224 = vmatprep.subr.bf16.mxu1 %v6771_v1 }
0x425a   :  { %6226 = vmatpush3.bf16.msra.mxu1 %v7823_v8 }
0x425b   :  { %6233 = vmatprep.subr.bf16.mxu1 %v6771_v1 }
0x4328   :  { %v4223_v12 = vpop.f32.mrb[36].mxu1 }
0x4329   :  { %v4234_v13 = vadd.f32 %v4223_v12, %v7853_v56  ;;  %v5914_v20 = vpop.f32.mrb[37].mxu1  ;;  %v4227_v22 = vadd.f32 %v4223_v12, %v4151_v21 }
0x432b   :  { %4236 = vrot.lane.b32.xlu0 %v4234_v13, %s6774_s26  ;;  %v5225_v23 = vmul.f32 -1.442695, %v4227_v22 }
0x432d   :  { %6462 = vpow2.f32 %v5225_v23 }
0x432f   :  { %4258 = vperm.xlu0 %6311, %v7714_v17  }
0x4337   :  { %v6463_v24 = vpop.eup %6462 }
0x4338   :  { %v4231_v19 = vadd.f32 1.0, %v6463_v24 }
0x433a   :  { %6464 = vrcp.f32 %v4231_v19 }
0x4344   :  { %v6465_v39 = vpop.eup %6464 }
0x4345   :  { %v4246_v45 = vsub.f32 1.0, %v6465_v39  ;;  %v4252_v46 = vmul.f32 %v6465_v39, %v4150_v9 }
0x439d   :  { %v4237_v41 = vpop.permute.xlu0 %4236 }
0x439e   :  { %v4239_v14 = vmul.f32 %v6465_v39, %v4237_v41 }
0x43a0   :  { %4241 = vrot.lane.b32.xlu1 %v4239_v14, %s6774_s26 }
0x43ae   :  { %v4259_v49 = vpop.permute.xlu0 %4258 }
0x4412   :  { %v4242_v43 = vpop.permute.xlu1 %4241 }
0x4413   :  { %v4244_v3 = vadd.f32 %v4242_v43, %v4151_v21 }
0x4415   :  { %6466 = vtanh.f32 %v4244_v3 }
0x441f   :  { %v6467_v44 = vpop.eup %6466 }
0x4420   :  { %4248 = vrot.lane.b32.xlu1 %v6467_v44, %s6776_s25 }
0x4492   :  { %v4249_v17 = vpop.permute.xlu1 %4248 }
0x4493   :  { %v4251_v47 = vmul.f32 %v4249_v17, %v4246_v45 }
0x4495   :  { %v4253_v7 = vadd.f32 %v4252_v46, %v4251_v47 }
0x4497   :  { %v4255_v48 = vsub.f32 %v4253_v7, %v4150_v9 }
0x4499   :  { %v4261_v50 = vmul.f32 %v4259_v49, %v4255_v48 }
0x449b   :  { %v4262_v57 = vadd.f32 %v4261_v50, %v4150_v9 }
0x449d   :  { %4265 = vrot.lane.b32.xlu0 %v4262_v57, %s6776_s25 }
0x450f   :  { %v4266_v27 = vpop.permute.xlu0 %4265 }
0x4510   :  { %5924 = vmatmul.mubr.msk.f32.vlgmr.msra.gmra.mrb[38].mxu1 %vm242_vm1, %v4266_v27 }
0x4511   :  { %6235 = vmatpush3.bf16.msra.mxu1 %v7812_v5  ;;  %5945 = vmatprep.mubr.msk.f32.mxu1 %vm6772_vm0, %v6773_v2 }
0x4512   :  { %6236 = vmatprep.subr.bf16.mxu1 %v6771_v1 }
0x4515   :  { %6238 = vmatpush3.bf16.msra.mxu1 %v7823_v8 }
0x4516   :  { %6245 = vmatprep.subr.bf16.mxu1 %v6771_v1 }
0x45e3   :  { %v4335_v28 = vpop.f32.mrb[38].mxu1 }
0x45e4   :  { %v4346_v29 = vadd.f32 %v4335_v28, %v7853_v56  ;;  %v5925_v30 = vpop.f32.mrb[39].mxu1  ;;  %v4339_v38 = vadd.f32 %v4335_v28, %v4263_v31 }
0x45e6   :  { %4348 = vrot.lane.b32.xlu1 %v4346_v29, %s6774_s26  ;;  %v5228_v34 = vmul.f32 -1.442695, %v4339_v38 }
0x45e8   :  { %6468 = vpow2.f32 %v5228_v34 }
0x45ea   :  { %4370 = vperm.xlu1 %6310, %v7696_v60  }
0x45f2   :  { %v6469_v51 = vpop.eup %6468 }
0x45f3   :  { %v4343_v62 = vadd.f32 1.0, %v6469_v51 }
0x45f5   :  { %6470 = vrcp.f32 %v4343_v62 }
0x45ff   :  { %v6471_v54 = vpop.eup %6470 }
0x4600   :  { %v4358_v18 = vsub.f32 1.0, %v6471_v54  ;;  %v4364_v10 = vmul.f32 %v6471_v54, %v4262_v57 }
0x4658   :  { %v4349_v53 = vpop.permute.xlu1 %4348 }
0x4659   :  { %v4351_v63 = vmul.f32 %v6471_v54, %v4349_v53 }
0x465b   :  { %4353 = vrot.lane.b32.xlu0 %v4351_v63, %s6774_s26 }
0x4669   :  { %v4371_v40 = vpop.permute.xlu1 %4370 }
0x46cd   :  { %v4354_v0 = vpop.permute.xlu0 %4353 }
0x46ce   :  { %v4356_v4 = vadd.f32 %v4354_v0, %v4263_v31 }
0x46d0   :  { %6472 = vtanh.f32 %v4356_v4 }
0x46da   :  { %v6473_v55 = vpop.eup %6472 }
0x46db   :  { %4360 = vrot.lane.b32.xlu0 %v6473_v55, %s6776_s25 }
0x474d   :  { %v4361_v60 = vpop.permute.xlu0 %4360 }
0x474e   :  { %v4363_v35 = vmul.f32 %v4361_v60, %v4358_v18 }
0x4750   :  { %v4365_v6 = vadd.f32 %v4364_v10, %v4363_v35 }
0x4752   :  { %v4367_v42 = vsub.f32 %v4365_v6, %v4262_v57 }
0x4754   :  { %v4373_v58 = vmul.f32 %v4371_v40, %v4367_v42  ;;  %v5238_v42 = vld [vmem:[%s8079_s11 + $0x8] sm:$0xff] }
0x4755   :  { %v4599_v40 = vld [vmem:[#allocation2 + $0x8] sm:$0xff] }
0x4756   :  { %v4374_v37 = vadd.f32 %v4373_v58, %v4262_v57  ;;  %v4487_v57 = vld [vmem:[#allocation2 + $0x10] sm:$0xff] }
0x4758   :  { %4377 = vrot.lane.b32.xlu1 %v4374_v37, %s6776_s25 }
0x47ca   :  { %v4378_v59 = vpop.permute.xlu1 %4377 }
0x47cb   :  { %5935 = vmatmul.mubr.msk.f32.vlgmr.msra.gmra.mrb[48].mxu0 %vm242_vm1, %v4378_v59 }
0x47cc   :  { %6241 = vmatpush3.bf16.msra.mxu0 %v7812_v5  ;;  %5956 = vmatprep.mubr.msk.f32.mxu0 %vm6772_vm0, %v6773_v2 }
0x47cd   :  { %6242 = vmatprep.subr.bf16.mxu0 %v6771_v1 }
0x47d0   :  { %6244 = vmatpush3.bf16.msra.mxu0 %v7823_v8 }
0x47d1   :  { %6251 = vmatprep.subr.bf16.mxu0 %v6771_v1 }
0x489e   :  { %v4447_v61 = vpop.f32.mrb[48].mxu0 }
0x489f   :  { %v4458_v52 = vadd.f32 %v4447_v61, %v7853_v56  ;;  %v5936_v9 = vpop.f32.mrb[49].mxu0  ;;  %v4451_v12 = vadd.f32 %v4447_v61, %v4375_v16 }
0x48a1   :  { %4460 = vrot.lane.b32.xlu0 %v4458_v52, %s6774_s26  ;;  %v5231_v13 = vmul.f32 -1.442695, %v4451_v12 }
0x48a3   :  { %6474 = vpow2.f32 %v5231_v13 }
0x48a5   :  { %4482 = vperm.xlu0 %6311, %v7653_v32  }
0x48ad   :  { %v6475_v20 = vpop.eup %6474 }
0x48ae   :  { %v4455_v21 = vadd.f32 1.0, %v6475_v20 }
0x48b0   :  { %6476 = vrcp.f32 %v4455_v21  ;;  %v3586_v21 = vadd.f32 %v7851_v11, %v7514_v26 }
0x48ba   :  { %v6477_v22 = vpop.eup %6476 }
0x48bb   :  { %v4470_v14 = vsub.f32 1.0, %v6477_v22  ;;  %v4476_v43 = vmul.f32 %v6477_v22, %v4374_v37 }
0x4913   :  { %v4461_v23 = vpop.permute.xlu0 %4460 }
0x4914   :  { %v4463_v24 = vmul.f32 %v6477_v22, %v4461_v23  ;;  %v3579_v22 = vadd.f32 %v7851_v11, %v7800_v33  ;;  %v4814_v11 = vld [vmem:[%s8079_s11] sm:$0xff] }
0x4916   :  { %4465 = vrot.lane.b32.xlu1 %v4463_v24, %s6774_s26  ;;  %v5199_v23 = vmul.f32 -1.442695, %v3579_v22 }
0x4924   :  { %v4483_v17 = vpop.permute.xlu0 %4482 }
0x4988   :  { %v4466_v19 = vpop.permute.xlu1 %4465 }
0x4989   :  { %v4468_v39 = vadd.f32 %v4466_v19, %v4375_v16 }
0x498b   :  { %6478 = vtanh.f32 %v4468_v39 }
0x4995   :  { %v6479_v41 = vpop.eup %6478 }
0x4996   :  { %4472 = vrot.lane.b32.xlu1 %v6479_v41, %s6776_s25 }
0x4a08   :  { %v4473_v32 = vpop.permute.xlu1 %4472 }
0x4a09   :  { %v4475_v3 = vmul.f32 %v4473_v32, %v4470_v14 }
0x4a0b   :  { %v4477_v44 = vadd.f32 %v4476_v43, %v4475_v3 }
0x4a0d   :  { %v4479_v45 = vsub.f32 %v4477_v44, %v4374_v37 }
0x4a0f   :  { %v4485_v46 = vmul.f32 %v4483_v17, %v4479_v45 }
0x4a11   :  { %v4486_v47 = vadd.f32 %v4485_v46, %v4374_v37 }
0x4a13   :  { %4489 = vrot.lane.b32.xlu0 %v4486_v47, %s6776_s25 }
0x4a85   :  { %v4490_v7 = vpop.permute.xlu0 %4489 }
0x4a86   :  { %5946 = vmatmul.mubr.msk.f32.vlgmr.msra.gmra.mrb[40].mxu1 %vm242_vm1, %v4490_v7 }
0x4a87   :  { %6247 = vmatpush3.bf16.msra.mxu1 %v7812_v5  ;;  %5967 = vmatprep.mubr.msk.f32.mxu1 %vm6772_vm0, %v6773_v2 }
0x4a88   :  { %6248 = vmatprep.subr.bf16.mxu1 %v6771_v1 }
0x4a8b   :  { %6250 = vmatpush3.bf16.msra.mxu1 %v7823_v8 }
0x4a8c   :  { %6263 = vmatprep.subr.bf16.mxu1 %v6771_v1 }
0x4b59   :  { %v4559_v48 = vpop.f32.mrb[40].mxu1 }
0x4b5a   :  { %v4570_v49 = vadd.f32 %v4559_v48, %v7853_v56  ;;  %v5947_v50 = vpop.f32.mrb[41].mxu1  ;;  %v4563_v27 = vadd.f32 %v4559_v48, %v4487_v57 }
0x4b5c   :  { %4572 = vrot.lane.b32.xlu1 %v4570_v49, %s6774_s26  ;;  %v5234_v5 = vmul.f32 -1.442695, %v4563_v27 }
0x4b5e   :  { %6480 = vpow2.f32 %v5234_v5 }
0x4b60   :  { %4594 = vperm.xlu1 %6310, %v7637_v36  }
0x4b68   :  { %v6481_v28 = vpop.eup %6480 }
0x4b69   :  { %v4567_v29 = vadd.f32 1.0, %v6481_v28 }
0x4b6b   :  { %6482 = vrcp.f32 %v4567_v29 }
0x4b75   :  { %v6483_v30 = vpop.eup %6482 }
0x4b76   :  { %v4582_v62 = vsub.f32 1.0, %v6483_v30  ;;  %v4588_v54 = vmul.f32 %v6483_v30, %v4486_v47 }
0x4bce   :  { %v4573_v31 = vpop.permute.xlu1 %4572 }
0x4bcf   :  { %v4575_v8 = vmul.f32 %v6483_v30, %v4573_v31 }
0x4bd1   :  { %4577 = vrot.lane.b32.xlu0 %v4575_v8, %s6774_s26 }
0x4bdf   :  { %v4595_v4 = vpop.permute.xlu1 %4594 }
0x4c43   :  { %v4578_v38 = vpop.permute.xlu0 %4577 }
0x4c44   :  { %v4580_v34 = vadd.f32 %v4578_v38, %v4487_v57  ;;  %v4711_v57 = vld [vmem:[#allocation2] sm:$0xff] }
0x4c46   :  { %6484 = vtanh.f32 %v4580_v34  ;;  %v4829_v34 = vld [vmem:[%s8045_s18 + $0x8] sm:$0xff] }
0x4c50   :  { %v6485_v51 = vpop.eup %6484 }
0x4c51   :  { %4584 = vrot.lane.b32.xlu0 %v6485_v51, %s6776_s25 }
0x4cc3   :  { %v4585_v36 = vpop.permute.xlu0 %4584 }
0x4cc4   :  { %v4587_v53 = vmul.f32 %v4585_v36, %v4582_v62  ;;  %v4831_v36 = vld [vmem:[%s8045_s18 + $0x18] sm:$0xff] }
0x4cc6   :  { %v4589_v63 = vadd.f32 %v4588_v54, %v4587_v53 }
0x4cc8   :  { %v4591_v0 = vsub.f32 %v4589_v63, %v4486_v47 }
0x4cca   :  { %v4597_v55 = vmul.f32 %v4595_v4, %v4591_v0  ;;  %v4832_v0 = vld [vmem:[%s8045_s18 + $0x20] sm:$0xff]  ;;  %v4833_v4 = vld [vmem:[%s8045_s18 + $0x28] sm:$0xff] }
0x4ccc   :  { %v4598_v18 = vadd.f32 %v4597_v55, %v4486_v47 }
0x4cce   :  { %4601 = vrot.lane.b32.xlu1 %v4598_v18, %s6776_s25 }
0x4d40   :  { %v4602_v60 = vpop.permute.xlu1 %4601 }
0x4d41   :  { %5957 = vmatmul.mubr.msk.f32.vlgmr.msra.gmra.mrb[50].mxu0 %vm242_vm1, %v4602_v60 }
0x4d42   :  { %5986 = vmatprep.mubr.msk.f32.mxu0 %vm6772_vm0, %v6773_v2 }
0x4e14   :  { %v4671_v10 = vpop.f32.mrb[50].mxu0 }
0x4e15   :  { %v4682_v35 = vadd.f32 %v4671_v10, %v7853_v56  ;;  %v5958_v6 = vpop.f32.mrb[51].mxu0  ;;  %v4675_v58 = vadd.f32 %v4671_v10, %v4599_v40 }
0x4e16   :  { %v4834_v6 = vld [vmem:[%s8045_s18 + $0x30] sm:$0xff] }
0x4e17   :  { %4684 = vrot.lane.b32.xlu0 %v4682_v35, %s6774_s26  ;;  %v5237_v37 = vmul.f32 -1.442695, %v4675_v58 }
0x4e19   :  { %6486 = vpow2.f32 %v5237_v37 }
0x4e1b   :  { %4706 = vperm.xlu0 %6311, %v5238_v42   ;;  %v4835_v42 = vld [vmem:[%s8045_s18 + $0x38] sm:$0xff] }
0x4e1c   :  { %v6261_v58 = vpack.c.bf16 %v4835_v42, %v4834_v6 }
0x4e23   :  { %v6487_v59 = vpop.eup %6486 }
0x4e24   :  { %v4679_v61 = vadd.f32 1.0, %v6487_v59 }
0x4e26   :  { %6488 = vrcp.f32 %v4679_v61 }
0x4e30   :  { %v6489_v52 = vpop.eup %6488 }
0x4e31   :  { %v4694_v39 = vsub.f32 1.0, %v6489_v52  ;;  %v4700_v14 = vmul.f32 %v6489_v52, %v4598_v18 }
0x4e89   :  { %v4685_v9 = vpop.permute.xlu0 %4684 }
0x4e8a   :  { %v4687_v16 = vmul.f32 %v6489_v52, %v4685_v9  ;;  %v4917_v52 = vld [vmem:[#allocation24] sm:$0xff]  ;;  %v4918_v9 = vld [vmem:[#allocation24 + $0x8] sm:$0xff] }
0x4e8c   :  { %4689 = vrot.lane.b32.xlu1 %v4687_v16, %s6774_s26 }
0x4e9a   :  { %v4707_v26 = vpop.permute.xlu0 %4706 }
0x4efe   :  { %v4690_v12 = vpop.permute.xlu1 %4689 }
0x4eff   :  { %v4692_v13 = vadd.f32 %v4690_v12, %v4599_v40 }
0x4f01   :  { %6490 = vtanh.f32 %v4692_v13  ;;  %v6264_v13 = vpack.c.bf16 %v4918_v9, %v4917_v52 }
0x4f02   :  { %6492 = vpow2.f32 %v5199_v23 }
0x4f0b   :  { %v6491_v20 = vpop.eup %6490 }
0x4f0c   :  { %4696 = vrot.lane.b32.xlu1 %v6491_v20, %s6776_s25  ;;  %v6493_v24 = vpop.eup %6492 }
0x4f0d   :  { %v3583_v19 = vadd.f32 1.0, %v6493_v24 }
0x4f0f   :  { %6494 = vrcp.f32 %v3583_v19 }
0x4f10   :  { %3588 = vrot.lane.b32.xlu1 %v3586_v21, %s6774_s26 }
0x4f19   :  { %v6495_v3 = vpop.eup %6494 }
0x4f1a   :  { %v3598_v55 = vsub.f32 1.0, %v6495_v3  ;;  %v3604_v10 = vmul.f32 %v6495_v3, %v7833_v15 }
0x4f7e   :  { %v4697_v41 = vpop.permute.xlu1 %4696 }
0x4f7f   :  { %v4699_v32 = vmul.f32 %v4697_v41, %v4694_v39 }
0x4f81   :  { %v4701_v43 = vadd.f32 %v4700_v14, %v4699_v32 }
0x4f82   :  { %v3589_v44 = vpop.permute.xlu1 %3588 }
0x4f83   :  { %v4703_v45 = vsub.f32 %v4701_v43, %v4598_v18  ;;  %v3591_v17 = vmul.f32 %v6495_v3, %v3589_v44  ;;  %v4919_v43 = vld [vmem:[#allocation24 + $0x10] sm:$0xff]  ;;  %v4920_v3 = vld [vmem:[#allocation24 + $0x18] sm:$0xff] }
0x4f84   :  { %v6267_v44 = vpack.c.bf16 %v4920_v3, %v4919_v43 }
0x4f85   :  { %v4709_v46 = vmul.f32 %v4707_v26, %v4703_v45  ;;  %3593 = vrot.lane.b32.xlu1 %v3591_v17, %s6774_s26  ;;  %v5001_v45 = vld [vmem:[%s8049_s22] sm:$0xff]  ;;  %v5002_v17 = vld [vmem:[%s8049_s22 + $0x8] sm:$0xff] }
0x4f86   :  { %v5241_v26 = vld [vmem:[%s8046_s19] ss:$0 sm:$0xff] }
0x4f87   :  { %v7947_v47 = vadd.f32 %v4709_v46, %v4598_v18  ;;  %v6258_v18 = vpack.c.bf16 %v4833_v4, %v4832_v0 }
0x4f89   :  { %4713 = vrot.lane.b32.xlu0 %v7947_v47, %s6776_s25  ;;  %3610 = vperm.xlu1 %6310, %v7860_v25  }
0x4f8d   :  { %4818 = vperm.xlu1 %6310, %v4814_v11  }
0x4ff7   :  { %v3594_v29 = vpop.permute.xlu1 %3593 }
0x4ff8   :  { %v3596_v30 = vadd.f32 %v3594_v29, %v7800_v33  ;;  %v4830_v33 = vld [vmem:[%s8045_s18 + $0x10] sm:$0xff] }
0x4ff9   :  { %v6255_v54 = vpack.c.bf16 %v4831_v36, %v4830_v33 }
0x4ffb   :  { %v4714_v7 = vpop.permute.xlu0 %4713 }
0x4ffc   :  { %5968 = vmatmul.mubr.msk.f32.vlgmr.msra.gmra.mrb[42].mxu1 %vm242_vm1, %v4714_v7 }
0x4ffd   :  { %5997 = vmatprep.mubr.msk.f32.mxu1 %vm6772_vm0, %v6773_v2  ;;  %6265 = vmatpush3.bf16.msra.mxu1 %v6264_v13 }
0x4ffe   :  { %6266 = vmatprep.subr.bf16.mxu1 %v6771_v1 }
0x5001   :  { %6268 = vmatpush3.bf16.msra.mxu1 %v6267_v44 }
0x5002   :  { %6269 = vmatprep.subr.bf16.mxu1 %v6771_v1 }
0x5008   :  { %v3611_v59 = vpop.permute.xlu1 %3610 }
0x500c   :  { %v4819_v39 = vpop.permute.xlu1 %4818 }
0x50cf   :  { %v4783_v48 = vpop.f32.mrb[42].mxu1 }
0x50d0   :  { %v4794_v49 = vadd.f32 %v4783_v48, %v7853_v56  ;;  %v5969_v50 = vpop.f32.mrb[43].mxu1  ;;  %v4787_v27 = vadd.f32 %v4783_v48, %v4711_v57  ;;  %v4828_v56 = vld [vmem:[%s8045_s18] sm:$0xff]  ;;  %v5003_v48 = vld [vmem:[%s8049_s22 + $0x10] sm:$0xff] }
0x50d1   :  { %v6252_v51 = vpack.c.bf16 %v4829_v34, %v4828_v56 }
0x50d2   :  { %4796 = vrot.lane.b32.xlu0 %v4794_v49, %s6774_s26  ;;  %v5240_v25 = vmul.f32 -1.442695, %v4787_v27  ;;  %v5004_v49 = vld [vmem:[%s8049_s22 + $0x18] sm:$0xff] }
0x50d3   :  { %6253 = vmatpush3.bf16.msra.mxu0 %v6252_v51  ;;  %v6273_v50 = vpack.c.bf16 %v5004_v49, %v5003_v48 }
0x50d4   :  { %6496 = vpow2.f32 %v5240_v25  ;;  %6254 = vmatprep.subr.bf16.mxu0 %v6771_v1 }
0x50d7   :  { %6256 = vmatpush3.bf16.msra.mxu0 %v6255_v54 }
0x50d8   :  { %6257 = vmatprep.subr.bf16.mxu0 %v6771_v1 }
0x50db   :  { %6259 = vmatpush3.bf16.msra.mxu0 %v6258_v18 }
0x50dc   :  { %6260 = vmatprep.subr.bf16.mxu0 %v6771_v1 }
0x50de   :  { %v6497_v5 = vpop.eup %6496 }
0x50df   :  { %v4791_v28 = vadd.f32 1.0, %v6497_v5  ;;  %6262 = vmatpush3.bf16.msra.mxu0 %v6261_v58 }
0x50e1   :  { %6498 = vrcp.f32 %v4791_v28 }
0x50e2   :  { %6500 = vtanh.f32 %v3596_v30 }
0x50eb   :  { %v6499_v31 = vpop.eup %6498 }
0x50ec   :  { %v6501_v62 = vpop.eup %6500  ;;  %v4806_v20 = vsub.f32 1.0, %v6499_v31  ;;  %v4812_v22 = vmul.f32 %v6499_v31, %v7947_v47 }
0x5144   :  { %v4797_v8 = vpop.permute.xlu0 %4796 }
0x5145   :  { %v4799_v38 = vmul.f32 %v6499_v31, %v4797_v8 }
0x5147   :  { %4801 = vrot.lane.b32.xlu0 %v4799_v38, %s6774_s26 }
0x514b   :  { %3600 = vrot.lane.b32.xlu0 %v6501_v62, %s6776_s25 }
0x51b9   :  { %v4802_v53 = vpop.permute.xlu0 %4801 }
0x51ba   :  { %v4804_v63 = vadd.f32 %v4802_v53, %v4711_v57  ;;  %v5243_v57 = vld [vmem:[%s8080_s24] ss:$0 sm:$0xff] }
0x51bc   :  { %6502 = vtanh.f32 %v4804_v63 }
0x51bd   :  { %v3601_v60 = vpop.permute.xlu0 %3600 }
0x51be   :  { %v3603_v35 = vmul.f32 %v3601_v60, %v3598_v55 }
0x51c0   :  { %v3605_v40 = vadd.f32 %v3604_v10, %v3603_v35 }
0x51c2   :  { %v3607_v37 = vsub.f32 %v3605_v40, %v7833_v15 }
0x51c4   :  { %v3613_v61 = vmul.f32 %v3611_v59, %v3607_v37 }
0x51c6   :  { %v6503_v16 = vpop.eup %6502  ;;  %v3614_v12 = vadd.f32 %v3613_v61, %v7833_v15 }
0x51c7   :  { %4808 = vrot.lane.b32.xlu0 %v6503_v16, %s6776_s25 }
0x51c8   :  { %4824 = vrot.lane.b32.xlu1 %v3614_v12, %s6776_s25 }
0x5239   :  { %v4809_v21 = vpop.permute.xlu0 %4808 }
0x523a   :  { %v4811_v23 = vmul.f32 %v4809_v21, %v4806_v20  ;;  %v4825_v14 = vpop.permute.xlu1 %4824 }
0x523c   :  { %v4813_v24 = vadd.f32 %v4812_v22, %v4811_v23 }
0x523e   :  { %v4815_v19 = vsub.f32 %v4813_v24, %v7947_v47 }
0x5240   :  { %v4821_v41 = vmul.f32 %v4819_v39, %v4815_v19 }
0x5242   :  { %v4822_v15 = vadd.f32 %v4821_v41, %v7947_v47  ;;  %v6270_v47 = vpack.c.bf16 %v5002_v17, %v5001_v45 }
0x5244   :  { %v4827_v32 = vsel %vm242_vm1, %v4825_v14, %v4822_v15 }
0x5245   :  { %5987 = vmatmul.mubr.msk.f32.vlgmr.msra.gmra.mrb[52].mxu0 %vm4843_vm3, %v4827_v32 }
0x5318   :  { %v4913_v46 = vpop.f32.mrb[52].mxu0 }
0x5319   :  { %v4914_v11 = vadd.f32 %v5241_v26, %v4913_v46  ;;  %v5988_v7 = vpop.f32.mrb[53].mxu0 }
0x531b   :  { %5998 = vmatmul.mubr.msk.f32.vlgmr.msra.gmra.mrb[44].mxu1 %vm242_vm1, %v4914_v11 }
0x531c   :  { %6271 = vmatpush3.bf16.msra.mxu1 %v6270_v47  ;;  %6008 = vmatprep.mubr.msk.f32.mxu1 %vm6772_vm0, %v6773_v2 }
0x531d   :  { %6272 = vmatprep.subr.bf16.mxu1 %v6771_v1  ;;  %v5245_v1 = vld [vmem:[#allocation7] ss:$0 sm:$0xff] }
0x5320   :  { %6274 = vmatpush3.bf16.msra.mxu1 %v6273_v50 }
0x53ee   :  { %v4997_v27 = vpop.f32.mrb[44].mxu1 }
0x53ef   :  { %v4998_v25 = vadd.f32 %v5243_v57, %v4997_v27  ;;  %v5999_v5 = vpop.f32.mrb[45].mxu1 }
0x53f1   :  { %6009 = vmatmul.mubr.msk.f32.vlgmr.msra.gmra.mrb[46].mxu1 %vm242_vm1, %v4998_v25 }
0x54c4   :  { %v5081_v2 = vpop.f32.mrb[46].mxu1 }
0x54c5   :  { %v5082_v28 = vadd.f32 %v5245_v1, %v5081_v2  ;;  %v6010_v29 = vpop.f32.mrb[47].mxu1 }
0x54c7   :  { %5086 = vst.msk [vmem:[%s8081_s0] sm:$0xff] %vm5085_vm4, %v5082_v28 }
0x54c8   :  { %5091 = vsyncpa [#allocation9], 1 }
0x54c9   :  { %5092 = vsyncpa [#allocation11], 1 }
0x54ca   :  { %5093 = vsyncpa [#allocation14], 1 }
0x54cb   :  { %5094 = vsyncpa [#allocation17], 1 }
0x54cc   :  { %5095 = vsyncpa [#allocation20], 1 }
0x54cd   :  { %5096 = vsyncpa [#allocation23], 1 }

</bundles_post_ra>
